<compile_context>
chip_gen: v6e
topology: v6e:2x2x1
jax: 0.10.0
libtpu: 0.0.40
codegen_flags: <defaults>
</compile_context>

<pallas_src>
import jax
import jax.numpy as jnp
from jax.experimental import pallas as pl
from jax.experimental.pallas import tpu as pltpu


# ---------------------------------------------------------------------------
# Kernel: full MLP forward for one batch tile.
#   h1 = relu(x  @ W1 + b1)   [tb,160]  @ [160,512]   (bf16 x bf16 -> f32)
#   h2 = relu(h1 @ W2 + b2)   [tb,512]  @ [512,1024]
#   h3 = relu(h2 @ W3 + b3)   [tb,1024] @ [1024,256]
#   o  = sum(h3 * w4_row) + b4            (VPU mul + lane reduce, no MXU pass)
# Output is written lane-dense as a (1, 1, tb) row.
# ---------------------------------------------------------------------------
def _mlp_kernel(x_ref,
                w1_ref, b1_ref,
                w2_ref, b2_ref,
                w3_ref, b3_ref,
                w4_ref, b4_ref,
                o_ref):
    # Layer 1: bf16 operands, f32 accumulation; bias + ReLU in f32 (VPU).
    h = jnp.dot(x_ref[...], w1_ref[...],
                preferred_element_type=jnp.float32) + b1_ref[...]
    h = jnp.maximum(h, 0.0)

    # Layer 2
    h = jnp.dot(h.astype(jnp.bfloat16), w2_ref[...],
                preferred_element_type=jnp.float32) + b2_ref[...]
    h = jnp.maximum(h, 0.0)

    # Layer 3
    h = jnp.dot(h.astype(jnp.bfloat16), w3_ref[...],
                preferred_element_type=jnp.float32) + b3_ref[...]
    h = jnp.maximum(h, 0.0)

    # Layer 4 (output dim 1): VPU multiply + cross-lane reduce in f32.
    # (tb,) + (1,1) broadcast -> (1, tb); reshape to the (1, 1, tb) out block.
    o = jnp.sum(h * w4_ref[...], axis=-1) + b4_ref[...]
    o_ref[...] = o.reshape(o_ref.shape).astype(o_ref.dtype)


def prepare_params(params):
    """One-time conversion of f32 params to kernel-ready operands.

    Call this once and cache/reuse the result; this keeps the f32->bf16
    weight conversion (separate XLA ops, ~5 MiB of HBM traffic) out of every
    forward call.
    """
    (w1, b1), (w2, b2), (w3, b3), (w4, b4) = params
    return (
        jnp.asarray(w1, jnp.bfloat16),
        jnp.asarray(b1, jnp.float32).reshape(1, -1),
        jnp.asarray(w2, jnp.bfloat16),
        jnp.asarray(b2, jnp.float32).reshape(1, -1),
        jnp.asarray(w3, jnp.bfloat16),
        jnp.asarray(b3, jnp.float32).reshape(1, -1),
        jnp.asarray(w4, jnp.float32).reshape(1, -1),   # [1,256] row, VPU reduce
        jnp.asarray(b4, jnp.float32).reshape(1, 1),
    )


def _round_up(v, m):
    return ((v + m - 1) // m) * m


def _build_call(x_bf, weights, tb, num_tiles, vmem_limit, cost,
                single_buffer_weights):
    if single_buffer_weights:
        def wspec(a):
            return pl.BlockSpec(a.shape, lambda i: (0, 0),
                                pipeline_mode=pl.Buffered(1))
    else:
        def wspec(a):
            return pl.BlockSpec(a.shape, lambda i: (0, 0))

    return pl.pallas_call(
        _mlp_kernel,
        out_shape=jax.ShapeDtypeStruct((num_tiles, 1, tb), jnp.float32),
        grid_spec=pltpu.PrefetchScalarGridSpec(
            num_scalar_prefetch=0,
            grid=(num_tiles,),
            in_specs=[pl.BlockSpec((tb, 160), lambda i: (i, 0))]   # x tile
                     + [wspec(a) for a in weights],                # resident
            out_specs=pl.BlockSpec((1, 1, tb), lambda i: (i, 0, 0)),
        ),
        compiler_params=pltpu.CompilerParams(
            dimension_semantics=("parallel",),
            vmem_limit_bytes=vmem_limit,
        ),
        cost_estimate=cost,
    )(x_bf, *weights)


def k_modulus_full_forward(x, prepared_params, *, batch_tile=1024):
    """x: [B, 2, 40, 2] float32 (or already [B, 160]).  Returns [B, 1] f32.

    `prepared_params` must come from prepare_params() (cached bf16 weights).
    `batch_tile`: sweep 512/1024 for large B on v6e/v7x; 256-512 is enough on
    v5e (MXU-bound there already).
    """
    B = x.shape[0]
    x_flat = x.reshape(B, -1)                      # nn.Flatten() semantics
    assert x_flat.shape[1] == 160, \
        f"expected 160 flattened features, got {x_flat.shape[1]}"

    weights = tuple(prepared_params)
    x_bf = x_flat.astype(jnp.bfloat16)

    # Tile selection: as large as batch_tile, but no larger than ~half the
    # batch (rounded to 16 for bf16 sublane packing) so the grid has >= 2
    # steps whenever possible -> both v7x TensorCores get work.
    half = pl.cdiv(B, 2)
    tb = min(int(batch_tile), max(16, _round_up(half, 16)))
    num_tiles = pl.cdiv(B, tb)
    padded_B = num_tiles * tb
    if padded_B != B:
        x_bf = jnp.pad(x_bf, ((0, padded_B - B), (0, 0)))

    # Rough VMEM budget for the chosen tile (weights + double-buffered x/out
    # + fused f32/bf16 intermediates), with headroom; capped at 48 MiB so the
    # kernel stays comfortable inside v7x's 64 MiB per-TC VMEM.
    weight_bytes = sum(int(a.size) * a.dtype.itemsize for a in weights)
    x_tile_bytes = 2 * tb * 160 * 2
    out_tile_bytes = 2 * tb * 4
    interm_bytes = tb * (512 * 6 + 1024 * 6 + 256 * 8)
    vmem_est = weight_bytes + x_tile_bytes + out_tile_bytes + interm_bytes
    vmem_limit = int(min(48 * 1024 * 1024,
                         max(32 * 1024 * 1024, vmem_est * 3 // 2)))

    n_mm = 160 * 512 + 512 * 1024 + 1024 * 256
    cost = pl.CostEstimate(
        flops=2 * padded_B * (n_mm + 256),
        transcendentals=0,
        bytes_accessed=int(padded_B * (160 * 2 + 4)        # x bf16 in, out f32
                           + n_mm * 2                      # bf16 weights
                           + (512 + 1024 + 256 + 256 + 1) * 4),
    )

    try:
        out = _build_call(x_bf, weights, tb, num_tiles, vmem_limit, cost,
                          single_buffer_weights=True)
    except Exception:
        # TODO(synk): drop this fallback once pl.Buffered(1) on constant
        # weight blocks is confirmed available on the deployed JAX version.
        out = _build_call(x_bf, weights, tb, num_tiles, vmem_limit, cost,
                          single_buffer_weights=False)

    # (num_tiles, 1, tb) lane-dense output -> [B, 1]; padded rows sliced off.
    return out.reshape(-1)[:B].reshape(B, 1)


# ---------------------------------------------------------------------------
# Deterministic parameter init (PyTorch nn.Linear default: U(-1/sqrt(fan_in), +))
# ---------------------------------------------------------------------------
def init_params(key):
    dims = [(160, 512), (512, 1024), (1024, 256), (256, 1)]
    params = []
    for (fan_in, fan_out) in dims:
        key, kw, kb = jax.random.split(key, 3)
        bound = 1.0 / (fan_in ** 0.5)
        w = jax.random.uniform(kw, (fan_in, fan_out), jnp.float32, -bound, bound)
        b = jax.random.uniform(kb, (fan_out,), jnp.float32, -bound, bound)
        params.append((w, b))
    return params


def _reference_forward_f32(x, params):
    """Pure f32 reference = exact PyTorch module semantics."""
    h = x.reshape(x.shape[0], -1)
    (w1, b1), (w2, b2), (w3, b3), (w4, b4) = params
    h = jnp.maximum(h @ w1 + b1, 0.0)
    h = jnp.maximum(h @ w2 + b2, 0.0)
    h = jnp.maximum(h @ w3 + b3, 0.0)
    return h @ w4 + b4


def _reference_forward_matched(x, params):
    """Reference with the same bf16-operand / f32-accumulation scheme as the kernel."""
    (w1, b1), (w2, b2), (w3, b3), (w4, b4) = params
    h = x.reshape(x.shape[0], -1).astype(jnp.bfloat16)
    h = jnp.maximum(jnp.dot(h, w1.astype(jnp.bfloat16),
                            preferred_element_type=jnp.float32) + b1, 0.0)
    h = jnp.maximum(jnp.dot(h.astype(jnp.bfloat16), w2.astype(jnp.bfloat16),
                            preferred_element_type=jnp.float32) + b2, 0.0)
    h = jnp.maximum(jnp.dot(h.astype(jnp.bfloat16), w3.astype(jnp.bfloat16),
                            preferred_element_type=jnp.float32) + b3, 0.0)
    return jnp.sum(h * w4.reshape(1, -1), axis=-1, keepdims=True) + b4.reshape(1, -1)


if __name__ == "__main__":
    key = jax.random.PRNGKey(0)
    key, kx = jax.random.split(key)

    # Small, module-consistent input: batch=8, flattens to 160 features.
    x = jax.random.normal(kx, (8, 2, 40, 2), jnp.float32)
    raw_params = init_params(key)

    # One-time weight preparation (cache this in real use).
    params = jax.block_until_ready(prepare_params(raw_params))

    out = k_modulus_full_forward(x, params)
    out = jax.block_until_ready(out)
    assert out.shape == (8, 1)

    # Tight check vs a reference using the same bf16-operand / f32-accum scheme.
    ref_matched = _reference_forward_matched(x, raw_params)
    assert jnp.allclose(out, ref_matched, rtol=1e-2, atol=1e-2), \
        "mismatch vs bf16-matched reference"

    # Sanity check vs the exact f32 PyTorch semantics (bf16 operand rounding).
    ref_f32 = _reference_forward_f32(x, raw_params)
    assert jnp.allclose(out, ref_f32, rtol=5e-2, atol=5e-2), \
        "mismatch vs f32 reference"

    print("KERNEL_OK")
</pallas_src>

<mosaic_0001>
module attributes {stable_mosaic.version = 11 : i64} {
  func.func @_mlp_kernel(%arg0: i32, %arg1: memref<16x160xbf16, #tpu.memory_space<vmem>>, %arg2: memref<160x512xbf16, #tpu.memory_space<vmem>>, %arg3: memref<1x512xf32, #tpu.memory_space<vmem>>, %arg4: memref<512x1024xbf16, #tpu.memory_space<vmem>>, %arg5: memref<1x1024xf32, #tpu.memory_space<vmem>>, %arg6: memref<1024x256xbf16, #tpu.memory_space<vmem>>, %arg7: memref<1x256xf32, #tpu.memory_space<vmem>>, %arg8: memref<1x256xf32, #tpu.memory_space<vmem>>, %arg9: memref<1x1xf32, #tpu.memory_space<vmem>>, %arg10: memref<1x1x16xf32, #tpu.memory_space<vmem>>) attributes {dimension_semantics = [#tpu.dimension_semantics<parallel>], iteration_bounds = array<i64: 1>, scalar_prefetch = 0 : i64, scratch_operands = 0 : i64, tpu.core_type = #tpu.core_type<tc>, window_params = [{transform_indices = @transform_0, window_bounds = array<i64: 16, 160>}, {pipeline_mode = #tpu.pipeline_mode<synchronous>, transform_indices = @transform_1, window_bounds = array<i64: 160, 512>}, {pipeline_mode = #tpu.pipeline_mode<synchronous>, transform_indices = @transform_2, window_bounds = array<i64: 1, 512>}, {pipeline_mode = #tpu.pipeline_mode<synchronous>, transform_indices = @transform_3, window_bounds = array<i64: 512, 1024>}, {pipeline_mode = #tpu.pipeline_mode<synchronous>, transform_indices = @transform_4, window_bounds = array<i64: 1, 1024>}, {pipeline_mode = #tpu.pipeline_mode<synchronous>, transform_indices = @transform_5, window_bounds = array<i64: 1024, 256>}, {pipeline_mode = #tpu.pipeline_mode<synchronous>, transform_indices = @transform_6, window_bounds = array<i64: 1, 256>}, {pipeline_mode = #tpu.pipeline_mode<synchronous>, transform_indices = @transform_7, window_bounds = array<i64: 1, 256>}, {pipeline_mode = #tpu.pipeline_mode<synchronous>, transform_indices = @transform_8, window_bounds = array<i64: 1, 1>}, {transform_indices = @transform_9, window_bounds = array<i64: 1, 1, 16>}]} {
    %c0 = arith.constant 0 : index
    %c0_0 = arith.constant 0 : index
    %0 = vector.load %arg1[%c0, %c0_0] : memref<16x160xbf16, #tpu.memory_space<vmem>>, vector<16x160xbf16>
    %c0_1 = arith.constant 0 : index
    %c0_2 = arith.constant 0 : index
    %1 = vector.load %arg2[%c0_1, %c0_2] : memref<160x512xbf16, #tpu.memory_space<vmem>>, vector<160x512xbf16>
    %cst = arith.constant dense<0.000000e+00> : vector<16x512xf32>
    %2 = tpu.matmul %0, %1, %cst {dimension_numbers = #tpu.dot_dimension_numbers<[1], [0], [0], [1], [0, 0, 1, 1], [], []>} : vector<16x160xbf16>, vector<160x512xbf16>, vector<16x512xf32> -> vector<16x512xf32>
    %c0_3 = arith.constant 0 : index
    %c0_4 = arith.constant 0 : index
    %3 = vector.load %arg3[%c0_3, %c0_4] : memref<1x512xf32, #tpu.memory_space<vmem>>, vector<1x512xf32>
    %4 = vector.broadcast %3 : vector<1x512xf32> to vector<16x512xf32>
    %5 = arith.addf %2, %4 : vector<16x512xf32>
    %cst_5 = arith.constant 0.000000e+00 : f32
    %6 = vector.broadcast %cst_5 : f32 to vector<16x512xf32>
    %7 = arith.maximumf %5, %6 : vector<16x512xf32>
    %8 = arith.truncf %7 : vector<16x512xf32> to vector<16x512xbf16>
    %c0_6 = arith.constant 0 : index
    %c0_7 = arith.constant 0 : index
    %9 = vector.load %arg4[%c0_6, %c0_7] : memref<512x1024xbf16, #tpu.memory_space<vmem>>, vector<512x1024xbf16>
    %cst_8 = arith.constant dense<0.000000e+00> : vector<16x1024xf32>
    %10 = tpu.matmul %8, %9, %cst_8 {dimension_numbers = #tpu.dot_dimension_numbers<[1], [0], [0], [1], [0, 0, 1, 1], [], []>} : vector<16x512xbf16>, vector<512x1024xbf16>, vector<16x1024xf32> -> vector<16x1024xf32>
    %c0_9 = arith.constant 0 : index
    %c0_10 = arith.constant 0 : index
    %11 = vector.load %arg5[%c0_9, %c0_10] : memref<1x1024xf32, #tpu.memory_space<vmem>>, vector<1x1024xf32>
    %12 = vector.broadcast %11 : vector<1x1024xf32> to vector<16x1024xf32>
    %13 = arith.addf %10, %12 : vector<16x1024xf32>
    %cst_11 = arith.constant 0.000000e+00 : f32
    %14 = vector.broadcast %cst_11 : f32 to vector<16x1024xf32>
    %15 = arith.maximumf %13, %14 : vector<16x1024xf32>
    %16 = arith.truncf %15 : vector<16x1024xf32> to vector<16x1024xbf16>
    %c0_12 = arith.constant 0 : index
    %c0_13 = arith.constant 0 : index
    %17 = vector.load %arg6[%c0_12, %c0_13] : memref<1024x256xbf16, #tpu.memory_space<vmem>>, vector<1024x256xbf16>
    %cst_14 = arith.constant dense<0.000000e+00> : vector<16x256xf32>
    %18 = tpu.matmul %16, %17, %cst_14 {dimension_numbers = #tpu.dot_dimension_numbers<[1], [0], [0], [1], [0, 0, 1, 1], [], []>} : vector<16x1024xbf16>, vector<1024x256xbf16>, vector<16x256xf32> -> vector<16x256xf32>
    %c0_15 = arith.constant 0 : index
    %c0_16 = arith.constant 0 : index
    %19 = vector.load %arg7[%c0_15, %c0_16] : memref<1x256xf32, #tpu.memory_space<vmem>>, vector<1x256xf32>
    %20 = vector.broadcast %19 : vector<1x256xf32> to vector<16x256xf32>
    %21 = arith.addf %18, %20 : vector<16x256xf32>
    %cst_17 = arith.constant 0.000000e+00 : f32
    %22 = vector.broadcast %cst_17 : f32 to vector<16x256xf32>
    %23 = arith.maximumf %21, %22 : vector<16x256xf32>
    %c0_18 = arith.constant 0 : index
    %c0_19 = arith.constant 0 : index
    %24 = vector.load %arg8[%c0_18, %c0_19] : memref<1x256xf32, #tpu.memory_space<vmem>>, vector<1x256xf32>
    %25 = vector.broadcast %24 : vector<1x256xf32> to vector<16x256xf32>
    %26 = arith.mulf %23, %25 : vector<16x256xf32>
    %cst_20 = arith.constant dense<0.000000e+00> : vector<16xf32>
    %27 = vector.multi_reduction <add>, %26, %cst_20 [1] : vector<16x256xf32> to vector<16xf32>
    %c0_21 = arith.constant 0 : index
    %c0_22 = arith.constant 0 : index
    %28 = vector.load %arg9[%c0_21, %c0_22] : memref<1x1xf32, #tpu.memory_space<vmem>>, vector<1x1xf32>
    %29 = vector.shape_cast %27 : vector<16xf32> to vector<1x16xf32>
    %30 = vector.broadcast %28 : vector<1x1xf32> to vector<1x16xf32>
    %31 = arith.addf %29, %30 : vector<1x16xf32>
    %32 = vector.shape_cast %31 : vector<1x16xf32> to vector<1x1x16xf32>
    %c0_23 = arith.constant 0 : index
    %c0_24 = arith.constant 0 : index
    %c0_25 = arith.constant 0 : index
    %33 = vector.load %arg10[%c0_23, %c0_24, %c0_25] : memref<1x1x16xf32, #tpu.memory_space<vmem>>, vector<1x1x16xf32>
    tpu.vector_store %arg10[%c0_23, %c0_24, %c0_25], %32 {strides = array<i32>} : memref<1x1x16xf32, #tpu.memory_space<vmem>>, vector<1x1x16xf32>,
    return
  }
  func.func @transform_0(%arg0: i32) -> (i32, i32) {
    %c0_i32 = arith.constant 0 : i32
    %c0_i32_0 = arith.constant 0 : i32
    return %arg0, %c0_i32 : i32, i32
  }
  func.func @transform_1(%arg0: i32) -> (i32, i32) {
    %c0_i32 = arith.constant 0 : i32
    %c0_i32_0 = arith.constant 0 : i32
    %c0_i32_1 = arith.constant 0 : i32
    return %c0_i32, %c0_i32_0 : i32, i32
  }
  func.func @transform_2(%arg0: i32) -> (i32, i32) {
    %c0_i32 = arith.constant 0 : i32
    %c0_i32_0 = arith.constant 0 : i32
    %c0_i32_1 = arith.constant 0 : i32
    return %c0_i32, %c0_i32_0 : i32, i32
  }
  func.func @transform_3(%arg0: i32) -> (i32, i32) {
    %c0_i32 = arith.constant 0 : i32
    %c0_i32_0 = arith.constant 0 : i32
    %c0_i32_1 = arith.constant 0 : i32
    return %c0_i32, %c0_i32_0 : i32, i32
  }
  func.func @transform_4(%arg0: i32) -> (i32, i32) {
    %c0_i32 = arith.constant 0 : i32
    %c0_i32_0 = arith.constant 0 : i32
    %c0_i32_1 = arith.constant 0 : i32
    return %c0_i32, %c0_i32_0 : i32, i32
  }
  func.func @transform_5(%arg0: i32) -> (i32, i32) {
    %c0_i32 = arith.constant 0 : i32
    %c0_i32_0 = arith.constant 0 : i32
    %c0_i32_1 = arith.constant 0 : i32
    return %c0_i32, %c0_i32_0 : i32, i32
  }
  func.func @transform_6(%arg0: i32) -> (i32, i32) {
    %c0_i32 = arith.constant 0 : i32
    %c0_i32_0 = arith.constant 0 : i32
    %c0_i32_1 = arith.constant 0 : i32
    return %c0_i32, %c0_i32_0 : i32, i32
  }
  func.func @transform_7(%arg0: i32) -> (i32, i32) {
    %c0_i32 = arith.constant 0 : i32
    %c0_i32_0 = arith.constant 0 : i32
    %c0_i32_1 = arith.constant 0 : i32
    return %c0_i32, %c0_i32_0 : i32, i32
  }
  func.func @transform_8(%arg0: i32) -> (i32, i32) {
    %c0_i32 = arith.constant 0 : i32
    %c0_i32_0 = arith.constant 0 : i32
    %c0_i32_1 = arith.constant 0 : i32
    return %c0_i32, %c0_i32_0 : i32, i32
  }
  func.func @transform_9(%arg0: i32) -> (i32, i32, i32) {
    %c0_i32 = arith.constant 0 : i32
    %c0_i32_0 = arith.constant 0 : i32
    %c0_i32_1 = arith.constant 0 : i32
    return %arg0, %c0_i32, %c0_i32_0 : i32, i32, i32
  }
}

module attributes {stable_mosaic.version = 11 : i64} {
  func.func @_mlp_kernel(%arg0: i32, %arg1: memref<16x160xbf16, #tpu.memory_space<vmem>>, %arg2: memref<160x512xbf16, #tpu.memory_space<vmem>>, %arg3: memref<1x512xf32, #tpu.memory_space<vmem>>, %arg4: memref<512x1024xbf16, #tpu.memory_space<vmem>>, %arg5: memref<1x1024xf32, #tpu.memory_space<vmem>>, %arg6: memref<1024x256xbf16, #tpu.memory_space<vmem>>, %arg7: memref<1x256xf32, #tpu.memory_space<vmem>>, %arg8: memref<1x256xf32, #tpu.memory_space<vmem>>, %arg9: memref<1x1xf32, #tpu.memory_space<vmem>>, %arg10: memref<1x1x16xf32, #tpu.memory_space<vmem>>) attributes {dimension_semantics = [#tpu.dimension_semantics<parallel>], iteration_bounds = array<i64: 1>, scalar_prefetch = 0 : i64, scratch_operands = 0 : i64, tpu.core_type = #tpu.core_type<tc>, window_params = [{transform_indices = @transform_0, window_bounds = array<i64: 16, 160>}, {pipeline_mode = #tpu.pipeline_mode<synchronous>, transform_indices = @transform_1, window_bounds = array<i64: 160, 512>}, {pipeline_mode = #tpu.pipeline_mode<synchronous>, transform_indices = @transform_2, window_bounds = array<i64: 1, 512>}, {pipeline_mode = #tpu.pipeline_mode<synchronous>, transform_indices = @transform_3, window_bounds = array<i64: 512, 1024>}, {pipeline_mode = #tpu.pipeline_mode<synchronous>, transform_indices = @transform_4, window_bounds = array<i64: 1, 1024>}, {pipeline_mode = #tpu.pipeline_mode<synchronous>, transform_indices = @transform_5, window_bounds = array<i64: 1024, 256>}, {pipeline_mode = #tpu.pipeline_mode<synchronous>, transform_indices = @transform_6, window_bounds = array<i64: 1, 256>}, {pipeline_mode = #tpu.pipeline_mode<synchronous>, transform_indices = @transform_7, window_bounds = array<i64: 1, 256>}, {pipeline_mode = #tpu.pipeline_mode<synchronous>, transform_indices = @transform_8, window_bounds = array<i64: 1, 1>}, {transform_indices = @transform_9, window_bounds = array<i64: 1, 1, 16>}]} {
    %c0 = arith.constant 0 : index
    %c0_0 = arith.constant 0 : index
    %0 = vector.load %arg1[%c0, %c0_0] : memref<16x160xbf16, #tpu.memory_space<vmem>>, vector<16x160xbf16>
    %c0_1 = arith.constant 0 : index
    %c0_2 = arith.constant 0 : index
    %1 = vector.load %arg2[%c0_1, %c0_2] : memref<160x512xbf16, #tpu.memory_space<vmem>>, vector<160x512xbf16>
    %cst = arith.constant dense<0.000000e+00> : vector<16x512xf32>
    %2 = tpu.matmul %0, %1, %cst {dimension_numbers = #tpu.dot_dimension_numbers<[1], [0], [0], [1], [0, 0, 1, 1], [], []>} : vector<16x160xbf16>, vector<160x512xbf16>, vector<16x512xf32> -> vector<16x512xf32>
    %c0_3 = arith.constant 0 : index
    %c0_4 = arith.constant 0 : index
    %3 = vector.load %arg3[%c0_3, %c0_4] : memref<1x512xf32, #tpu.memory_space<vmem>>, vector<1x512xf32>
    %4 = vector.broadcast %3 : vector<1x512xf32> to vector<16x512xf32>
    %5 = arith.addf %2, %4 : vector<16x512xf32>
    %cst_5 = arith.constant 0.000000e+00 : f32
    %6 = vector.broadcast %cst_5 : f32 to vector<16x512xf32>
    %7 = arith.maximumf %5, %6 : vector<16x512xf32>
    %8 = arith.truncf %7 : vector<16x512xf32> to vector<16x512xbf16>
    %c0_6 = arith.constant 0 : index
    %c0_7 = arith.constant 0 : index
    %9 = vector.load %arg4[%c0_6, %c0_7] : memref<512x1024xbf16, #tpu.memory_space<vmem>>, vector<512x1024xbf16>
    %cst_8 = arith.constant dense<0.000000e+00> : vector<16x1024xf32>
    %10 = tpu.matmul %8, %9, %cst_8 {dimension_numbers = #tpu.dot_dimension_numbers<[1], [0], [0], [1], [0, 0, 1, 1], [], []>} : vector<16x512xbf16>, vector<512x1024xbf16>, vector<16x1024xf32> -> vector<16x1024xf32>
    %c0_9 = arith.constant 0 : index
    %c0_10 = arith.constant 0 : index
    %11 = vector.load %arg5[%c0_9, %c0_10] : memref<1x1024xf32, #tpu.memory_space<vmem>>, vector<1x1024xf32>
    %12 = vector.broadcast %11 : vector<1x1024xf32> to vector<16x1024xf32>
    %13 = arith.addf %10, %12 : vector<16x1024xf32>
    %cst_11 = arith.constant 0.000000e+00 : f32
    %14 = vector.broadcast %cst_11 : f32 to vector<16x1024xf32>
    %15 = arith.maximumf %13, %14 : vector<16x1024xf32>
    %16 = arith.truncf %15 : vector<16x1024xf32> to vector<16x1024xbf16>
    %c0_12 = arith.constant 0 : index
    %c0_13 = arith.constant 0 : index
    %17 = vector.load %arg6[%c0_12, %c0_13] : memref<1024x256xbf16, #tpu.memory_space<vmem>>, vector<1024x256xbf16>
    %cst_14 = arith.constant dense<0.000000e+00> : vector<16x256xf32>
    %18 = tpu.matmul %16, %17, %cst_14 {dimension_numbers = #tpu.dot_dimension_numbers<[1], [0], [0], [1], [0, 0, 1, 1], [], []>} : vector<16x1024xbf16>, vector<1024x256xbf16>, vector<16x256xf32> -> vector<16x256xf32>
    %c0_15 = arith.constant 0 : index
    %c0_16 = arith.constant 0 : index
    %19 = vector.load %arg7[%c0_15, %c0_16] : memref<1x256xf32, #tpu.memory_space<vmem>>, vector<1x256xf32>
    %20 = vector.broadcast %19 : vector<1x256xf32> to vector<16x256xf32>
    %21 = arith.addf %18, %20 : vector<16x256xf32>
    %cst_17 = arith.constant 0.000000e+00 : f32
    %22 = vector.broadcast %cst_17 : f32 to vector<16x256xf32>
    %23 = arith.maximumf %21, %22 : vector<16x256xf32>
    %c0_18 = arith.constant 0 : index
    %c0_19 = arith.constant 0 : index
    %24 = vector.load %arg8[%c0_18, %c0_19] : memref<1x256xf32, #tpu.memory_space<vmem>>, vector<1x256xf32>
    %25 = vector.broadcast %24 : vector<1x256xf32> to vector<16x256xf32>
    %26 = arith.mulf %23, %25 : vector<16x256xf32>
    %cst_20 = arith.constant dense<0.000000e+00> : vector<16xf32>
    %27 = vector.multi_reduction <add>, %26, %cst_20 [1] : vector<16x256xf32> to vector<16xf32>
    %c0_21 = arith.constant 0 : index
    %c0_22 = arith.constant 0 : index
    %28 = vector.load %arg9[%c0_21, %c0_22] : memref<1x1xf32, #tpu.memory_space<vmem>>, vector<1x1xf32>
    %29 = vector.shape_cast %27 : vector<16xf32> to vector<1x16xf32>
    %30 = vector.broadcast %28 : vector<1x1xf32> to vector<1x16xf32>
    %31 = arith.addf %29, %30 : vector<1x16xf32>
    %32 = vector.shape_cast %31 : vector<1x16xf32> to vector<1x1x16xf32>
    %c0_23 = arith.constant 0 : index
    %c0_24 = arith.constant 0 : index
    %c0_25 = arith.constant 0 : index
    %33 = vector.load %arg10[%c0_23, %c0_24, %c0_25] : memref<1x1x16xf32, #tpu.memory_space<vmem>>, vector<1x1x16xf32>
    tpu.vector_store %arg10[%c0_23, %c0_24, %c0_25], %32 {strides = array<i32>} : memref<1x1x16xf32, #tpu.memory_space<vmem>>, vector<1x1x16xf32>,
    return
  }
  func.func @transform_0(%arg0: i32) -> (i32, i32) {
    %c0_i32 = arith.constant 0 : i32
    %c0_i32_0 = arith.constant 0 : i32
    return %arg0, %c0_i32 : i32, i32
  }
  func.func @transform_1(%arg0: i32) -> (i32, i32) {
    %c0_i32 = arith.constant 0 : i32
    %c0_i32_0 = arith.constant 0 : i32
    %c0_i32_1 = arith.constant 0 : i32
    return %c0_i32, %c0_i32_0 : i32, i32
  }
  func.func @transform_2(%arg0: i32) -> (i32, i32) {
    %c0_i32 = arith.constant 0 : i32
    %c0_i32_0 = arith.constant 0 : i32
    %c0_i32_1 = arith.constant 0 : i32
    return %c0_i32, %c0_i32_0 : i32, i32
  }
  func.func @transform_3(%arg0: i32) -> (i32, i32) {
    %c0_i32 = arith.constant 0 : i32
    %c0_i32_0 = arith.constant 0 : i32
    %c0_i32_1 = arith.constant 0 : i32
    return %c0_i32, %c0_i32_0 : i32, i32
  }
  func.func @transform_4(%arg0: i32) -> (i32, i32) {
    %c0_i32 = arith.constant 0 : i32
    %c0_i32_0 = arith.constant 0 : i32
    %c0_i32_1 = arith.constant 0 : i32
    return %c0_i32, %c0_i32_0 : i32, i32
  }
  func.func @transform_5(%arg0: i32) -> (i32, i32) {
    %c0_i32 = arith.constant 0 : i32
    %c0_i32_0 = arith.constant 0 : i32
    %c0_i32_1 = arith.constant 0 : i32
    return %c0_i32, %c0_i32_0 : i32, i32
  }
  func.func @transform_6(%arg0: i32) -> (i32, i32) {
    %c0_i32 = arith.constant 0 : i32
    %c0_i32_0 = arith.constant 0 : i32
    %c0_i32_1 = arith.constant 0 : i32
    return %c0_i32, %c0_i32_0 : i32, i32
  }
  func.func @transform_7(%arg0: i32) -> (i32, i32) {
    %c0_i32 = arith.constant 0 : i32
    %c0_i32_0 = arith.constant 0 : i32
    %c0_i32_1 = arith.constant 0 : i32
    return %c0_i32, %c0_i32_0 : i32, i32
  }
  func.func @transform_8(%arg0: i32) -> (i32, i32) {
    %c0_i32 = arith.constant 0 : i32
    %c0_i32_0 = arith.constant 0 : i32
    %c0_i32_1 = arith.constant 0 : i32
    return %c0_i32, %c0_i32_0 : i32, i32
  }
  func.func @transform_9(%arg0: i32) -> (i32, i32, i32) {
    %c0_i32 = arith.constant 0 : i32
    %c0_i32_0 = arith.constant 0 : i32
    %c0_i32_1 = arith.constant 0 : i32
    return %arg0, %c0_i32, %c0_i32_0 : i32, i32, i32
  }
}

</mosaic_0001>

<bundles_post_ra>
// kernel: tpu_custom_call.1
= control target key start
LH: loop header
LB: loop body
LE: loop exit
PB: predicated region body
PF: predicated region fallthrough
CT: control target
= control target key end

     0   :  { %s4460_s0 = inlined_call_operand.hbm [shape: bf16[16,160], index: 0, kind: input, shape index: {}]   ;;  %s4461_s1 = inlined_call_operand.hbm [shape: bf16[160,512], index: 1, kind: input, shape index: {}]   ;;  %s4462_s2 = inlined_call_operand.hbm [shape: f32[1,512], index: 2, kind: input, shape index: {}]   ;;  %s4463_s3 = inlined_call_operand.hbm [shape: bf16[512,1024], index: 3, kind: input, shape index: {}]   ;;  %s4464_s4 = inlined_call_operand.vmem [shape: f32[1,1024], index: 4, kind: input, shape index: {}]   ;;  %s4465_s5 = inlined_call_operand.hbm [shape: bf16[1024,256], index: 5, kind: input, shape index: {}]   ;;  %s4466_s6 = inlined_call_operand.vmem [shape: f32[1,256], index: 6, kind: input, shape index: {}]   ;;  %s4467_s7 = inlined_call_operand.vmem [shape: f32[1,256], index: 7, kind: input, shape index: {}]   ;;  %s4468_s8 = inlined_call_operand.<no memory space> [shape: f32[1,1], index: 8, kind: input, shape index: {}]   ;;  %s4469_s9 = inlined_call_operand.hbm [shape: f32[1,1,16], index: 9, kind: output, shape index: {}]  }
   0x1   :  { %v14_v0 = vstv %s4468_s8 }
   0x2   :  { %15 = vst [vmem:[#allocation2] sm:$0x1] %v14_v0 }
   0x3   :  { %16 = vsyncpa [#allocation4], 0 }
   0x4   :  { %17 = vsyncpa [#allocation7], 0 }
   0x5   :  { %18 = vsyncpa [#allocation10], 0 }
   0x6   :  { %19 = vsyncpa [#allocation5], 0  ;;  %s4274_s11 = smov [#allocation6]  }
   0x7   :  { %s37_s12 = sshll.u32 %s4274_s11, 4  ;;  %s38_s12 = int_to_ptr.vmem [resolvable:$true] %s37_s12 }
   0x8   :  { %s4154_s13 = scalar_lea.vmem %s38_s12, 5120  ;;  %p4159_p1 = scmp.lt.s32.totalorder %s38_s12, %s38_s12 }
   0x9   :  { %p4155_p0 = scmp.ne.s32.totalorder %s38_s12, %s4154_s13  ;;  %p4160_p2 = scmp.lt.s32.totalorder %s4154_s13, %s4154_s13 }
   0xb   :  { %p4161_p3 = por %p4160_p2, %p4159_p1 }
   0xd   :  { %p4162_p4 = pnand %p4161_p3, %p4155_p0 }
   0xf   :  { %4165 = shalt.err (!%p4162_p4)
}
  0x10   :  { %s4275_s14 = smov 256   ;;  %s4276_s15 = smov 16  }
  0x11   :  { %43 = dma.hbm_to_vmem [thread:$0]  %s4461_s1, 5120, %s38_s12, [#allocation7], %s4275_s14, %s4275_s14, %s4276_s15  }
  0x12   :  { %s4277_s8 = smov [#allocation9]  }
  0x13   :  { %s59_s18 = sshll.u32 %s4277_s8, 4  ;;  %s60_s18 = int_to_ptr.vmem [resolvable:$true] %s59_s18 }
  0x14   :  { %s4174_s19 = scalar_lea.vmem %s60_s18, 32768  ;;  %p4179_p6 = scmp.lt.s32.totalorder %s60_s18, %s60_s18 }
  0x15   :  { %p4175_p5 = scmp.ne.s32.totalorder %s60_s18, %s4174_s19  ;;  %p4180_p7 = scmp.lt.s32.totalorder %s4174_s19, %s4174_s19 }
  0x17   :  { %p4181_p8 = por %p4180_p7, %p4179_p6 }
  0x19   :  { %p4182_p9 = pnand %p4181_p8, %p4175_p5 }
  0x1b   :  { %4185 = shalt.err (!%p4182_p9)
}
  0x1c   :  { %s4278_s20 = smov 512   ;;  %s4279_s21 = smov 32  }
  0x1d   :  { %65 = dma.hbm_to_vmem [thread:$0]  %s4463_s3, 32768, %s60_s18, [#allocation10], %s4278_s20, %s4278_s20, %s4279_s21  }
  0x1e   :  { %s4280_s24 = smov [#allocation3]  }
  0x1f   :  { %s25_s25 = sshll.u32 %s4280_s24, 4  ;;  %s26_s25 = int_to_ptr.vmem [resolvable:$true] %s25_s25 }
  0x20   :  { %s4194_s1 = scalar_lea.vmem %s26_s25, 256  ;;  %p4199_p11 = scmp.lt.s32.totalorder %s26_s25, %s26_s25 }
  0x21   :  { %p4195_p10 = scmp.ne.s32.totalorder %s26_s25, %s4194_s1  ;;  %p4200_p12 = scmp.lt.s32.totalorder %s4194_s1, %s4194_s1 }
  0x23   :  { %p4201_p13 = por %p4200_p12, %p4199_p11 }
  0x25   :  { %p4202_p0 = pnand %p4201_p13, %p4195_p10 }
  0x27   :  { %4205 = shalt.err (!%p4202_p0)
}
  0x28   :  { %s4281_s26 = smov 128   ;;  %s4282_s27 = smov 8  }
  0x29   :  { %31 = dma.hbm_to_vmem [thread:$0]  %s4460_s0, 256, %s26_s25, [#allocation4], %s4281_s26, %s4281_s26, %s4282_s27  }
  0x2a   :  { %s4283_s30 = smov [#allocation8]   ;;  %s4284_s3 = smov [#allocation11]  }
  0x2b   :  { %s50_s10 = sshll.u32 %s4283_s30, 4  ;;  %s73_s11 = sshll.u32 %s4284_s3, 4  ;;  %s51_s10 = int_to_ptr.vmem [resolvable:$true] %s50_s10  ;;  %s74_s11 = int_to_ptr.vmem [resolvable:$true] %s73_s11 }
  0x2c   :  { %s4214_s12 = scalar_lea.vmem %s51_s10, 64  ;;  %p4219_p2 = scmp.lt.s32.totalorder %s51_s10, %s51_s10 }
  0x2d   :  { %p4215_p1 = scmp.ne.s32.totalorder %s51_s10, %s4214_s12  ;;  %p4220_p3 = scmp.lt.s32.totalorder %s4214_s12, %s4214_s12 }
  0x2f   :  { %p4221_p4 = por %p4220_p3, %p4219_p2 }
  0x31   :  { %p4222_p5 = pnand %p4221_p4, %p4215_p1 }
  0x33   :  { %4225 = shalt.err (!%p4222_p5)
}
  0x34   :  { %53 = dma.hbm_to_vmem [thread:$0]  %s4462_s2, 64, %s51_s10, [#allocation7]  }
  0x35   :  { %s4234_s15 = scalar_lea.vmem %s74_s11, 16384  ;;  %p4239_p7 = scmp.lt.s32.totalorder %s74_s11, %s74_s11 }
  0x36   :  { %p4235_p6 = scmp.ne.s32.totalorder %s74_s11, %s4234_s15  ;;  %p4240_p8 = scmp.lt.s32.totalorder %s4234_s15, %s4234_s15 }
  0x38   :  { %p4241_p9 = por %p4240_p8, %p4239_p7 }
  0x3a   :  { %p4242_p10 = pnand %p4241_p9, %p4235_p6 }
  0x3c   :  { %4245 = shalt.err (!%p4242_p10)
}
  0x3d   :  { %79 = dma.hbm_to_vmem [thread:$0]  %s4465_s5, 16384, %s74_s11, [#allocation10], %s4281_s26, %s4281_s26, %s4282_s27  }
  0x3e   :  { %4266 = dma.done.wait [#allocation4], 256  }
  0x3f   :  { %4267 = vsyncadd [#allocation4], 4294967040 }
  0x40   :  { %4268 = dma.done.wait [#allocation7], 5184  }
  0x41   :  { %4269 = vsyncadd [#allocation7], 4294962112 }
  0x42   :  { %4270 = dma.done.wait [#allocation10], 49152  }
  0x43   :  { %4271 = vsyncadd [#allocation10], 4294918144  ;;  %v3891_v1 = vld [vmem:[#allocation6 + $0xe4] ss:$16 sps:$4 sm:$0xff]   ;;  %v3893_v2 = vld [vmem:[#allocation6 + $0xec] ss:$16 sps:$4 sm:$0xff]  }
  0x44   :  { %379 = vmatprep.subr.bf16.mxu0 %v3891_v1  ;;  %v3895_v3 = vld [vmem:[#allocation6 + $0xe0] ss:$16 sps:$4 sm:$0xff]   ;;  %v3896_v4 = vld [vmem:[#allocation6 + $0xe8] ss:$16 sps:$4 sm:$0xff]   ;;  %422 = vmatprep.subr.bf16.mxu1 %v3893_v2  ;;  %v3897_v5 = vld [vmem:[#allocation6 + $0xc4] ss:$16 sps:$4 sm:$0xff]  }
  0x45   :  { %380 = vmatpush1.bf16.msra.mxu0 %v3895_v3  ;;  %423 = vmatpush1.bf16.msra.mxu1 %v3896_v4  ;;  %v3899_v6 = vld [vmem:[#allocation6 + $0xcc] ss:$16 sps:$4 sm:$0xff]   ;;  %v3901_v7 = vld [vmem:[#allocation6 + $0xc0] ss:$16 sps:$4 sm:$0xff]   ;;  %v3902_v8 = vld [vmem:[#allocation6 + $0xc8] ss:$16 sps:$4 sm:$0xff]  }
  0x46   :  { %381 = vmatprep.subr.bf16.mxu0 %v3897_v5  ;;  %424 = vmatprep.subr.bf16.mxu1 %v3899_v6  ;;  %v3903_v9 = vld [vmem:[#allocation6 + $0xa4] ss:$16 sps:$4 sm:$0xff]   ;;  %v3905_v10 = vld [vmem:[#allocation6 + $0xac] ss:$16 sps:$4 sm:$0xff]   ;;  %v3907_v11 = vld [vmem:[#allocation6 + $0xa0] ss:$16 sps:$4 sm:$0xff]  }
  0x47   :  { %v3908_v12 = vld [vmem:[#allocation6 + $0xa8] ss:$16 sps:$4 sm:$0xff]   ;;  %v3909_v13 = vld [vmem:[#allocation6 + $0x84] ss:$16 sps:$4 sm:$0xff]   ;;  %v3911_v14 = vld [vmem:[#allocation6 + $0x8c] ss:$16 sps:$4 sm:$0xff]  }
  0x48   :  { %v3913_v15 = vld [vmem:[#allocation6 + $0x80] ss:$16 sps:$4 sm:$0xff]   ;;  %v3914_v16 = vld [vmem:[#allocation6 + $0x88] ss:$16 sps:$4 sm:$0xff]   ;;  %v3915_v17 = vld [vmem:[#allocation6 + $0x64] ss:$16 sps:$4 sm:$0xff]  }
  0x49   :  { %382 = vmatpush1.bf16.msra.mxu0 %v3901_v7  ;;  %425 = vmatpush1.bf16.msra.mxu1 %v3902_v8  ;;  %v3917_v18 = vld [vmem:[#allocation6 + $0x6c] ss:$16 sps:$4 sm:$0xff]   ;;  %v3919_v19 = vld [vmem:[#allocation6 + $0x60] ss:$16 sps:$4 sm:$0xff]   ;;  %v3920_v20 = vld [vmem:[#allocation6 + $0x68] ss:$16 sps:$4 sm:$0xff]  }
  0x4a   :  { %383 = vmatprep.subr.bf16.mxu0 %v3903_v9  ;;  %426 = vmatprep.subr.bf16.mxu1 %v3905_v10  ;;  %v3921_v21 = vld [vmem:[#allocation6 + $0x44] ss:$16 sps:$4 sm:$0xff]   ;;  %v3923_v22 = vld [vmem:[#allocation6 + $0x4c] ss:$16 sps:$4 sm:$0xff]   ;;  %v3925_v23 = vld [vmem:[#allocation6 + $0x40] ss:$16 sps:$4 sm:$0xff]  }
  0x4b   :  { %v3926_v24 = vld [vmem:[#allocation6 + $0x48] ss:$16 sps:$4 sm:$0xff]   ;;  %v3927_v25 = vld [vmem:[#allocation6 + $0x24] ss:$16 sps:$4 sm:$0xff]   ;;  %v3929_v26 = vld [vmem:[#allocation6 + $0x2c] ss:$16 sps:$4 sm:$0xff]  }
  0x4c   :  { %v3931_v27 = vld [vmem:[#allocation6 + $0x20] ss:$16 sps:$4 sm:$0xff]   ;;  %v3932_v28 = vld [vmem:[#allocation6 + $0x28] ss:$16 sps:$4 sm:$0xff]   ;;  %v3933_v29 = vld [vmem:[#allocation6 + $0x4] ss:$16 sps:$4 sm:$0xff]  }
  0x4d   :  { %384 = vmatpush1.bf16.msra.mxu0 %v3907_v11  ;;  %427 = vmatpush1.bf16.msra.mxu1 %v3908_v12  ;;  %v3935_v30 = vld [vmem:[#allocation6 + $0xc] ss:$16 sps:$4 sm:$0xff]   ;;  %vm375_vm0 = vcmask 261120   ;;  %v3937_v32 = vld [vmem:[#allocation6] ss:$16 sps:$4 sm:$0xff]   ;;  %v533_v40 = vld [vmem:[#allocation9 + $0x1c0] sm:$0xff] }
  0x4e   :  { %385 = vmatprep.subr.bf16.mxu0 %v3909_v13  ;;  %428 = vmatprep.subr.bf16.mxu1 %v3911_v14  ;;  %v3953_v31 = vld [vmem:[#allocation3 + $0x4] ss:$8 sps:$4 sm:$0xff]   ;;  %v3938_v33 = vld [vmem:[#allocation6 + $0x8] ss:$16 sps:$4 sm:$0xff]   ;;  %v3943_v36 = vld [vmem:[#allocation6 + $0x120] ss:$16 sps:$4 sm:$0xff]  }
  0x4f   :  { %v3939_v34 = vld [vmem:[#allocation6 + $0x124] ss:$16 sps:$4 sm:$0xff]   ;;  %v3941_v35 = vld [vmem:[#allocation6 + $0x12c] ss:$16 sps:$4 sm:$0xff]   ;;  %3490 = vmatprep.mubr.msk.bf16.mxu0 %vm375_vm0, %v3953_v31  ;;  %3491 = vmatprep.mubr.msk.bf16.mxu1 %vm375_vm0, %v3953_v31  ;;  %v3944_v37 = vld [vmem:[#allocation6 + $0x128] ss:$16 sps:$4 sm:$0xff]  }
  0x50   :  { %v3945_v38 = vld [vmem:[#allocation6 + $0x104] ss:$16 sps:$4 sm:$0xff]   ;;  %v3947_v39 = vld [vmem:[#allocation6 + $0x10c] ss:$16 sps:$4 sm:$0xff]   ;;  %v3949_v44 = vld [vmem:[#allocation6 + $0x100] ss:$16 sps:$4 sm:$0xff]  }
  0x51   :  { %386 = vmatpush1.bf16.msra.mxu0 %v3913_v15  ;;  %429 = vmatpush1.bf16.msra.mxu1 %v3914_v16  ;;  %v537_v41 = vld [vmem:[#allocation9 + $0x1e0] sm:$0xff]  ;;  %v3951_v52 = vld [vmem:[#allocation3] ss:$8 sps:$4 sm:$0xff]   ;;  %vm3426_vm1 = vcmask 130112   ;;  %vm3429_vm2 = vcmask 122880  }
  0x52   :  { %387 = vmatprep.subr.bf16.mxu0 %v3915_v17  ;;  %430 = vmatprep.subr.bf16.mxu1 %v3917_v18  ;;  %v661_v42 = vld [vmem:[#allocation9 + $0x5c0] sm:$0xff]  ;;  %v3549_v46 = vcombine.high %v533_v40, %v537_v41  ;;  %v3548_v53 = vcombine.low %v533_v40, %v537_v41 }
  0x53   :  { %v665_v43 = vld [vmem:[#allocation9 + $0x5e0] sm:$0xff] }
  0x54   :  { %v3950_v45 = vld [vmem:[#allocation6 + $0x108] ss:$16 sps:$4 sm:$0xff]   ;;  %v3677_v47 = vcombine.high %v661_v42, %v665_v43  ;;  %v3676_v54 = vcombine.low %v661_v42, %v665_v43 }
  0x55   :  { %388 = vmatpush1.bf16.msra.mxu0 %v3919_v19  ;;  %431 = vmatpush1.bf16.msra.mxu1 %v3920_v20  ;;  %v525_v48 = vld [vmem:[#allocation9 + $0x180] sm:$0xff] }
  0x56   :  { %389 = vmatprep.subr.bf16.mxu0 %v3921_v21  ;;  %432 = vmatprep.subr.bf16.mxu1 %v3923_v22  ;;  %v529_v49 = vld [vmem:[#allocation9 + $0x1a0] sm:$0xff] }
  0x57   :  { %v653_v50 = vld [vmem:[#allocation9 + $0x580] sm:$0xff]  ;;  %v3541_v55 = vcombine.high %v525_v48, %v529_v49  ;;  %v3540_v61 = vcombine.low %v525_v48, %v529_v49 }
  0x58   :  { %v657_v51 = vld [vmem:[#allocation9 + $0x5a0] sm:$0xff] }
  0x59   :  { %390 = vmatpush1.bf16.msra.mxu0 %v3925_v23  ;;  %433 = vmatpush1.bf16.msra.mxu1 %v3926_v24  ;;  %v3669_v56 = vcombine.high %v653_v50, %v657_v51  ;;  %v517_v57 = vld [vmem:[#allocation9 + $0x140] sm:$0xff]  ;;  %v3668_v62 = vcombine.low %v653_v50, %v657_v51 }
  0x5a   :  { %391 = vmatprep.subr.bf16.mxu0 %v3927_v25  ;;  %434 = vmatprep.subr.bf16.mxu1 %v3929_v26  ;;  %v521_v58 = vld [vmem:[#allocation9 + $0x160] sm:$0xff] }
  0x5b   :  { %v645_v59 = vld [vmem:[#allocation9 + $0x540] sm:$0xff]  ;;  %v3533_v1 = vcombine.high %v517_v57, %v521_v58  ;;  %v3532_v5 = vcombine.low %v517_v57, %v521_v58 }
  0x5c   :  { %v649_v60 = vld [vmem:[#allocation9 + $0x560] sm:$0xff] }
  0x5d   :  { %392 = vmatpush1.bf16.msra.mxu0 %v3931_v27  ;;  %435 = vmatpush1.bf16.msra.mxu1 %v3932_v28  ;;  %v509_v63 = vld [vmem:[#allocation9 + $0x100] sm:$0xff]  ;;  %v3661_v2 = vcombine.high %v645_v59, %v649_v60  ;;  %v3660_v6 = vcombine.low %v645_v59, %v649_v60 }
  0x5e   :  { %393 = vmatprep.subr.bf16.mxu0 %v3933_v29  ;;  %436 = vmatprep.subr.bf16.mxu1 %v3935_v30  ;;  %v513_v0 = vld [vmem:[#allocation9 + $0x120] sm:$0xff] }
  0x5f   :  { %v637_v3 = vld [vmem:[#allocation9 + $0x500] sm:$0xff]  ;;  %v3525_v11 = vcombine.high %v509_v63, %v513_v0  ;;  %v3524_v13 = vcombine.low %v509_v63, %v513_v0 }
  0x60   :  { %v641_v4 = vld [vmem:[#allocation9 + $0x520] sm:$0xff] }
  0x61   :  { %394 = vmatpush1.bf16.msra.mxu0 %v3937_v32  ;;  %437 = vmatpush1.bf16.msra.mxu1 %v3938_v33  ;;  %v501_v7 = vld [vmem:[#allocation9 + $0xc0] sm:$0xff]  ;;  %v3653_v12 = vcombine.high %v637_v3, %v641_v4  ;;  %v3652_v14 = vcombine.low %v637_v3, %v641_v4 }
  0x62   :  { %407 = vmatprep.subr.bf16.mxu0 %v3939_v34  ;;  %450 = vmatprep.subr.bf16.mxu1 %v3941_v35  ;;  %v505_v8 = vld [vmem:[#allocation9 + $0xe0] sm:$0xff] }
  0x63   :  { %v629_v9 = vld [vmem:[#allocation9 + $0x4c0] sm:$0xff]  ;;  %v3517_v19 = vcombine.high %v501_v7, %v505_v8  ;;  %v3516_v21 = vcombine.low %v501_v7, %v505_v8 }
  0x64   :  { %v633_v10 = vld [vmem:[#allocation9 + $0x4e0] sm:$0xff] }
  0x65   :  { %408 = vmatpush2.bf16.msra.mxu0 %v3943_v36  ;;  %451 = vmatpush2.bf16.msra.mxu1 %v3944_v37  ;;  %v493_v15 = vld [vmem:[#allocation9 + $0x80] sm:$0xff]  ;;  %v3645_v20 = vcombine.high %v629_v9, %v633_v10  ;;  %v3644_v22 = vcombine.low %v629_v9, %v633_v10 }
  0x66   :  { %409 = vmatprep.subr.bf16.mxu0 %v3945_v38  ;;  %452 = vmatprep.subr.bf16.mxu1 %v3947_v39  ;;  %v497_v16 = vld [vmem:[#allocation9 + $0xa0] sm:$0xff] }
  0x67   :  { %v621_v17 = vld [vmem:[#allocation9 + $0x480] sm:$0xff]  ;;  %v3509_v27 = vcombine.high %v493_v15, %v497_v16  ;;  %v3508_v29 = vcombine.low %v493_v15, %v497_v16 }
  0x68   :  { %v625_v18 = vld [vmem:[#allocation9 + $0x4a0] sm:$0xff] }
  0x69   :  { %410 = vmatpush2.bf16.msra.mxu0 %v3949_v44  ;;  %453 = vmatpush2.bf16.msra.mxu1 %v3950_v45  ;;  %v485_v23 = vld [vmem:[#allocation9 + $0x40] sm:$0xff]  ;;  %v3637_v28 = vcombine.high %v621_v17, %v625_v18  ;;  %v3636_v30 = vcombine.low %v621_v17, %v625_v18 }
  0x6a   :  { %2055 = vmatprep.subr.bf16.mxu0 %v3549_v46  ;;  %2098 = vmatprep.subr.bf16.mxu1 %v3677_v47  ;;  %v489_v24 = vld [vmem:[#allocation9 + $0x60] sm:$0xff] }
  0x6b   :  { %v613_v25 = vld [vmem:[#allocation9 + $0x440] sm:$0xff]  ;;  %v3501_v35 = vcombine.high %v485_v23, %v489_v24  ;;  %v3500_v37 = vcombine.low %v485_v23, %v489_v24 }
  0x6c   :  { %412 = vmatmul.mubr.bf16.vlgmr.msra.gmra.mxu0 %v3951_v52  ;;  %455 = vmatmul.mubr.bf16.vlgmr.msra.gmra.mxu1 %v3951_v52  ;;  %v617_v26 = vld [vmem:[#allocation9 + $0x460] sm:$0xff] }
  0x6d   :  { %2056 = vmatpush1.bf16.msra.mxu0 %v3548_v53  ;;  %2099 = vmatpush1.bf16.msra.mxu1 %v3676_v54  ;;  %v477_v31 = vld [vmem:[#allocation9] sm:$0xff]  ;;  %v3629_v36 = vcombine.high %v613_v25, %v617_v26  ;;  %v3628_v38 = vcombine.low %v613_v25, %v617_v26 }
  0x6e   :  { %2057 = vmatprep.subr.bf16.mxu0 %v3541_v55  ;;  %2100 = vmatprep.subr.bf16.mxu1 %v3669_v56  ;;  %v481_v32 = vld [vmem:[#allocation9 + $0x20] sm:$0xff] }
  0x6f   :  { %v605_v33 = vld [vmem:[#allocation9 + $0x400] sm:$0xff]  ;;  %v3493_v43 = vcombine.high %v477_v31, %v481_v32  ;;  %v3492_v45 = vcombine.low %v477_v31, %v481_v32 }
  0x70   :  { %v609_v34 = vld [vmem:[#allocation9 + $0x420] sm:$0xff] }
  0x71   :  { %2058 = vmatpush1.bf16.msra.mxu0 %v3540_v61  ;;  %2101 = vmatpush1.bf16.msra.mxu1 %v3668_v62  ;;  %v597_v39 = vld [vmem:[#allocation9 + $0x3c0] sm:$0xff]  ;;  %v3621_v44 = vcombine.high %v605_v33, %v609_v34  ;;  %v3620_v46 = vcombine.low %v605_v33, %v609_v34 }
  0x72   :  { %2059 = vmatprep.subr.bf16.mxu0 %v3533_v1  ;;  %2102 = vmatprep.subr.bf16.mxu1 %v3661_v2  ;;  %v601_v40 = vld [vmem:[#allocation9 + $0x3e0] sm:$0xff] }
  0x73   :  { %v725_v41 = vld [vmem:[#allocation9 + $0x7c0] sm:$0xff]  ;;  %v3613_v51 = vcombine.high %v597_v39, %v601_v40  ;;  %v3612_v53 = vcombine.low %v597_v39, %v601_v40 }
  0x74   :  { %v729_v42 = vld [vmem:[#allocation9 + $0x7e0] sm:$0xff] }
  0x75   :  { %2060 = vmatpush1.bf16.msra.mxu0 %v3532_v5  ;;  %2103 = vmatpush1.bf16.msra.mxu1 %v3660_v6  ;;  %v589_v47 = vld [vmem:[#allocation9 + $0x380] sm:$0xff]  ;;  %v3741_v52 = vcombine.high %v725_v41, %v729_v42  ;;  %v3740_v54 = vcombine.low %v725_v41, %v729_v42 }
  0x76   :  { %2061 = vmatprep.subr.bf16.mxu0 %v3525_v11  ;;  %2104 = vmatprep.subr.bf16.mxu1 %v3653_v12  ;;  %v593_v48 = vld [vmem:[#allocation9 + $0x3a0] sm:$0xff] }
  0x77   :  { %v717_v49 = vld [vmem:[#allocation9 + $0x780] sm:$0xff]  ;;  %v3605_v59 = vcombine.high %v589_v47, %v593_v48  ;;  %v3604_v61 = vcombine.low %v589_v47, %v593_v48  ;;  %v666_v47 = vld [vmem:[#allocation9 + $0x5e8] sm:$0xff] }
  0x78   :  { %v721_v50 = vld [vmem:[#allocation9 + $0x7a0] sm:$0xff] }
  0x79   :  { %2062 = vmatpush1.bf16.msra.mxu0 %v3524_v13  ;;  %2105 = vmatpush1.bf16.msra.mxu1 %v3652_v14  ;;  %v581_v55 = vld [vmem:[#allocation9 + $0x340] sm:$0xff]  ;;  %v3733_v60 = vcombine.high %v717_v49, %v721_v50  ;;  %v3732_v62 = vcombine.low %v717_v49, %v721_v50 }
  0x7a   :  { %2063 = vmatprep.subr.bf16.mxu0 %v3517_v19  ;;  %2106 = vmatprep.subr.bf16.mxu1 %v3645_v20  ;;  %v585_v56 = vld [vmem:[#allocation9 + $0x360] sm:$0xff] }
  0x7b   :  { %v709_v57 = vld [vmem:[#allocation9 + $0x740] sm:$0xff]  ;;  %v3597_v3 = vcombine.high %v581_v55, %v585_v56  ;;  %v3596_v5 = vcombine.low %v581_v55, %v585_v56 }
  0x7c   :  { %v713_v58 = vld [vmem:[#allocation9 + $0x760] sm:$0xff] }
  0x7d   :  { %2064 = vmatpush1.bf16.msra.mxu0 %v3516_v21  ;;  %2107 = vmatpush1.bf16.msra.mxu1 %v3644_v22  ;;  %v573_v63 = vld [vmem:[#allocation9 + $0x300] sm:$0xff]  ;;  %v3725_v4 = vcombine.high %v709_v57, %v713_v58  ;;  %v3724_v6 = vcombine.low %v709_v57, %v713_v58  ;;  %v144_v57 = vld [vmem:[#allocation8] sm:$0xf] }
  0x7e   :  { %2065 = vmatprep.subr.bf16.mxu0 %v3509_v27  ;;  %2108 = vmatprep.subr.bf16.mxu1 %v3637_v28  ;;  %v577_v0 = vld [vmem:[#allocation9 + $0x320] sm:$0xff] }
  0x7f   :  { %v701_v1 = vld [vmem:[#allocation9 + $0x700] sm:$0xff]  ;;  %v3589_v11 = vcombine.high %v573_v63, %v577_v0  ;;  %v3588_v13 = vcombine.low %v573_v63, %v577_v0 }
  0x80   :  { %v705_v2 = vld [vmem:[#allocation9 + $0x720] sm:$0xff] }
  0x81   :  { %2066 = vmatpush1.bf16.msra.mxu0 %v3508_v29  ;;  %2109 = vmatpush1.bf16.msra.mxu1 %v3636_v30  ;;  %v565_v7 = vld [vmem:[#allocation9 + $0x2c0] sm:$0xff]  ;;  %v3717_v12 = vcombine.high %v701_v1, %v705_v2  ;;  %v3716_v14 = vcombine.low %v701_v1, %v705_v2 }
  0x82   :  { %2067 = vmatprep.subr.bf16.mxu0 %v3501_v35  ;;  %2110 = vmatprep.subr.bf16.mxu1 %v3629_v36  ;;  %v569_v8 = vld [vmem:[#allocation9 + $0x2e0] sm:$0xff] }
  0x83   :  { %v693_v9 = vld [vmem:[#allocation9 + $0x6c0] sm:$0xff]  ;;  %v3581_v15 = vcombine.high %v565_v7, %v569_v8  ;;  %v3580_v17 = vcombine.low %v565_v7, %v569_v8 }
  0x84   :  { %v697_v10 = vld [vmem:[#allocation9 + $0x6e0] sm:$0xff] }
  0x85   :  { %2068 = vmatpush1.bf16.msra.mxu0 %v3500_v37  ;;  %2111 = vmatpush1.bf16.msra.mxu1 %v3628_v38  ;;  %v3709_v16 = vcombine.high %v693_v9, %v697_v10  ;;  %v3708_v18 = vcombine.low %v693_v9, %v697_v10  ;;  %v557_v19 = vld [vmem:[#allocation9 + $0x280] sm:$0xff] }
  0x86   :  { %2069 = vmatprep.subr.bf16.mxu0 %v3493_v43  ;;  %2112 = vmatprep.subr.bf16.mxu1 %v3621_v44  ;;  %v561_v20 = vld [vmem:[#allocation9 + $0x2a0] sm:$0xff]  ;;  %v4355_v43 = vld [vmem:[#allocation9 + $0x1c8] sm:$0xff] }
  0x87   :  { %v685_v21 = vld [vmem:[#allocation9 + $0x680] sm:$0xff]  ;;  %v3573_v22 = vcombine.high %v557_v19, %v561_v20  ;;  %v3572_v24 = vcombine.low %v557_v19, %v561_v20  ;;  %v4357_v44 = vld [vmem:[#allocation9 + $0x1e8] sm:$0xff] }
  0x88   :  { %v689_v23 = vld [vmem:[#allocation9 + $0x6a0] sm:$0xff]  ;;  %v3550_v48 = vcombine.low %v4355_v43, %v4357_v44  ;;  %v526_v20 = vld [vmem:[#allocation9 + $0x188] sm:$0xff] }
  0x89   :  { %2070 = vmatpush1.bf16.msra.mxu0 %v3492_v45  ;;  %2113 = vmatpush1.bf16.msra.mxu1 %v3620_v46  ;;  %v3700_v25 = vcombine.low %v685_v21, %v689_v23  ;;  %v3701_v26 = vcombine.high %v685_v21, %v689_v23  ;;  %v549_v27 = vld [vmem:[#allocation9 + $0x240] sm:$0xff]  ;;  %v4359_v45 = vld [vmem:[#allocation9 + $0x5c8] sm:$0xff]  ;;  %v3551_v46 = vcombine.high %v4355_v43, %v4357_v44 }
  0x8a   :  { %2071 = vmatprep.subr.bf16.mxu0 %v3613_v51  ;;  %2114 = vmatprep.subr.bf16.mxu1 %v3741_v52  ;;  %v553_v28 = vld [vmem:[#allocation9 + $0x260] sm:$0xff]  ;;  %v3678_v49 = vcombine.low %v4359_v45, %v666_v47  ;;  %v3679_v50 = vcombine.high %v4359_v45, %v666_v47  ;;  %v146_v51 = vlaneseq  ;;  %v530_v23 = vld [vmem:[#allocation9 + $0x1a8] sm:$0xff] }
  0x8b   :  { %v677_v29 = vld [vmem:[#allocation9 + $0x640] sm:$0xff]  ;;  %v3565_v30 = vcombine.high %v549_v27, %v553_v28  ;;  %v3564_v32 = vcombine.low %v549_v27, %v553_v28  ;;  %v642_v43 = vld [vmem:[#allocation9 + $0x528] sm:$0xff] }
  0x8c   :  { %v681_v31 = vld [vmem:[#allocation9 + $0x660] sm:$0xff]  ;;  %v4368_v52 = vshrl.u32 %v146_v51, 7 }
  0x8d   :  { %2072 = vmatpush2.bf16.msra.mxu0 %v3612_v53  ;;  %2115 = vmatpush2.bf16.msra.mxu1 %v3740_v54  ;;  %v3692_v33 = vcombine.low %v677_v29, %v681_v31  ;;  %v3693_v34 = vcombine.high %v677_v29, %v681_v31  ;;  %v541_v35 = vld [vmem:[#allocation9 + $0x200] sm:$0xff]  ;;  %v3543_v31 = vcombine.high %v526_v20, %v530_v23 }
  0x8e   :  { %2073 = vmatprep.subr.bf16.mxu0 %v3605_v59  ;;  %2116 = vmatprep.subr.bf16.mxu1 %v3733_v60  ;;  %v545_v36 = vld [vmem:[#allocation9 + $0x220] sm:$0xff]  ;;  %v4371_v53 = vsub.s32 1, %v4368_v52  ;;  %v160_v54 = vsub.s32 3, %v4368_v52  ;;  %v4375_v55 = vsub.s32 0, %v4368_v52  ;;  %v156_v56 = vsub.s32 2, %v4368_v52 }
  0x8f   :  { %v669_v37 = vld [vmem:[#allocation9 + $0x600] sm:$0xff]  ;;  %v3557_v38 = vcombine.high %v541_v35, %v545_v36  ;;  %v3556_v40 = vcombine.low %v541_v35, %v545_v36  ;;  %v650_v35 = vld [vmem:[#allocation9 + $0x568] sm:$0xff]  ;;  %v3542_v36 = vcombine.low %v526_v20, %v530_v23 }
  0x90   :  { %v673_v39 = vld [vmem:[#allocation9 + $0x620] sm:$0xff]  ;;  %v153_v60 = vrot.slane %v144_v57, %v4371_v53  ;;  %v157_v63 = vrot.slane %v144_v57, %v156_v56  ;;  %v602_v23 = vld [vmem:[#allocation9 + $0x3e8] sm:$0xff] }
  0x91   :  { %2074 = vmatpush2.bf16.msra.mxu0 %v3604_v61  ;;  %2117 = vmatpush2.bf16.msra.mxu1 %v3732_v62  ;;  %v3684_v41 = vcombine.low %v669_v37, %v673_v39  ;;  %v3685_v42 = vcombine.high %v669_v37, %v673_v39  ;;  %v161_v61 = vrot.slane %v144_v57, %v160_v54 }
  0x92   :  { %2075 = vmatprep.subr.bf16.mxu0 %v3597_v3  ;;  %2118 = vmatprep.subr.bf16.mxu1 %v3725_v4  ;;  %v149_v62 = vrot.slane %v144_v57, %v4375_v55  ;;  %v634_v57 = vld [vmem:[#allocation9 + $0x4e8] sm:$0xff] }
  0x95   :  { %2076 = vmatpush2.bf16.msra.mxu0 %v3596_v5  ;;  %2119 = vmatpush2.bf16.msra.mxu1 %v3724_v6 }
  0x96   :  { %2077 = vmatprep.subr.bf16.mxu0 %v3589_v11  ;;  %2120 = vmatprep.subr.bf16.mxu1 %v3717_v12 }
  0x99   :  { %2078 = vmatpush2.bf16.msra.mxu0 %v3588_v13  ;;  %2121 = vmatpush2.bf16.msra.mxu1 %v3716_v14 }
  0x9a   :  { %2079 = vmatprep.subr.bf16.mxu0 %v3581_v15  ;;  %2122 = vmatprep.subr.bf16.mxu1 %v3709_v16 }
  0x9d   :  { %2080 = vmatpush2.bf16.msra.mxu0 %v3580_v17  ;;  %2123 = vmatpush2.bf16.msra.mxu1 %v3708_v18 }
  0x9e   :  { %2081 = vmatprep.subr.bf16.mxu0 %v3573_v22  ;;  %2124 = vmatprep.subr.bf16.mxu1 %v3701_v26 }
  0xa1   :  { %2082 = vmatpush2.bf16.msra.mxu0 %v3572_v24  ;;  %2125 = vmatpush2.bf16.msra.mxu1 %v3700_v25  ;;  %v654_v24 = vld [vmem:[#allocation9 + $0x588] sm:$0xff] }
  0xa2   :  { %2083 = vmatprep.subr.bf16.mxu0 %v3565_v30  ;;  %2126 = vmatprep.subr.bf16.mxu1 %v3693_v34  ;;  %v658_v25 = vld [vmem:[#allocation9 + $0x5a8] sm:$0xff] }
  0xa3   :  { %v518_v30 = vld [vmem:[#allocation9 + $0x148] sm:$0xff]  ;;  %v3670_v37 = vcombine.low %v654_v24, %v658_v25 }
  0xa4   :  { %v646_v34 = vld [vmem:[#allocation9 + $0x548] sm:$0xff] }
  0xa5   :  { %2084 = vmatpush2.bf16.msra.mxu0 %v3564_v32  ;;  %2127 = vmatpush2.bf16.msra.mxu1 %v3692_v33  ;;  %v3671_v32 = vcombine.high %v654_v24, %v658_v25  ;;  %v522_v33 = vld [vmem:[#allocation9 + $0x168] sm:$0xff]  ;;  %v3663_v39 = vcombine.high %v646_v34, %v650_v35  ;;  %v3662_v45 = vcombine.low %v646_v34, %v650_v35 }
  0xa6   :  { %2085 = vmatprep.subr.bf16.mxu0 %v3557_v38  ;;  %2128 = vmatprep.subr.bf16.mxu1 %v3685_v42  ;;  %v3535_v38 = vcombine.high %v518_v30, %v522_v33  ;;  %v638_v42 = vld [vmem:[#allocation9 + $0x508] sm:$0xff]  ;;  %v3534_v44 = vcombine.low %v518_v30, %v522_v33 }
  0xa7   :  { %v3655_v47 = vcombine.high %v638_v42, %v642_v43  ;;  %v726_v24 = vld [vmem:[#allocation9 + $0x7c8] sm:$0xff] }
  0xa8   :  { %v730_v25 = vld [vmem:[#allocation9 + $0x7e8] sm:$0xff] }
  0xa9   :  { %2086 = vmatpush2.bf16.msra.mxu0 %v3556_v40  ;;  %2129 = vmatpush2.bf16.msra.mxu1 %v3684_v41  ;;  %v510_v40 = vld [vmem:[#allocation9 + $0x108] sm:$0xff]  ;;  %v3743_v33 = vcombine.high %v726_v24, %v730_v25 }
  0xaa   :  { %2141 = vmatprep.subr.bf16.mxu0 %v3551_v46  ;;  %2184 = vmatprep.subr.bf16.mxu1 %v3679_v50  ;;  %v514_v41 = vld [vmem:[#allocation9 + $0x128] sm:$0xff] }
  0xab   :  { %v3527_v46 = vcombine.high %v510_v40, %v514_v41  ;;  %v630_v50 = vld [vmem:[#allocation9 + $0x4c8] sm:$0xff] }
  0xac   :  { %v590_v34 = vld [vmem:[#allocation9 + $0x388] sm:$0xff] }
  0xad   :  { %v594_v35 = vld [vmem:[#allocation9 + $0x3a8] sm:$0xff] }
 0x12c   :  { %v413_v58 = vpop.f32.mrf.mxu0  ;;  %v456_v59 = vpop.f32.mrf.mxu1 }
 0x12d   :  { %v414_v8 = vadd.f32 %v413_v58, %v149_v62  ;;  %v457_v9 = vadd.f32 %v456_v59, %v157_v63  ;;  %v3526_v58 = vcombine.low %v510_v40, %v514_v41  ;;  %v3654_v59 = vcombine.low %v638_v42, %v642_v43  ;;  %v582_v42 = vld [vmem:[#allocation9 + $0x348] sm:$0xff] }
 0x12e   :  { %v415_v0 = vpop.f32.mrf.mxu0  ;;  %v458_v1 = vpop.f32.mrf.mxu1  ;;  %v3607_v40 = vcombine.high %v590_v34, %v594_v35  ;;  %v586_v43 = vld [vmem:[#allocation9 + $0x368] sm:$0xff] }
 0x12f   :  { %v416_v4 = vadd.f32 %v415_v0, %v153_v60  ;;  %v459_v5 = vadd.f32 %v458_v1, %v161_v61  ;;  %v465_v21 = vmax.f32 %v414_v8, 0.0  ;;  %v467_v22 = vmax.f32 %v457_v9, 0.0  ;;  %v622_v0 = vld [vmem:[#allocation9 + $0x488] sm:$0xff] }
 0x130   :  { %v417_v2 = vpop.f32.mrf.mxu0  ;;  %v460_v3 = vpop.f32.mrf.mxu1  ;;  %v626_v1 = vld [vmem:[#allocation9 + $0x4a8] sm:$0xff] }
 0x131   :  { %v418_v6 = vadd.f32 %v417_v2, %v149_v62  ;;  %v461_v7 = vadd.f32 %v460_v3, %v157_v63  ;;  %v466_v16 = vmax.f32 %v416_v4, 0.0  ;;  %v468_v17 = vmax.f32 %v459_v5, 0.0  ;;  %v494_v62 = vld [vmem:[#allocation9 + $0x88] sm:$0xff] }
 0x132   :  { %v419_v10 = vpop.f32.mrf.mxu0  ;;  %v462_v11 = vpop.f32.mrf.mxu1  ;;  %v498_v63 = vld [vmem:[#allocation9 + $0xa8] sm:$0xff]  ;;  %v3646_v3 = vcombine.low %v630_v50, %v634_v57  ;;  %v3639_v5 = vcombine.high %v622_v0, %v626_v1 }
 0x133   :  { %v420_v12 = vadd.f32 %v419_v10, %v153_v60  ;;  %v463_v13 = vadd.f32 %v462_v11, %v161_v61  ;;  %v469_v14 = vmax.f32 %v418_v6, 0.0  ;;  %v471_v15 = vmax.f32 %v461_v7, 0.0  ;;  %v486_v6 = vld [vmem:[#allocation9 + $0x48] sm:$0xff] }
 0x134   :  { %v3647_v61 = vcombine.high %v630_v50, %v634_v57  ;;  %v3511_v4 = vcombine.high %v494_v62, %v498_v63  ;;  %v490_v7 = vld [vmem:[#allocation9 + $0x68] sm:$0xff]  ;;  %v3510_v10 = vcombine.low %v494_v62, %v498_v63  ;;  %v3638_v11 = vcombine.low %v622_v0, %v626_v1 }
 0x135   :  { %v470_v18 = vmax.f32 %v420_v12, 0.0  ;;  %v472_v19 = vmax.f32 %v463_v13, 0.0  ;;  %v4388_v28 = vpack.c.bf16 %v469_v14, %v465_v21  ;;  %v4390_v29 = vpack.c.bf16 %v471_v15, %v467_v22  ;;  %v614_v8 = vld [vmem:[#allocation9 + $0x448] sm:$0xff] }
 0x136   :  { %v618_v9 = vld [vmem:[#allocation9 + $0x468] sm:$0xff]  ;;  %v3503_v12 = vcombine.high %v486_v6, %v490_v7 }
 0x137   :  { %v4384_v26 = vpack.c.bf16 %v470_v18, %v466_v16  ;;  %v4386_v27 = vpack.c.bf16 %v472_v19, %v468_v17  ;;  %v3631_v13 = vcombine.high %v614_v8, %v618_v9  ;;  %v478_v14 = vld [vmem:[#allocation9 + $0x8] sm:$0xff]  ;;  %v3502_v18 = vcombine.low %v486_v6, %v490_v7 }
 0x138   :  { %v482_v15 = vld [vmem:[#allocation9 + $0x28] sm:$0xff]  ;;  %v3630_v19 = vcombine.low %v614_v8, %v618_v9 }
 0x139   :  { %2087 = vmatprep.mubr.bf16.mxu0 %v4384_v26  ;;  %2130 = vmatprep.mubr.bf16.mxu1 %v4386_v27  ;;  %v606_v16 = vld [vmem:[#allocation9 + $0x408] sm:$0xff]  ;;  %v3495_v20 = vcombine.high %v478_v14, %v482_v15  ;;  %v3494_v30 = vcombine.low %v478_v14, %v482_v15 }
 0x13a   :  { %2088 = vmatmul.mubr.bf16.vlgmr.msra.gmra.mxu0 %v4388_v28  ;;  %2131 = vmatmul.mubr.bf16.vlgmr.msra.gmra.mxu1 %v4390_v29  ;;  %v610_v17 = vld [vmem:[#allocation9 + $0x428] sm:$0xff] }
 0x13b   :  { %2142 = vmatpush1.bf16.msra.mxu0 %v3550_v48  ;;  %2185 = vmatpush1.bf16.msra.mxu1 %v3678_v49  ;;  %v502_v48 = vld [vmem:[#allocation9 + $0xc8] sm:$0xff]  ;;  %v3623_v21 = vcombine.high %v606_v16, %v610_v17 }
 0x13c   :  { %2173 = vmatprep.mubr.bf16.mxu0 %v4384_v26  ;;  %2216 = vmatprep.mubr.bf16.mxu1 %v4386_v27  ;;  %v506_v49 = vld [vmem:[#allocation9 + $0xe8] sm:$0xff] }
 0x13d   :  { %2143 = vmatprep.subr.bf16.mxu0 %v3543_v31  ;;  %2186 = vmatprep.subr.bf16.mxu1 %v3671_v32  ;;  %v3519_v60 = vcombine.high %v502_v48, %v506_v49  ;;  %v3518_v2 = vcombine.low %v502_v48, %v506_v49  ;;  %v598_v22 = vld [vmem:[#allocation9 + $0x3c8] sm:$0xff]  ;;  %v3622_v31 = vcombine.low %v606_v16, %v610_v17 }
 0x13e   :  { %v3615_v32 = vcombine.high %v598_v22, %v602_v23  ;;  %v3599_v48 = vcombine.high %v582_v42, %v586_v43  ;;  %v574_v50 = vld [vmem:[#allocation9 + $0x308] sm:$0xff] }
 0x13f   :  { %2144 = vmatpush1.bf16.msra.mxu0 %v3542_v36  ;;  %2187 = vmatpush1.bf16.msra.mxu1 %v3670_v37  ;;  %v718_v36 = vld [vmem:[#allocation9 + $0x788] sm:$0xff] }
 0x140   :  { %2145 = vmatprep.subr.bf16.mxu0 %v3535_v38  ;;  %2188 = vmatprep.subr.bf16.mxu1 %v3663_v39  ;;  %v722_v37 = vld [vmem:[#allocation9 + $0x7a8] sm:$0xff]  ;;  %v3614_v38 = vcombine.low %v598_v22, %v602_v23  ;;  %v3742_v39 = vcombine.low %v726_v24, %v730_v25 }
 0x141   :  { %v3735_v41 = vcombine.high %v718_v36, %v722_v37  ;;  %v578_v57 = vld [vmem:[#allocation9 + $0x328] sm:$0xff] }
 0x142   :  { %v3591_v62 = vcombine.high %v574_v50, %v578_v57  ;;  %v566_v0 = vld [vmem:[#allocation9 + $0x2c8] sm:$0xff] }
 0x143   :  { %2146 = vmatpush1.bf16.msra.mxu0 %v3534_v44  ;;  %2189 = vmatpush1.bf16.msra.mxu1 %v3662_v45  ;;  %v710_v44 = vld [vmem:[#allocation9 + $0x748] sm:$0xff] }
 0x144   :  { %2147 = vmatprep.subr.bf16.mxu0 %v3527_v46  ;;  %2190 = vmatprep.subr.bf16.mxu1 %v3655_v47  ;;  %v714_v45 = vld [vmem:[#allocation9 + $0x768] sm:$0xff]  ;;  %v3606_v46 = vcombine.low %v590_v34, %v594_v35  ;;  %v3734_v47 = vcombine.low %v718_v36, %v722_v37  ;;  %v535_v36 = vld [vmem:[#allocation9 + $0x1d0] sm:$0xff] }
 0x145   :  { %v3727_v49 = vcombine.high %v710_v44, %v714_v45  ;;  %v570_v1 = vld [vmem:[#allocation9 + $0x2e8] sm:$0xff]  ;;  %v539_v37 = vld [vmem:[#allocation9 + $0x1f0] sm:$0xff] }
 0x146   :  { %v3583_v6 = vcombine.high %v566_v0, %v570_v1  ;;  %v558_v8 = vld [vmem:[#allocation9 + $0x288] sm:$0xff] }
 0x147   :  { %2148 = vmatpush1.bf16.msra.mxu0 %v3526_v58  ;;  %2191 = vmatpush1.bf16.msra.mxu1 %v3654_v59  ;;  %v702_v58 = vld [vmem:[#allocation9 + $0x708] sm:$0xff] }
 0x148   :  { %2149 = vmatprep.subr.bf16.mxu0 %v3519_v60  ;;  %2192 = vmatprep.subr.bf16.mxu1 %v3647_v61  ;;  %v706_v59 = vld [vmem:[#allocation9 + $0x728] sm:$0xff]  ;;  %v3598_v60 = vcombine.low %v582_v42, %v586_v43  ;;  %v3726_v61 = vcombine.low %v710_v44, %v714_v45  ;;  %v3553_v42 = vcombine.high %v535_v36, %v539_v37  ;;  %v527_v44 = vld [vmem:[#allocation9 + $0x190] sm:$0xff] }
 0x149   :  { %v3719_v63 = vcombine.high %v702_v58, %v706_v59  ;;  %v562_v9 = vld [vmem:[#allocation9 + $0x2a8] sm:$0xff]  ;;  %v531_v45 = vld [vmem:[#allocation9 + $0x1b0] sm:$0xff] }
 0x14a   :  { %v3575_v14 = vcombine.high %v558_v8, %v562_v9  ;;  %v550_v16 = vld [vmem:[#allocation9 + $0x248] sm:$0xff] }
 0x14b   :  { %2150 = vmatpush1.bf16.msra.mxu0 %v3518_v2  ;;  %2193 = vmatpush1.bf16.msra.mxu1 %v3646_v3  ;;  %v694_v2 = vld [vmem:[#allocation9 + $0x6c8] sm:$0xff] }
 0x14c   :  { %2151 = vmatprep.subr.bf16.mxu0 %v3511_v4  ;;  %2194 = vmatprep.subr.bf16.mxu1 %v3639_v5  ;;  %v698_v3 = vld [vmem:[#allocation9 + $0x6e8] sm:$0xff]  ;;  %v3590_v4 = vcombine.low %v574_v50, %v578_v57  ;;  %v3718_v5 = vcombine.low %v702_v58, %v706_v59  ;;  %v3545_v50 = vcombine.high %v527_v44, %v531_v45  ;;  %v519_v58 = vld [vmem:[#allocation9 + $0x150] sm:$0xff] }
 0x14d   :  { %v3711_v7 = vcombine.high %v694_v2, %v698_v3  ;;  %v554_v17 = vld [vmem:[#allocation9 + $0x268] sm:$0xff]  ;;  %v523_v59 = vld [vmem:[#allocation9 + $0x170] sm:$0xff] }
 0x14e   :  { %v3567_v22 = vcombine.high %v550_v16, %v554_v17  ;;  %v542_v24 = vld [vmem:[#allocation9 + $0x208] sm:$0xff] }
 0x14f   :  { %2152 = vmatpush1.bf16.msra.mxu0 %v3510_v10  ;;  %2195 = vmatpush1.bf16.msra.mxu1 %v3638_v11  ;;  %v686_v10 = vld [vmem:[#allocation9 + $0x688] sm:$0xff] }
 0x150   :  { %2153 = vmatprep.subr.bf16.mxu0 %v3503_v12  ;;  %2196 = vmatprep.subr.bf16.mxu1 %v3631_v13  ;;  %v690_v11 = vld [vmem:[#allocation9 + $0x6a8] sm:$0xff]  ;;  %v3582_v12 = vcombine.low %v566_v0, %v570_v1  ;;  %v3710_v13 = vcombine.low %v694_v2, %v698_v3  ;;  %v3537_v0 = vcombine.high %v519_v58, %v523_v59  ;;  %v511_v2 = vld [vmem:[#allocation9 + $0x110] sm:$0xff] }
 0x151   :  { %v3703_v15 = vcombine.high %v686_v10, %v690_v11  ;;  %v546_v25 = vld [vmem:[#allocation9 + $0x228] sm:$0xff]  ;;  %v515_v3 = vld [vmem:[#allocation9 + $0x130] sm:$0xff] }
 0x152   :  { %v3559_v34 = vcombine.high %v542_v24, %v546_v25 }
 0x153   :  { %2154 = vmatpush1.bf16.msra.mxu0 %v3502_v18  ;;  %2197 = vmatpush1.bf16.msra.mxu1 %v3630_v19  ;;  %v678_v18 = vld [vmem:[#allocation9 + $0x648] sm:$0xff] }
 0x154   :  { %2155 = vmatprep.subr.bf16.mxu0 %v3495_v20  ;;  %2198 = vmatprep.subr.bf16.mxu1 %v3623_v21  ;;  %v682_v19 = vld [vmem:[#allocation9 + $0x668] sm:$0xff]  ;;  %v3574_v20 = vcombine.low %v558_v8, %v562_v9  ;;  %v3702_v21 = vcombine.low %v686_v10, %v690_v11  ;;  %v3529_v8 = vcombine.high %v511_v2, %v515_v3  ;;  %v503_v10 = vld [vmem:[#allocation9 + $0xd0] sm:$0xff] }
 0x155   :  { %v3695_v23 = vcombine.high %v678_v18, %v682_v19  ;;  %v507_v11 = vld [vmem:[#allocation9 + $0xf0] sm:$0xff] }
 0x157   :  { %2156 = vmatpush1.bf16.msra.mxu0 %v3494_v30  ;;  %2199 = vmatpush1.bf16.msra.mxu1 %v3622_v31  ;;  %v670_v30 = vld [vmem:[#allocation9 + $0x608] sm:$0xff] }
 0x158   :  { %2157 = vmatprep.subr.bf16.mxu0 %v3615_v32  ;;  %2200 = vmatprep.subr.bf16.mxu1 %v3743_v33  ;;  %v674_v31 = vld [vmem:[#allocation9 + $0x628] sm:$0xff]  ;;  %v3566_v32 = vcombine.low %v550_v16, %v554_v17  ;;  %v3694_v33 = vcombine.low %v678_v18, %v682_v19  ;;  %v3521_v16 = vcombine.high %v503_v10, %v507_v11  ;;  %v495_v18 = vld [vmem:[#allocation9 + $0x90] sm:$0xff] }
 0x159   :  { %v3687_v35 = vcombine.high %v670_v30, %v674_v31  ;;  %v499_v19 = vld [vmem:[#allocation9 + $0xb0] sm:$0xff] }
 0x15b   :  { %2158 = vmatpush2.bf16.msra.mxu0 %v3614_v38  ;;  %2201 = vmatpush2.bf16.msra.mxu1 %v3742_v39  ;;  %v663_v38 = vld [vmem:[#allocation9 + $0x5d0] sm:$0xff] }
 0x15c   :  { %2159 = vmatprep.subr.bf16.mxu0 %v3607_v40  ;;  %2202 = vmatprep.subr.bf16.mxu1 %v3735_v41  ;;  %v667_v39 = vld [vmem:[#allocation9 + $0x5f0] sm:$0xff]  ;;  %v3558_v40 = vcombine.low %v542_v24, %v546_v25  ;;  %v3686_v41 = vcombine.low %v670_v30, %v674_v31  ;;  %v3513_v24 = vcombine.high %v495_v18, %v499_v19 }
 0x15d   :  { %v3681_v43 = vcombine.high %v663_v38, %v667_v39  ;;  %v487_v30 = vld [vmem:[#allocation9 + $0x50] sm:$0xff] }
 0x15e   :  { %v491_v31 = vld [vmem:[#allocation9 + $0x70] sm:$0xff] }
 0x15f   :  { %2160 = vmatpush2.bf16.msra.mxu0 %v3606_v46  ;;  %2203 = vmatpush2.bf16.msra.mxu1 %v3734_v47  ;;  %v655_v46 = vld [vmem:[#allocation9 + $0x590] sm:$0xff] }
 0x160   :  { %2161 = vmatprep.subr.bf16.mxu0 %v3599_v48  ;;  %2204 = vmatprep.subr.bf16.mxu1 %v3727_v49  ;;  %v659_v47 = vld [vmem:[#allocation9 + $0x5b0] sm:$0xff]  ;;  %v3552_v48 = vcombine.low %v535_v36, %v539_v37  ;;  %v3680_v49 = vcombine.low %v663_v38, %v667_v39  ;;  %v3505_v36 = vcombine.high %v487_v30, %v491_v31 }
 0x161   :  { %v3673_v57 = vcombine.high %v655_v46, %v659_v47  ;;  %v479_v38 = vld [vmem:[#allocation9 + $0x10] sm:$0xff] }
 0x162   :  { %v483_v39 = vld [vmem:[#allocation9 + $0x30] sm:$0xff] }
 0x163   :  { %2162 = vmatpush2.bf16.msra.mxu0 %v3598_v60  ;;  %2205 = vmatpush2.bf16.msra.mxu1 %v3726_v61  ;;  %v647_v60 = vld [vmem:[#allocation9 + $0x550] sm:$0xff] }
 0x164   :  { %2163 = vmatprep.subr.bf16.mxu0 %v3591_v62  ;;  %2206 = vmatprep.subr.bf16.mxu1 %v3719_v63  ;;  %v651_v61 = vld [vmem:[#allocation9 + $0x570] sm:$0xff]  ;;  %v3544_v62 = vcombine.low %v527_v44, %v531_v45  ;;  %v3672_v63 = vcombine.low %v655_v46, %v659_v47  ;;  %v3497_v44 = vcombine.high %v479_v38, %v483_v39 }
 0x165   :  { %v3665_v1 = vcombine.high %v647_v60, %v651_v61  ;;  %v599_v46 = vld [vmem:[#allocation9 + $0x3d0] sm:$0xff] }
 0x166   :  { %v603_v47 = vld [vmem:[#allocation9 + $0x3f0] sm:$0xff] }
 0x167   :  { %2164 = vmatpush2.bf16.msra.mxu0 %v3590_v4  ;;  %2207 = vmatpush2.bf16.msra.mxu1 %v3718_v5  ;;  %v639_v4 = vld [vmem:[#allocation9 + $0x510] sm:$0xff] }
 0x168   :  { %2165 = vmatprep.subr.bf16.mxu0 %v3583_v6  ;;  %2208 = vmatprep.subr.bf16.mxu1 %v3711_v7  ;;  %v643_v5 = vld [vmem:[#allocation9 + $0x530] sm:$0xff]  ;;  %v3536_v6 = vcombine.low %v519_v58, %v523_v59  ;;  %v3664_v7 = vcombine.low %v647_v60, %v651_v61  ;;  %v3617_v58 = vcombine.high %v599_v46, %v603_v47 }
 0x169   :  { %v3657_v9 = vcombine.high %v639_v4, %v643_v5  ;;  %v591_v60 = vld [vmem:[#allocation9 + $0x390] sm:$0xff] }
 0x16a   :  { %v595_v61 = vld [vmem:[#allocation9 + $0x3b0] sm:$0xff] }
 0x16b   :  { %2166 = vmatpush2.bf16.msra.mxu0 %v3582_v12  ;;  %2209 = vmatpush2.bf16.msra.mxu1 %v3710_v13  ;;  %v631_v12 = vld [vmem:[#allocation9 + $0x4d0] sm:$0xff] }
 0x16c   :  { %2167 = vmatprep.subr.bf16.mxu0 %v3575_v14  ;;  %2210 = vmatprep.subr.bf16.mxu1 %v3703_v15  ;;  %v635_v13 = vld [vmem:[#allocation9 + $0x4f0] sm:$0xff]  ;;  %v3528_v14 = vcombine.low %v511_v2, %v515_v3  ;;  %v3656_v15 = vcombine.low %v639_v4, %v643_v5  ;;  %v3609_v2 = vcombine.high %v591_v60, %v595_v61 }
 0x16d   :  { %v3649_v17 = vcombine.high %v631_v12, %v635_v13  ;;  %v583_v4 = vld [vmem:[#allocation9 + $0x350] sm:$0xff] }
 0x16e   :  { %v587_v5 = vld [vmem:[#allocation9 + $0x370] sm:$0xff] }
 0x16f   :  { %2168 = vmatpush2.bf16.msra.mxu0 %v3574_v20  ;;  %2211 = vmatpush2.bf16.msra.mxu1 %v3702_v21  ;;  %v623_v20 = vld [vmem:[#allocation9 + $0x490] sm:$0xff] }
 0x170   :  { %2169 = vmatprep.subr.bf16.mxu0 %v3567_v22  ;;  %2212 = vmatprep.subr.bf16.mxu1 %v3695_v23  ;;  %v627_v21 = vld [vmem:[#allocation9 + $0x4b0] sm:$0xff]  ;;  %v3520_v22 = vcombine.low %v503_v10, %v507_v11  ;;  %v3648_v23 = vcombine.low %v631_v12, %v635_v13  ;;  %v3601_v10 = vcombine.high %v583_v4, %v587_v5 }
 0x171   :  { %v3641_v25 = vcombine.high %v623_v20, %v627_v21  ;;  %v575_v12 = vld [vmem:[#allocation9 + $0x310] sm:$0xff] }
 0x172   :  { %v579_v13 = vld [vmem:[#allocation9 + $0x330] sm:$0xff] }
 0x173   :  { %2170 = vmatpush2.bf16.msra.mxu0 %v3566_v32  ;;  %2213 = vmatpush2.bf16.msra.mxu1 %v3694_v33  ;;  %v615_v32 = vld [vmem:[#allocation9 + $0x450] sm:$0xff] }
 0x174   :  { %2171 = vmatprep.subr.bf16.mxu0 %v3559_v34  ;;  %2214 = vmatprep.subr.bf16.mxu1 %v3687_v35  ;;  %v619_v33 = vld [vmem:[#allocation9 + $0x470] sm:$0xff]  ;;  %v3512_v34 = vcombine.low %v495_v18, %v499_v19  ;;  %v3640_v35 = vcombine.low %v623_v20, %v627_v21  ;;  %v3593_v18 = vcombine.high %v575_v12, %v579_v13 }
 0x175   :  { %v3633_v37 = vcombine.high %v615_v32, %v619_v33  ;;  %v567_v20 = vld [vmem:[#allocation9 + $0x2d0] sm:$0xff] }
 0x176   :  { %v571_v21 = vld [vmem:[#allocation9 + $0x2f0] sm:$0xff] }
 0x177   :  { %2172 = vmatpush2.bf16.msra.mxu0 %v3558_v40  ;;  %2215 = vmatpush2.bf16.msra.mxu1 %v3686_v41  ;;  %v607_v40 = vld [vmem:[#allocation9 + $0x410] sm:$0xff] }
 0x178   :  { %2227 = vmatprep.subr.bf16.mxu0 %v3553_v42  ;;  %2270 = vmatprep.subr.bf16.mxu1 %v3681_v43  ;;  %v611_v41 = vld [vmem:[#allocation9 + $0x430] sm:$0xff]  ;;  %v3504_v42 = vcombine.low %v487_v30, %v491_v31  ;;  %v3632_v43 = vcombine.low %v615_v32, %v619_v33  ;;  %v3585_v30 = vcombine.high %v567_v20, %v571_v21 }
 0x179   :  { %v3625_v45 = vcombine.high %v607_v40, %v611_v41  ;;  %v559_v32 = vld [vmem:[#allocation9 + $0x290] sm:$0xff] }
 0x17a   :  { %2174 = vmatmul.mubr.bf16.vlgmr.msra.gmra.mxu0 %v4388_v28  ;;  %2217 = vmatmul.mubr.bf16.vlgmr.msra.gmra.mxu1 %v4390_v29  ;;  %v563_v33 = vld [vmem:[#allocation9 + $0x2b0] sm:$0xff] }
 0x17b   :  { %2228 = vmatpush1.bf16.msra.mxu0 %v3552_v48  ;;  %2259 = vmatprep.mubr.bf16.mxu0 %v4384_v26  ;;  %v727_v48 = vld [vmem:[#allocation9 + $0x7d0] sm:$0xff] }
 0x17c   :  { %2271 = vmatpush1.bf16.msra.mxu1 %v3680_v49  ;;  %2302 = vmatprep.mubr.bf16.mxu1 %v4386_v27  ;;  %v731_v49 = vld [vmem:[#allocation9 + $0x7f0] sm:$0xff] }
 0x17d   :  { %2229 = vmatprep.subr.bf16.mxu0 %v3545_v50  ;;  %2272 = vmatprep.subr.bf16.mxu1 %v3673_v57  ;;  %v3496_v50 = vcombine.low %v479_v38, %v483_v39  ;;  %v3624_v57 = vcombine.low %v607_v40, %v611_v41  ;;  %v3745_v59 = vcombine.high %v727_v48, %v731_v49  ;;  %v551_v40 = vld [vmem:[#allocation9 + $0x250] sm:$0xff] }
 0x17e   :  { %v3577_v38 = vcombine.high %v559_v32, %v563_v33  ;;  %v555_v41 = vld [vmem:[#allocation9 + $0x270] sm:$0xff] }
 0x17f   :  { %2230 = vmatpush1.bf16.msra.mxu0 %v3544_v62  ;;  %v719_v62 = vld [vmem:[#allocation9 + $0x790] sm:$0xff] }
 0x180   :  { %2273 = vmatpush1.bf16.msra.mxu1 %v3672_v63  ;;  %2231 = vmatprep.subr.bf16.mxu0 %v3537_v0  ;;  %v723_v63 = vld [vmem:[#allocation9 + $0x7b0] sm:$0xff]  ;;  %v3616_v0 = vcombine.low %v599_v46, %v603_v47  ;;  %v3569_v46 = vcombine.high %v551_v40, %v555_v41 }
 0x181   :  { %2274 = vmatprep.subr.bf16.mxu1 %v3665_v1  ;;  %v3744_v1 = vcombine.low %v727_v48, %v731_v49  ;;  %v3737_v3 = vcombine.high %v719_v62, %v723_v63  ;;  %v543_v48 = vld [vmem:[#allocation9 + $0x210] sm:$0xff] }
 0x182   :  { %v547_v49 = vld [vmem:[#allocation9 + $0x230] sm:$0xff] }
 0x183   :  { %2232 = vmatpush1.bf16.msra.mxu0 %v3536_v6  ;;  %v711_v6 = vld [vmem:[#allocation9 + $0x750] sm:$0xff] }
 0x184   :  { %2275 = vmatpush1.bf16.msra.mxu1 %v3664_v7  ;;  %2233 = vmatprep.subr.bf16.mxu0 %v3529_v8  ;;  %v715_v7 = vld [vmem:[#allocation9 + $0x770] sm:$0xff]  ;;  %v3608_v8 = vcombine.low %v591_v60, %v595_v61  ;;  %v3561_v60 = vcombine.high %v543_v48, %v547_v49 }
 0x185   :  { %2276 = vmatprep.subr.bf16.mxu1 %v3657_v9  ;;  %v3736_v9 = vcombine.low %v719_v62, %v723_v63  ;;  %v3729_v11 = vcombine.high %v711_v6, %v715_v7  ;;  %v536_v62 = vld [vmem:[#allocation9 + $0x1d8] sm:$0xff] }
 0x186   :  { %v540_v63 = vld [vmem:[#allocation9 + $0x1f8] sm:$0xff] }
 0x187   :  { %2234 = vmatpush1.bf16.msra.mxu0 %v3528_v14  ;;  %v703_v14 = vld [vmem:[#allocation9 + $0x710] sm:$0xff] }
 0x188   :  { %2277 = vmatpush1.bf16.msra.mxu1 %v3656_v15  ;;  %2235 = vmatprep.subr.bf16.mxu0 %v3521_v16  ;;  %v707_v15 = vld [vmem:[#allocation9 + $0x730] sm:$0xff]  ;;  %v3600_v16 = vcombine.low %v583_v4, %v587_v5  ;;  %v3555_v4 = vcombine.high %v536_v62, %v540_v63 }
 0x189   :  { %2278 = vmatprep.subr.bf16.mxu1 %v3649_v17  ;;  %v3728_v17 = vcombine.low %v711_v6, %v715_v7  ;;  %v3721_v19 = vcombine.high %v703_v14, %v707_v15  ;;  %v528_v6 = vld [vmem:[#allocation9 + $0x198] sm:$0xff] }
 0x18a   :  { %v532_v7 = vld [vmem:[#allocation9 + $0x1b8] sm:$0xff] }
 0x18b   :  { %2236 = vmatpush1.bf16.msra.mxu0 %v3520_v22  ;;  %v695_v22 = vld [vmem:[#allocation9 + $0x6d0] sm:$0xff] }
 0x18c   :  { %2279 = vmatpush1.bf16.msra.mxu1 %v3648_v23  ;;  %2237 = vmatprep.subr.bf16.mxu0 %v3513_v24  ;;  %v699_v23 = vld [vmem:[#allocation9 + $0x6f0] sm:$0xff]  ;;  %v3592_v24 = vcombine.low %v575_v12, %v579_v13  ;;  %v3547_v12 = vcombine.high %v528_v6, %v532_v7  ;;  %v520_v13 = vld [vmem:[#allocation9 + $0x158] sm:$0xff] }
 0x18d   :  { %2280 = vmatprep.subr.bf16.mxu1 %v3641_v25  ;;  %v3720_v25 = vcombine.low %v703_v14, %v707_v15  ;;  %v3713_v31 = vcombine.high %v695_v22, %v699_v23  ;;  %v524_v14 = vld [vmem:[#allocation9 + $0x178] sm:$0xff] }
 0x18f   :  { %2238 = vmatpush1.bf16.msra.mxu0 %v3512_v34  ;;  %v687_v34 = vld [vmem:[#allocation9 + $0x690] sm:$0xff] }
 0x190   :  { %2281 = vmatpush1.bf16.msra.mxu1 %v3640_v35  ;;  %2239 = vmatprep.subr.bf16.mxu0 %v3505_v36  ;;  %v691_v35 = vld [vmem:[#allocation9 + $0x6b0] sm:$0xff]  ;;  %v3584_v36 = vcombine.low %v567_v20, %v571_v21  ;;  %v3539_v20 = vcombine.high %v520_v13, %v524_v14 }
 0x191   :  { %2282 = vmatprep.subr.bf16.mxu1 %v3633_v37  ;;  %v3712_v37 = vcombine.low %v695_v22, %v699_v23  ;;  %v3705_v39 = vcombine.high %v687_v34, %v691_v35  ;;  %v512_v22 = vld [vmem:[#allocation9 + $0x118] sm:$0xff] }
 0x192   :  { %v516_v23 = vld [vmem:[#allocation9 + $0x138] sm:$0xff] }
 0x193   :  { %2240 = vmatpush1.bf16.msra.mxu0 %v3504_v42  ;;  %v679_v42 = vld [vmem:[#allocation9 + $0x650] sm:$0xff] }
 0x194   :  { %2283 = vmatpush1.bf16.msra.mxu1 %v3632_v43  ;;  %2241 = vmatprep.subr.bf16.mxu0 %v3497_v44  ;;  %v683_v43 = vld [vmem:[#allocation9 + $0x670] sm:$0xff]  ;;  %v3576_v44 = vcombine.low %v559_v32, %v563_v33  ;;  %v3531_v32 = vcombine.high %v512_v22, %v516_v23  ;;  %v504_v33 = vld [vmem:[#allocation9 + $0xd8] sm:$0xff] }
 0x195   :  { %2284 = vmatprep.subr.bf16.mxu1 %v3625_v45  ;;  %v3704_v45 = vcombine.low %v687_v34, %v691_v35  ;;  %v3697_v47 = vcombine.high %v679_v42, %v683_v43  ;;  %v508_v34 = vld [vmem:[#allocation9 + $0xf8] sm:$0xff] }
 0x196   :  { %v632_v35 = vld [vmem:[#allocation9 + $0x4d8] sm:$0xff] }
 0x197   :  { %2242 = vmatpush1.bf16.msra.mxu0 %v3496_v50  ;;  %v671_v50 = vld [vmem:[#allocation9 + $0x610] sm:$0xff] }
 0x198   :  { %2285 = vmatpush1.bf16.msra.mxu1 %v3624_v57  ;;  %2243 = vmatprep.subr.bf16.mxu0 %v3617_v58  ;;  %v675_v57 = vld [vmem:[#allocation9 + $0x630] sm:$0xff]  ;;  %v3568_v58 = vcombine.low %v551_v40, %v555_v41  ;;  %v496_v40 = vld [vmem:[#allocation9 + $0x98] sm:$0xff] }
 0x199   :  { %2286 = vmatprep.subr.bf16.mxu1 %v3745_v59  ;;  %v3696_v59 = vcombine.low %v679_v42, %v683_v43  ;;  %v3689_v61 = vcombine.high %v671_v50, %v675_v57  ;;  %v500_v41 = vld [vmem:[#allocation9 + $0xb8] sm:$0xff] }
 0x19a   :  { %v624_v42 = vld [vmem:[#allocation9 + $0x498] sm:$0xff] }
 0x19b   :  { %2244 = vmatpush2.bf16.msra.mxu0 %v3616_v0  ;;  %v664_v0 = vld [vmem:[#allocation9 + $0x5d8] sm:$0xff] }
 0x19c   :  { %2287 = vmatpush2.bf16.msra.mxu1 %v3744_v1  ;;  %2245 = vmatprep.subr.bf16.mxu0 %v3609_v2  ;;  %v668_v1 = vld [vmem:[#allocation9 + $0x5f8] sm:$0xff]  ;;  %v3560_v2 = vcombine.low %v543_v48, %v547_v49 }
 0x19d   :  { %2288 = vmatprep.subr.bf16.mxu1 %v3737_v3  ;;  %v3688_v3 = vcombine.low %v671_v50, %v675_v57  ;;  %v3683_v5 = vcombine.high %v664_v0, %v668_v1  ;;  %v628_v43 = vld [vmem:[#allocation9 + $0x4b8] sm:$0xff] }
 0x19e   :  { %v488_v48 = vld [vmem:[#allocation9 + $0x58] sm:$0xff] }
 0x19f   :  { %2246 = vmatpush2.bf16.msra.mxu0 %v3608_v8  ;;  %v3554_v8 = vcombine.low %v536_v62, %v540_v63  ;;  %v492_v49 = vld [vmem:[#allocation9 + $0x78] sm:$0xff] }
 0x1a0   :  { %2289 = vmatpush2.bf16.msra.mxu1 %v3736_v9  ;;  %2247 = vmatprep.subr.bf16.mxu0 %v3601_v10  ;;  %v656_v9 = vld [vmem:[#allocation9 + $0x598] sm:$0xff] }
 0x1a1   :  { %2290 = vmatprep.subr.bf16.mxu1 %v3729_v11  ;;  %v660_v10 = vld [vmem:[#allocation9 + $0x5b8] sm:$0xff]  ;;  %v3682_v11 = vcombine.low %v664_v0, %v668_v1 }
 0x1a2   :  { %v3675_v15 = vcombine.high %v656_v9, %v660_v10  ;;  %v616_v50 = vld [vmem:[#allocation9 + $0x458] sm:$0xff] }
 0x1a3   :  { %2248 = vmatpush2.bf16.msra.mxu0 %v3600_v16  ;;  %v648_v16 = vld [vmem:[#allocation9 + $0x558] sm:$0xff] }
 0x1a4   :  { %2291 = vmatpush2.bf16.msra.mxu1 %v3728_v17  ;;  %2249 = vmatprep.subr.bf16.mxu0 %v3593_v18  ;;  %v652_v17 = vld [vmem:[#allocation9 + $0x578] sm:$0xff]  ;;  %v3546_v18 = vcombine.low %v528_v6, %v532_v7 }
 0x1a5   :  { %2292 = vmatprep.subr.bf16.mxu1 %v3721_v19  ;;  %v3674_v19 = vcombine.low %v656_v9, %v660_v10  ;;  %v3667_v21 = vcombine.high %v648_v16, %v652_v17  ;;  %v620_v57 = vld [vmem:[#allocation9 + $0x478] sm:$0xff] }
 0x1a6   :  { %v480_v62 = vld [vmem:[#allocation9 + $0x18] sm:$0xff] }
 0x1a7   :  { %2250 = vmatpush2.bf16.msra.mxu0 %v3592_v24  ;;  %v640_v24 = vld [vmem:[#allocation9 + $0x518] sm:$0xff] }
 0x1a8   :  { %2293 = vmatpush2.bf16.msra.mxu1 %v3720_v25  ;;  %2251 = vmatprep.subr.bf16.mxu0 %v3585_v30  ;;  %v644_v25 = vld [vmem:[#allocation9 + $0x538] sm:$0xff]  ;;  %v3538_v30 = vcombine.low %v520_v13, %v524_v14 }
 0x1a9   :  { %2294 = vmatprep.subr.bf16.mxu1 %v3713_v31  ;;  %v3666_v31 = vcombine.low %v648_v16, %v652_v17  ;;  %v484_v63 = vld [vmem:[#allocation9 + $0x38] sm:$0xff] }
 0x1aa   :  { %v608_v0 = vld [vmem:[#allocation9 + $0x418] sm:$0xff]  ;;  %v3498_v10 = vcombine.low %v480_v62, %v484_v63 }
 0x1ab   :  { %2252 = vmatpush2.bf16.msra.mxu0 %v3584_v36  ;;  %v636_v36 = vld [vmem:[#allocation9 + $0x4f8] sm:$0xff] }
 0x1ac   :  { %2295 = vmatpush2.bf16.msra.mxu1 %v3712_v37  ;;  %2253 = vmatprep.subr.bf16.mxu0 %v3577_v38  ;;  %v3658_v37 = vcombine.low %v640_v24, %v644_v25  ;;  %v3523_v38 = vcombine.high %v504_v33, %v508_v34  ;;  %v612_v1 = vld [vmem:[#allocation9 + $0x438] sm:$0xff] }
 0x1ad   :  { %2296 = vmatprep.subr.bf16.mxu1 %v3705_v39  ;;  %v3651_v39 = vcombine.high %v632_v35, %v636_v36  ;;  %v600_v6 = vld [vmem:[#allocation9 + $0x3d8] sm:$0xff] }
 0x1ae   :  { %v604_v7 = vld [vmem:[#allocation9 + $0x3f8] sm:$0xff] }
 0x1af   :  { %2254 = vmatpush2.bf16.msra.mxu0 %v3576_v44  ;;  %v3522_v44 = vcombine.low %v504_v33, %v508_v34  ;;  %v732_v9 = vld [vmem:[#allocation9 + $0x7f8] sm:$0xff] }
 0x1b0   :  { %2297 = vmatpush2.bf16.msra.mxu1 %v3704_v45  ;;  %2255 = vmatprep.subr.bf16.mxu0 %v3569_v46  ;;  %v3650_v45 = vcombine.low %v632_v35, %v636_v36  ;;  %v3515_v46 = vcombine.high %v496_v40, %v500_v41  ;;  %v592_v14 = vld [vmem:[#allocation9 + $0x398] sm:$0xff] }
 0x1b1   :  { %2298 = vmatprep.subr.bf16.mxu1 %v3697_v47  ;;  %v3643_v47 = vcombine.high %v624_v42, %v628_v43  ;;  %v720_v16 = vld [vmem:[#allocation9 + $0x798] sm:$0xff] }
 0x1b2   :  { %v724_v17 = vld [vmem:[#allocation9 + $0x7b8] sm:$0xff] }
 0x1b3   :  { %2256 = vmatpush2.bf16.msra.mxu0 %v3568_v58  ;;  %v3514_v58 = vcombine.low %v496_v40, %v500_v41  ;;  %v576_v33 = vld [vmem:[#allocation9 + $0x318] sm:$0xff] }
 0x1b4   :  { %2299 = vmatpush2.bf16.msra.mxu1 %v3696_v59  ;;  %2257 = vmatprep.subr.bf16.mxu0 %v3561_v60  ;;  %v3642_v59 = vcombine.low %v624_v42, %v628_v43  ;;  %v3507_v60 = vcombine.high %v488_v48, %v492_v49  ;;  %v580_v34 = vld [vmem:[#allocation9 + $0x338] sm:$0xff] }
 0x1b5   :  { %2300 = vmatprep.subr.bf16.mxu1 %v3689_v61  ;;  %v3635_v61 = vcombine.high %v616_v50, %v620_v57  ;;  %v704_v35 = vld [vmem:[#allocation9 + $0x718] sm:$0xff] }
 0x1b6   :  { %v708_v36 = vld [vmem:[#allocation9 + $0x738] sm:$0xff] }
 0x1b7   :  { %2258 = vmatpush2.bf16.msra.mxu0 %v3560_v2  ;;  %v3506_v2 = vcombine.low %v488_v48, %v492_v49  ;;  %v568_v40 = vld [vmem:[#allocation9 + $0x2d8] sm:$0xff] }
 0x1b8   :  { %2301 = vmatpush2.bf16.msra.mxu1 %v3688_v3  ;;  %2313 = vmatprep.subr.bf16.mxu0 %v3555_v4  ;;  %v3634_v3 = vcombine.low %v616_v50, %v620_v57  ;;  %v3499_v4 = vcombine.high %v480_v62, %v484_v63  ;;  %v572_v41 = vld [vmem:[#allocation9 + $0x2f8] sm:$0xff] }
 0x1b9   :  { %2356 = vmatprep.subr.bf16.mxu1 %v3683_v5  ;;  %v3627_v5 = vcombine.high %v608_v0, %v612_v1  ;;  %v696_v42 = vld [vmem:[#allocation9 + $0x6d8] sm:$0xff] }
 0x1ba   :  { %2260 = vmatmul.mubr.bf16.vlgmr.msra.gmra.mxu0 %v4388_v28  ;;  %v700_v43 = vld [vmem:[#allocation9 + $0x6f8] sm:$0xff] }
 0x1bb   :  { %2303 = vmatmul.mubr.bf16.vlgmr.msra.gmra.mxu1 %v4390_v29  ;;  %2314 = vmatpush1.bf16.msra.mxu0 %v3554_v8  ;;  %v728_v8 = vld [vmem:[#allocation9 + $0x7d8] sm:$0xff] }
 0x1bc   :  { %2345 = vmatprep.mubr.bf16.mxu0 %v4384_v26  ;;  %2357 = vmatpush1.bf16.msra.mxu1 %v3682_v11  ;;  %v3659_v26 = vcombine.high %v640_v24, %v644_v25  ;;  %v3626_v11 = vcombine.low %v608_v0, %v612_v1  ;;  %v3747_v13 = vcombine.high %v728_v8, %v732_v9  ;;  %v712_v24 = vld [vmem:[#allocation9 + $0x758] sm:$0xff] }
 0x1bd   :  { %2388 = vmatprep.mubr.bf16.mxu1 %v4386_v27  ;;  %2315 = vmatprep.subr.bf16.mxu0 %v3547_v12  ;;  %v3530_v27 = vcombine.low %v512_v22, %v516_v23  ;;  %v3619_v12 = vcombine.high %v600_v6, %v604_v7  ;;  %v584_v22 = vld [vmem:[#allocation9 + $0x358] sm:$0xff] }
 0x1be   :  { %2358 = vmatprep.subr.bf16.mxu1 %v3675_v15  ;;  %v596_v15 = vld [vmem:[#allocation9 + $0x3b8] sm:$0xff] }
 0x1bf   :  { %2316 = vmatpush1.bf16.msra.mxu0 %v3546_v18  ;;  %v3618_v18 = vcombine.low %v600_v6, %v604_v7  ;;  %v588_v23 = vld [vmem:[#allocation9 + $0x378] sm:$0xff] }
 0x1c0   :  { %2359 = vmatpush1.bf16.msra.mxu1 %v3674_v19  ;;  %2317 = vmatprep.subr.bf16.mxu0 %v3539_v20  ;;  %v3746_v19 = vcombine.low %v728_v8, %v732_v9  ;;  %v3611_v20 = vcombine.high %v592_v14, %v596_v15  ;;  %v716_v25 = vld [vmem:[#allocation9 + $0x778] sm:$0xff] }
 0x1c1   :  { %2360 = vmatprep.subr.bf16.mxu1 %v3667_v21  ;;  %v3739_v21 = vcombine.high %v720_v16, %v724_v17  ;;  %v560_v48 = vld [vmem:[#allocation9 + $0x298] sm:$0xff] }
 0x1c2   :  { %v564_v49 = vld [vmem:[#allocation9 + $0x2b8] sm:$0xff] }
 0x1c3   :  { %2318 = vmatpush1.bf16.msra.mxu0 %v3538_v30  ;;  %v3610_v30 = vcombine.low %v592_v14, %v596_v15  ;;  %v688_v50 = vld [vmem:[#allocation9 + $0x698] sm:$0xff] }
 0x1c4   :  { %2361 = vmatpush1.bf16.msra.mxu1 %v3666_v31  ;;  %2319 = vmatprep.subr.bf16.mxu0 %v3531_v32  ;;  %v3738_v31 = vcombine.low %v720_v16, %v724_v17  ;;  %v3603_v32 = vcombine.high %v584_v22, %v588_v23  ;;  %v692_v57 = vld [vmem:[#allocation9 + $0x6b8] sm:$0xff] }
 0x1c5   :  { %2362 = vmatprep.subr.bf16.mxu1 %v3659_v26  ;;  %v3731_v26 = vcombine.high %v712_v24, %v716_v25  ;;  %v552_v62 = vld [vmem:[#allocation9 + $0x258] sm:$0xff] }
 0x1c6   :  { %v556_v63 = vld [vmem:[#allocation9 + $0x278] sm:$0xff] }
 0x1c7   :  { %2320 = vmatpush1.bf16.msra.mxu0 %v3530_v27  ;;  %v3602_v27 = vcombine.low %v584_v22, %v588_v23  ;;  %v680_v0 = vld [vmem:[#allocation9 + $0x658] sm:$0xff]  ;;  %v3977_v23 = vld [vmem:[#allocation11 + $0x164] ss:$8 sps:$4 sm:$0xff]  }
 0x1c8   :  { %2363 = vmatpush1.bf16.msra.mxu1 %v3658_v37  ;;  %2321 = vmatprep.subr.bf16.mxu0 %v3523_v38  ;;  %v3730_v37 = vcombine.low %v712_v24, %v716_v25  ;;  %v3595_v38 = vcombine.high %v576_v33, %v580_v34  ;;  %v684_v1 = vld [vmem:[#allocation9 + $0x678] sm:$0xff] }
 0x1c9   :  { %2364 = vmatprep.subr.bf16.mxu1 %v3651_v39  ;;  %v3723_v39 = vcombine.high %v704_v35, %v708_v36  ;;  %v544_v6 = vld [vmem:[#allocation9 + $0x218] sm:$0xff] }
 0x1ca   :  { %v548_v7 = vld [vmem:[#allocation9 + $0x238] sm:$0xff] }
 0x1cb   :  { %2322 = vmatpush1.bf16.msra.mxu0 %v3522_v44  ;;  %v3594_v44 = vcombine.low %v576_v33, %v580_v34  ;;  %v672_v8 = vld [vmem:[#allocation9 + $0x618] sm:$0xff]  ;;  %v3562_v14 = vcombine.low %v544_v6, %v548_v7  ;;  %v3975_v33 = vld [vmem:[#allocation11 + $0x160] ss:$8 sps:$4 sm:$0xff]  }
 0x1cc   :  { %2365 = vmatpush1.bf16.msra.mxu1 %v3650_v45  ;;  %2323 = vmatprep.subr.bf16.mxu0 %v3515_v46  ;;  %v3722_v45 = vcombine.low %v704_v35, %v708_v36  ;;  %v3587_v46 = vcombine.high %v568_v40, %v572_v41  ;;  %v676_v9 = vld [vmem:[#allocation9 + $0x638] sm:$0xff] }
 0x1cd   :  { %2366 = vmatprep.subr.bf16.mxu1 %v3643_v47  ;;  %v3715_v47 = vcombine.high %v696_v42, %v700_v43  ;;  %v3690_v15 = vcombine.low %v672_v8, %v676_v9  ;;  %v3956_v16 = vld [vmem:[#allocation11 + $0x74] ss:$8 sps:$4 sm:$0xff]  }
 0x1ce   :  { %v3971_v17 = vld [vmem:[#allocation11 + $0x174] ss:$8 sps:$4 sm:$0xff]  }
 0x1cf   :  { %2324 = vmatpush1.bf16.msra.mxu0 %v3514_v58  ;;  %v3586_v58 = vcombine.low %v568_v40, %v572_v41  ;;  %v3983_v35 = vld [vmem:[#allocation11 + $0x154] ss:$8 sps:$4 sm:$0xff]   ;;  %v3989_v41 = vld [vmem:[#allocation11 + $0x144] ss:$8 sps:$4 sm:$0xff]  }
 0x1d0   :  { %2367 = vmatpush1.bf16.msra.mxu1 %v3642_v59  ;;  %2325 = vmatprep.subr.bf16.mxu0 %v3507_v60  ;;  %v3714_v59 = vcombine.low %v696_v42, %v700_v43  ;;  %v3579_v60 = vcombine.high %v560_v48, %v564_v49 }
 0x1d1   :  { %2368 = vmatprep.subr.bf16.mxu1 %v3635_v61  ;;  %v3707_v61 = vcombine.high %v688_v50, %v692_v57 }
 0x1d3   :  { %2326 = vmatpush1.bf16.msra.mxu0 %v3506_v2  ;;  %v3578_v2 = vcombine.low %v560_v48, %v564_v49  ;;  %v3995_v49 = vld [vmem:[#allocation11 + $0x134] ss:$8 sps:$4 sm:$0xff]  }
 0x1d4   :  { %2369 = vmatpush1.bf16.msra.mxu1 %v3634_v3  ;;  %2327 = vmatprep.subr.bf16.mxu0 %v3499_v4  ;;  %v3706_v3 = vcombine.low %v688_v50, %v692_v57  ;;  %v3571_v4 = vcombine.high %v552_v62, %v556_v63  ;;  %v3966_v57 = vld [vmem:[#allocation11 + $0x30] ss:$8 sps:$4 sm:$0xff]  }
 0x1d5   :  { %2370 = vmatprep.subr.bf16.mxu1 %v3627_v5  ;;  %v3699_v5 = vcombine.high %v680_v0, %v684_v1 }
 0x1d7   :  { %2328 = vmatpush1.bf16.msra.mxu0 %v3498_v10  ;;  %v3570_v10 = vcombine.low %v552_v62, %v556_v63  ;;  %v3980_v62 = vld [vmem:[#allocation11 + $0x14] ss:$8 sps:$4 sm:$0xff]   ;;  %v3999_v63 = vld [vmem:[#allocation11 + $0x120] ss:$8 sps:$4 sm:$0xff]  }
 0x1d8   :  { %2371 = vmatpush1.bf16.msra.mxu1 %v3626_v11  ;;  %2329 = vmatprep.subr.bf16.mxu0 %v3619_v12  ;;  %v3698_v11 = vcombine.low %v680_v0, %v684_v1  ;;  %v3563_v12 = vcombine.high %v544_v6, %v548_v7  ;;  %v4007_v0 = vld [vmem:[#allocation11 + $0x114] ss:$8 sps:$4 sm:$0xff]   ;;  %v3978_v1 = vld [vmem:[#allocation11 + $0x10] ss:$8 sps:$4 sm:$0xff]   ;;  %v4011_v7 = vld [vmem:[#allocation11 + $0x100] ss:$8 sps:$4 sm:$0xff]  }
 0x1d9   :  { %2372 = vmatprep.subr.bf16.mxu1 %v3747_v13  ;;  %v3691_v13 = vcombine.high %v672_v8, %v676_v9  ;;  %v3992_v6 = vld [vmem:[#allocation11 + $0xf4] ss:$8 sps:$4 sm:$0xff]   ;;  %v3990_v9 = vld [vmem:[#allocation11 + $0xf0] ss:$8 sps:$4 sm:$0xff]  }
 0x1da   :  { %v4019_v8 = vld [vmem:[#allocation11 + $0x1f4] ss:$8 sps:$4 sm:$0xff]  }
 0x1db   :  { %2330 = vmatpush2.bf16.msra.mxu0 %v3618_v18  ;;  %v3954_v18 = vld [vmem:[#allocation11 + $0x70] ss:$8 sps:$4 sm:$0xff]  }
 0x1dc   :  { %2373 = vmatpush2.bf16.msra.mxu1 %v3746_v19  ;;  %2331 = vmatprep.subr.bf16.mxu0 %v3611_v20  ;;  %v4409_v19 = vld [vmem:[%s4464_s4] sm:$0xff] }
 0x1dd   :  { %2374 = vmatprep.subr.bf16.mxu1 %v3739_v21  ;;  %v3959_v20 = vld [vmem:[#allocation11 + $0x64] ss:$8 sps:$4 sm:$0xff]   ;;  %v3969_v21 = vld [vmem:[#allocation11 + $0x170] ss:$8 sps:$4 sm:$0xff]   ;;  %v742_v22 = vrot.slane %v4409_v19, %v4371_v53 }
 0x1df   :  { %2332 = vmatpush2.bf16.msra.mxu0 %v3610_v30  ;;  %v3957_v30 = vld [vmem:[#allocation11 + $0x60] ss:$8 sps:$4 sm:$0xff]  }
 0x1e0   :  { %2375 = vmatpush2.bf16.msra.mxu1 %v3738_v31  ;;  %2333 = vmatprep.subr.bf16.mxu0 %v3603_v32 }
 0x1e1   :  { %2376 = vmatprep.subr.bf16.mxu1 %v3731_v26  ;;  %v3962_v26 = vld [vmem:[#allocation11 + $0x54] ss:$8 sps:$4 sm:$0xff]  }
 0x1e3   :  { %2334 = vmatpush2.bf16.msra.mxu0 %v3602_v27  ;;  %v3960_v27 = vld [vmem:[#allocation11 + $0x50] ss:$8 sps:$4 sm:$0xff]  }
 0x1e4   :  { %2377 = vmatpush2.bf16.msra.mxu1 %v3730_v37  ;;  %2335 = vmatprep.subr.bf16.mxu0 %v3595_v38  ;;  %v3981_v38 = vld [vmem:[#allocation11 + $0x150] ss:$8 sps:$4 sm:$0xff]  }
 0x1e5   :  { %2378 = vmatprep.subr.bf16.mxu1 %v3723_v39 }
 0x1e7   :  { %2336 = vmatpush2.bf16.msra.mxu0 %v3594_v44  ;;  %v3963_v44 = vld [vmem:[#allocation11 + $0x40] ss:$8 sps:$4 sm:$0xff]  }
 0x1e8   :  { %2379 = vmatpush2.bf16.msra.mxu1 %v3722_v45  ;;  %2337 = vmatprep.subr.bf16.mxu0 %v3587_v46  ;;  %v3968_v45 = vld [vmem:[#allocation11 + $0x34] ss:$8 sps:$4 sm:$0xff]   ;;  %v3987_v46 = vld [vmem:[#allocation11 + $0x140] ss:$8 sps:$4 sm:$0xff]  }
 0x1e9   :  { %2380 = vmatprep.subr.bf16.mxu1 %v3715_v47 }
 0x1eb   :  { %2338 = vmatpush2.bf16.msra.mxu0 %v3586_v58  ;;  %v3974_v58 = vld [vmem:[#allocation11 + $0x24] ss:$8 sps:$4 sm:$0xff]  }
 0x1ec   :  { %2381 = vmatpush2.bf16.msra.mxu1 %v3714_v59  ;;  %2339 = vmatprep.subr.bf16.mxu0 %v3579_v60  ;;  %v3993_v59 = vld [vmem:[#allocation11 + $0x130] ss:$8 sps:$4 sm:$0xff]   ;;  %v4001_v60 = vld [vmem:[#allocation11 + $0x124] ss:$8 sps:$4 sm:$0xff]  }
 0x1ed   :  { %2382 = vmatprep.subr.bf16.mxu1 %v3707_v61  ;;  %v3972_v61 = vld [vmem:[#allocation11 + $0x20] ss:$8 sps:$4 sm:$0xff]  }
 0x1ef   :  { %2340 = vmatpush2.bf16.msra.mxu0 %v3578_v2  ;;  %v3986_v2 = vld [vmem:[#allocation11 + $0x4] ss:$8 sps:$4 sm:$0xff]  }
 0x1f0   :  { %2383 = vmatpush2.bf16.msra.mxu1 %v3706_v3  ;;  %2341 = vmatprep.subr.bf16.mxu0 %v3571_v4  ;;  %v4005_v3 = vld [vmem:[#allocation11 + $0x110] ss:$8 sps:$4 sm:$0xff]   ;;  %v4013_v4 = vld [vmem:[#allocation11 + $0x104] ss:$8 sps:$4 sm:$0xff]  }
 0x1f1   :  { %2384 = vmatprep.subr.bf16.mxu1 %v3699_v5  ;;  %v3984_v5 = vld [vmem:[#allocation11] ss:$8 sps:$4 sm:$0xff]  }
 0x1f3   :  { %2342 = vmatpush2.bf16.msra.mxu0 %v3570_v10  ;;  %v3998_v10 = vld [vmem:[#allocation11 + $0xe4] ss:$8 sps:$4 sm:$0xff]  }
 0x1f4   :  { %2385 = vmatpush2.bf16.msra.mxu1 %v3698_v11  ;;  %2343 = vmatprep.subr.bf16.mxu0 %v3563_v12  ;;  %v4017_v11 = vld [vmem:[#allocation11 + $0x1f0] ss:$8 sps:$4 sm:$0xff]   ;;  %v4025_v12 = vld [vmem:[#allocation11 + $0x1e4] ss:$8 sps:$4 sm:$0xff]  }
 0x1f5   :  { %2386 = vmatprep.subr.bf16.mxu1 %v3691_v13  ;;  %v3996_v13 = vld [vmem:[#allocation11 + $0xe0] ss:$8 sps:$4 sm:$0xff]  }
 0x1f7   :  { %2344 = vmatpush2.bf16.msra.mxu0 %v3562_v14  ;;  %v4004_v14 = vld [vmem:[#allocation11 + $0xd4] ss:$8 sps:$4 sm:$0xff]  }
 0x1f8   :  { %2387 = vmatpush2.bf16.msra.mxu1 %v3690_v15  ;;  %3203 = vmatprep.subr.bf16.mxu0 %v3956_v16  ;;  %v4023_v15 = vld [vmem:[#allocation11 + $0x1e0] ss:$8 sps:$4 sm:$0xff]   ;;  %v4031_v16 = vld [vmem:[#allocation11 + $0x1d4] ss:$8 sps:$4 sm:$0xff]  }
 0x1f9   :  { %3246 = vmatprep.subr.bf16.mxu1 %v3971_v17  ;;  %v4002_v17 = vld [vmem:[#allocation11 + $0xd0] ss:$8 sps:$4 sm:$0xff]  }
 0x1fa   :  { %2346 = vmatmul.mubr.bf16.vlgmr.msra.gmra.mxu0 %v4388_v28  ;;  %v4414_v24 = vpop.f32.mrf.mxu0  ;;  %v4416_v25 = vpop.f32.mrf.mxu1 }
 0x1fb   :  { %2389 = vmatmul.mubr.bf16.vlgmr.msra.gmra.mxu1 %v4390_v29  ;;  %3204 = vmatpush1.bf16.msra.mxu0 %v3954_v18  ;;  %v3965_v29 = vld [vmem:[#allocation11 + $0x44] ss:$8 sps:$4 sm:$0xff]  }
 0x1fc   :  { %v2091_v31 = vpop.f32.mrf.mxu0  ;;  %v2134_v32 = vpop.f32.mrf.mxu1  ;;  %3205 = vmatprep.subr.bf16.mxu0 %v3959_v20  ;;  %3247 = vmatpush1.bf16.msra.mxu1 %v3969_v21  ;;  %v4010_v18 = vld [vmem:[#allocation11 + $0xc4] ss:$8 sps:$4 sm:$0xff]   ;;  %v4029_v20 = vld [vmem:[#allocation11 + $0x1d0] ss:$8 sps:$4 sm:$0xff]  }
 0x1fd   :  { %v2092_v34 = vadd.f32 %v2091_v31, %v742_v22  ;;  %3248 = vmatprep.subr.bf16.mxu1 %v3977_v23  ;;  %v4037_v21 = vld [vmem:[#allocation11 + $0x1c4] ss:$8 sps:$4 sm:$0xff]   ;;  %v4016_v23 = vld [vmem:[#allocation11 + $0xb4] ss:$8 sps:$4 sm:$0xff]  }
 0x1fe   :  { %v4419_v36 = vpop.f32.mrf.mxu0  ;;  %v4421_v28 = vpop.f32.mrf.mxu1  ;;  %v4040_v31 = vld [vmem:[#allocation11 + $0x1b4] ss:$8 sps:$4 sm:$0xff]  }
 0x1ff   :  { %3206 = vmatpush1.bf16.msra.mxu0 %v3957_v30  ;;  %v2135_v39 = vadd.f32 %v2134_v32, %v2092_v34  ;;  %v4035_v30 = vld [vmem:[#allocation11 + $0x1c0] ss:$8 sps:$4 sm:$0xff]   ;;  %v4014_v32 = vld [vmem:[#allocation11 + $0xb0] ss:$8 sps:$4 sm:$0xff]   ;;  %v4043_v34 = vld [vmem:[#allocation11 + $0x1a4] ss:$8 sps:$4 sm:$0xff]  }
 0x200   :  { %v2095_v37 = vpop.f32.mrf.mxu0  ;;  %3207 = vmatprep.subr.bf16.mxu0 %v3962_v26  ;;  %3249 = vmatpush1.bf16.msra.mxu1 %v3975_v33  ;;  %v2138_v42 = vpop.f32.mrf.mxu1  ;;  %v4022_v26 = vld [vmem:[#allocation11 + $0xa4] ss:$8 sps:$4 sm:$0xff]   ;;  %v4038_v33 = vld [vmem:[#allocation11 + $0x1b0] ss:$8 sps:$4 sm:$0xff]  }
 0x201   :  { %v2096_v40 = vadd.f32 %v2095_v37, %v742_v22  ;;  %3250 = vmatprep.subr.bf16.mxu1 %v3983_v35  ;;  %v2400_v47 = vmax.f32 %v2135_v39, 0.0  ;;  %v4008_v22 = vld [vmem:[#allocation11 + $0xc0] ss:$8 sps:$4 sm:$0xff]   ;;  %v738_v35 = vrot.slane %v4409_v19, %v4375_v55  ;;  %v4046_v39 = vld [vmem:[#allocation11 + $0x194] ss:$8 sps:$4 sm:$0xff]  }
 0x203   :  { %v2139_v43 = vadd.f32 %v2138_v42, %v2096_v40  ;;  %3208 = vmatpush1.bf16.msra.mxu0 %v3960_v27  ;;  %v4020_v27 = vld [vmem:[#allocation11 + $0xa0] ss:$8 sps:$4 sm:$0xff]   ;;  %v2094_v37 = vadd.f32 %v4419_v36, %v738_v35  ;;  %v2090_v40 = vadd.f32 %v4414_v24, %v738_v35  ;;  %v4100_v24 = vld [vmem:[#allocation11 + $0x374] ss:$8 sps:$4 sm:$0xff]  }
 0x204   :  { %3209 = vmatprep.subr.bf16.mxu0 %v3965_v29  ;;  %3251 = vmatpush1.bf16.msra.mxu1 %v3981_v38  ;;  %v4028_v29 = vld [vmem:[#allocation11 + $0x94] ss:$8 sps:$4 sm:$0xff]   ;;  %v4041_v38 = vld [vmem:[#allocation11 + $0x1a0] ss:$8 sps:$4 sm:$0xff]  }
 0x205   :  { %v2408_v48 = vmax.f32 %v2139_v43, 0.0  ;;  %3252 = vmatprep.subr.bf16.mxu1 %v3989_v41  ;;  %v4026_v41 = vld [vmem:[#allocation11 + $0x90] ss:$8 sps:$4 sm:$0xff]   ;;  %v2137_v42 = vadd.f32 %v4421_v28, %v2094_v37  ;;  %v4034_v43 = vld [vmem:[#allocation11 + $0x84] ss:$8 sps:$4 sm:$0xff]   ;;  %v2133_v36 = vadd.f32 %v4416_v25, %v2090_v40  ;;  %v750_v25 = vrot.slane %v4409_v19, %v160_v54 }
 0x206   :  { %v4050_v28 = vld [vmem:[#allocation11 + $0x270] ss:$8 sps:$4 sm:$0xff]   ;;  %v4106_v35 = vld [vmem:[#allocation11 + $0x354] ss:$8 sps:$4 sm:$0xff]   ;;  %v4107_v40 = vld [vmem:[#allocation11 + $0x340] ss:$8 sps:$4 sm:$0xff]  }
 0x207   :  { %v2416_v50 = vpack.c.bf16 %v2408_v48, %v2400_v47  ;;  %3210 = vmatpush1.bf16.msra.mxu0 %v3963_v44  ;;  %v4044_v44 = vld [vmem:[#allocation11 + $0x190] ss:$8 sps:$4 sm:$0xff]   ;;  %v2407_v47 = vmax.f32 %v2137_v42, 0.0  ;;  %v4047_v48 = vld [vmem:[#allocation11 + $0x180] ss:$8 sps:$4 sm:$0xff]  }
 0x208   :  { %3211 = vmatprep.subr.bf16.mxu0 %v3968_v45  ;;  %3253 = vmatpush1.bf16.msra.mxu1 %v3987_v46  ;;  %v4049_v45 = vld [vmem:[#allocation11 + $0x184] ss:$8 sps:$4 sm:$0xff]   ;;  %v4032_v46 = vld [vmem:[#allocation11 + $0x80] ss:$8 sps:$4 sm:$0xff]   ;;  %v4056_v54 = vld [vmem:[#allocation11 + $0x250] ss:$8 sps:$4 sm:$0xff]  }
 0x209   :  { %3235 = vmatprep.mubr.bf16.mxu0 %v2416_v50  ;;  %3254 = vmatprep.subr.bf16.mxu1 %v3995_v49  ;;  %v4052_v49 = vld [vmem:[#allocation11 + $0x274] ss:$8 sps:$4 sm:$0xff]   ;;  %v2399_v50 = vmax.f32 %v2133_v36, 0.0  ;;  %v4104_v37 = vld [vmem:[#allocation11 + $0x350] ss:$8 sps:$4 sm:$0xff]  }
 0x20a   :  { %v4112_v42 = vld [vmem:[#allocation11 + $0x334] ss:$8 sps:$4 sm:$0xff]   ;;  %v4115_v36 = vld [vmem:[#allocation11 + $0x324] ss:$8 sps:$4 sm:$0xff]  }
 0x20b   :  { %3212 = vmatpush1.bf16.msra.mxu0 %v3966_v57  ;;  %v2415_v57 = vpack.c.bf16 %v2407_v47, %v2399_v50  ;;  %v4113_v47 = vld [vmem:[#allocation11 + $0x320] ss:$8 sps:$4 sm:$0xff]   ;;  %v4116_v50 = vld [vmem:[#allocation11 + $0x310] ss:$8 sps:$4 sm:$0xff]  }
 0x20c   :  { %3213 = vmatprep.subr.bf16.mxu0 %v3974_v58  ;;  %3255 = vmatpush1.bf16.msra.mxu1 %v3993_v59  ;;  %v4055_v58 = vld [vmem:[#allocation11 + $0x264] ss:$8 sps:$4 sm:$0xff]   ;;  %v746_v59 = vrot.slane %v4409_v19, %v156_v56 }
 0x20d   :  { %3256 = vmatprep.subr.bf16.mxu1 %v4001_v60 }
 0x20f   :  { %3214 = vmatpush1.bf16.msra.mxu0 %v3972_v61 }
 0x210   :  { %3215 = vmatprep.subr.bf16.mxu0 %v3980_v62  ;;  %3257 = vmatpush1.bf16.msra.mxu1 %v3999_v63  ;;  %v4053_v62 = vld [vmem:[#allocation11 + $0x260] ss:$8 sps:$4 sm:$0xff]  }
 0x211   :  { %3258 = vmatprep.subr.bf16.mxu1 %v4007_v0 }
 0x213   :  { %3216 = vmatpush1.bf16.msra.mxu0 %v3978_v1  ;;  %v4058_v1 = vld [vmem:[#allocation11 + $0x254] ss:$8 sps:$4 sm:$0xff]  }
 0x214   :  { %3217 = vmatprep.subr.bf16.mxu0 %v3986_v2  ;;  %3259 = vmatpush1.bf16.msra.mxu1 %v4005_v3 }
 0x215   :  { %3260 = vmatprep.subr.bf16.mxu1 %v4013_v4 }
 0x217   :  { %3218 = vmatpush1.bf16.msra.mxu0 %v3984_v5 }
 0x218   :  { %3219 = vmatprep.subr.bf16.mxu0 %v3992_v6  ;;  %3261 = vmatpush1.bf16.msra.mxu1 %v4011_v7 }
 0x219   :  { %3262 = vmatprep.subr.bf16.mxu1 %v4019_v8  ;;  %v4061_v8 = vld [vmem:[#allocation11 + $0x244] ss:$8 sps:$4 sm:$0xff]  }
 0x21b   :  { %3220 = vmatpush2.bf16.msra.mxu0 %v3990_v9 }
 0x21c   :  { %3221 = vmatprep.subr.bf16.mxu0 %v3998_v10  ;;  %3263 = vmatpush2.bf16.msra.mxu1 %v4017_v11 }
 0x21d   :  { %3264 = vmatprep.subr.bf16.mxu1 %v4025_v12 }
 0x21f   :  { %3222 = vmatpush2.bf16.msra.mxu0 %v3996_v13 }
 0x220   :  { %3223 = vmatprep.subr.bf16.mxu0 %v4004_v14  ;;  %3265 = vmatpush2.bf16.msra.mxu1 %v4023_v15  ;;  %v4059_v14 = vld [vmem:[#allocation11 + $0x240] ss:$8 sps:$4 sm:$0xff]  }
 0x221   :  { %3266 = vmatprep.subr.bf16.mxu1 %v4031_v16  ;;  %v4064_v16 = vld [vmem:[#allocation11 + $0x234] ss:$8 sps:$4 sm:$0xff]  }
 0x223   :  { %3224 = vmatpush2.bf16.msra.mxu0 %v4002_v17 }
 0x224   :  { %3225 = vmatprep.subr.bf16.mxu0 %v4010_v18  ;;  %3267 = vmatpush2.bf16.msra.mxu1 %v4029_v20 }
 0x225   :  { %3268 = vmatprep.subr.bf16.mxu1 %v4037_v21 }
 0x227   :  { %3226 = vmatpush2.bf16.msra.mxu0 %v4008_v22  ;;  %v4062_v22 = vld [vmem:[#allocation11 + $0x230] ss:$8 sps:$4 sm:$0xff]  }
 0x228   :  { %3227 = vmatprep.subr.bf16.mxu0 %v4016_v23  ;;  %3269 = vmatpush2.bf16.msra.mxu1 %v4035_v30  ;;  %v4098_v23 = vld [vmem:[#allocation11 + $0x370] ss:$8 sps:$4 sm:$0xff]  }
 0x229   :  { %3270 = vmatprep.subr.bf16.mxu1 %v4040_v31  ;;  %v4067_v31 = vld [vmem:[#allocation11 + $0x224] ss:$8 sps:$4 sm:$0xff]  }
 0x22b   :  { %3228 = vmatpush2.bf16.msra.mxu0 %v4014_v32  ;;  %v4103_v32 = vld [vmem:[#allocation11 + $0x364] ss:$8 sps:$4 sm:$0xff]  }
 0x22c   :  { %3229 = vmatprep.subr.bf16.mxu0 %v4022_v26  ;;  %3271 = vmatpush2.bf16.msra.mxu1 %v4038_v33  ;;  %v4065_v26 = vld [vmem:[#allocation11 + $0x220] ss:$8 sps:$4 sm:$0xff]  }
 0x22d   :  { %3272 = vmatprep.subr.bf16.mxu1 %v4043_v34  ;;  %v4101_v33 = vld [vmem:[#allocation11 + $0x360] ss:$8 sps:$4 sm:$0xff]   ;;  %v4070_v34 = vld [vmem:[#allocation11 + $0x214] ss:$8 sps:$4 sm:$0xff]  }
 0x22f   :  { %3230 = vmatpush2.bf16.msra.mxu0 %v4020_v27  ;;  %v4068_v27 = vld [vmem:[#allocation11 + $0x210] ss:$8 sps:$4 sm:$0xff]  }
 0x230   :  { %3231 = vmatprep.subr.bf16.mxu0 %v4028_v29  ;;  %3273 = vmatpush2.bf16.msra.mxu1 %v4041_v38  ;;  %v4073_v29 = vld [vmem:[#allocation11 + $0x204] ss:$8 sps:$4 sm:$0xff]  }
 0x231   :  { %3274 = vmatprep.subr.bf16.mxu1 %v4046_v39  ;;  %v4109_v38 = vld [vmem:[#allocation11 + $0x344] ss:$8 sps:$4 sm:$0xff]   ;;  %v4071_v39 = vld [vmem:[#allocation11 + $0x200] ss:$8 sps:$4 sm:$0xff]  }
 0x233   :  { %3232 = vmatpush2.bf16.msra.mxu0 %v4026_v41  ;;  %v4076_v41 = vld [vmem:[#allocation11 + $0x2f4] ss:$8 sps:$4 sm:$0xff]  }
 0x234   :  { %3233 = vmatprep.subr.bf16.mxu0 %v4034_v43  ;;  %3275 = vmatpush2.bf16.msra.mxu1 %v4044_v44  ;;  %v4074_v43 = vld [vmem:[#allocation11 + $0x2f0] ss:$8 sps:$4 sm:$0xff]  }
 0x235   :  { %3276 = vmatprep.subr.bf16.mxu1 %v4049_v45  ;;  %v4110_v44 = vld [vmem:[#allocation11 + $0x330] ss:$8 sps:$4 sm:$0xff]   ;;  %v4079_v45 = vld [vmem:[#allocation11 + $0x2e4] ss:$8 sps:$4 sm:$0xff]  }
 0x237   :  { %3234 = vmatpush2.bf16.msra.mxu0 %v4032_v46  ;;  %v4077_v46 = vld [vmem:[#allocation11 + $0x2e0] ss:$8 sps:$4 sm:$0xff]  }
 0x238   :  { %3277 = vmatpush2.bf16.msra.mxu1 %v4047_v48  ;;  %3289 = vmatprep.subr.bf16.mxu0 %v4052_v49  ;;  %v4082_v48 = vld [vmem:[#allocation11 + $0x2d4] ss:$8 sps:$4 sm:$0xff]  }
 0x239   :  { %3332 = vmatprep.subr.bf16.mxu1 %v4100_v24  ;;  %v4118_v49 = vld [vmem:[#allocation11 + $0x314] ss:$8 sps:$4 sm:$0xff]   ;;  %v4080_v24 = vld [vmem:[#allocation11 + $0x2d0] ss:$8 sps:$4 sm:$0xff]  }
 0x23a   :  { %v2175_v60 = vpop.f32.mrf.mxu0  ;;  %v2218_v61 = vpop.f32.mrf.mxu1  ;;  %3236 = vmatmul.mubr.bf16.vlgmr.msra.gmra.mxu0 %v2415_v57  ;;  %v4121_v57 = vld [vmem:[#allocation11 + $0x304] ss:$8 sps:$4 sm:$0xff]  }
 0x23b   :  { %3290 = vmatpush1.bf16.msra.mxu0 %v4050_v28  ;;  %v2176_v3 = vadd.f32 %v2175_v60, %v746_v59  ;;  %v4085_v28 = vld [vmem:[#allocation11 + $0x2c4] ss:$8 sps:$4 sm:$0xff]   ;;  %v4124_v60 = vld [vmem:[#allocation11 + $0x3f4] ss:$8 sps:$4 sm:$0xff]  }
 0x23c   :  { %v2177_v63 = vpop.f32.mrf.mxu0  ;;  %v2220_v0 = vpop.f32.mrf.mxu1  ;;  %3291 = vmatprep.subr.bf16.mxu0 %v4055_v58  ;;  %v4083_v58 = vld [vmem:[#allocation11 + $0x2c0] ss:$8 sps:$4 sm:$0xff]  }
 0x23d   :  { %v2178_v2 = vadd.f32 %v2177_v63, %v750_v25  ;;  %v2219_v11 = vadd.f32 %v2218_v61, %v2176_v3  ;;  %v4086_v61 = vld [vmem:[#allocation11 + $0x2b0] ss:$8 sps:$4 sm:$0xff]   ;;  %v4091_v63 = vld [vmem:[#allocation11 + $0x2a4] ss:$8 sps:$4 sm:$0xff]   ;;  %v4094_v3 = vld [vmem:[#allocation11 + $0x294] ss:$8 sps:$4 sm:$0xff]  }
 0x23e   :  { %v2179_v4 = vpop.f32.mrf.mxu0  ;;  %v2222_v5 = vpop.f32.mrf.mxu1 }
 0x23f   :  { %v2180_v6 = vadd.f32 %v2179_v4, %v746_v59  ;;  %3292 = vmatpush1.bf16.msra.mxu0 %v4053_v62  ;;  %v2221_v56 = vadd.f32 %v2220_v0, %v2178_v2  ;;  %v2401_v20 = vmax.f32 %v2219_v11, 0.0  ;;  %v4088_v59 = vld [vmem:[#allocation11 + $0x2b4] ss:$8 sps:$4 sm:$0xff]   ;;  %v4122_v62 = vld [vmem:[#allocation11 + $0x3f0] ss:$8 sps:$4 sm:$0xff]   ;;  %v753_v11 = vsub.s32 4, %v4368_v52 }
 0x240   :  { %v2181_v7 = vpop.f32.mrf.mxu0  ;;  %3293 = vmatprep.subr.bf16.mxu0 %v4058_v1  ;;  %v2224_v12 = vpop.f32.mrf.mxu1  ;;  %v4127_v0 = vld [vmem:[#allocation11 + $0x3e4] ss:$8 sps:$4 sm:$0xff]   ;;  %v4089_v1 = vld [vmem:[#allocation11 + $0x2a0] ss:$8 sps:$4 sm:$0xff]   ;;  %v4130_v4 = vld [vmem:[#allocation11 + $0x3d4] ss:$8 sps:$4 sm:$0xff]  }
 0x241   :  { %v2223_v9 = vadd.f32 %v2222_v5, %v2180_v6  ;;  %v2182_v10 = vadd.f32 %v2181_v7, %v750_v25  ;;  %v2402_v17 = vmax.f32 %v2221_v56, 0.0  ;;  %v4119_v25 = vld [vmem:[#allocation11 + $0x300] ss:$8 sps:$4 sm:$0xff]   ;;  %v4092_v5 = vld [vmem:[#allocation11 + $0x290] ss:$8 sps:$4 sm:$0xff]  }
 0x242   :  { %v4125_v2 = vld [vmem:[#allocation11 + $0x3e0] ss:$8 sps:$4 sm:$0xff]   ;;  %v4128_v6 = vld [vmem:[#allocation11 + $0x3d0] ss:$8 sps:$4 sm:$0xff]   ;;  %v4133_v7 = vld [vmem:[#allocation11 + $0x3c4] ss:$8 sps:$4 sm:$0xff]  }
 0x243   :  { %v2225_v13 = vadd.f32 %v2224_v12, %v2182_v10  ;;  %3294 = vmatpush1.bf16.msra.mxu0 %v4056_v54  ;;  %v2409_v15 = vmax.f32 %v2223_v9, 0.0  ;;  %v4097_v54 = vld [vmem:[#allocation11 + $0x284] ss:$8 sps:$4 sm:$0xff]   ;;  %v4131_v56 = vld [vmem:[#allocation11 + $0x3c0] ss:$8 sps:$4 sm:$0xff]   ;;  %v757_v10 = vsub.s32 5, %v4368_v52 }
 0x244   :  { %3295 = vmatprep.subr.bf16.mxu0 %v4061_v8  ;;  %v4095_v8 = vld [vmem:[#allocation11 + $0x280] ss:$8 sps:$4 sm:$0xff]   ;;  %v4136_v9 = vld [vmem:[#allocation11 + $0x3b4] ss:$8 sps:$4 sm:$0xff]   ;;  %v4134_v12 = vld [vmem:[#allocation11 + $0x3b0] ss:$8 sps:$4 sm:$0xff]  }
 0x245   :  { %v2410_v18 = vmax.f32 %v2225_v13, 0.0  ;;  %v2417_v30 = vpack.c.bf16 %v2409_v15, %v2401_v20  ;;  %v4139_v13 = vld [vmem:[#allocation11 + $0x3a4] ss:$8 sps:$4 sm:$0xff]   ;;  %v754_v15 = vrot.slane %v4409_v19, %v753_v11 }
 0x247   :  { %v2418_v21 = vpack.c.bf16 %v2410_v18, %v2402_v17  ;;  %3296 = vmatpush1.bf16.msra.mxu0 %v4059_v14  ;;  %v758_v14 = vrot.slane %v4409_v19, %v757_v10  ;;  %v4137_v18 = vld [vmem:[#allocation11 + $0x3a0] ss:$8 sps:$4 sm:$0xff]   ;;  %v4285_v10 = vmov 0  }
 0x248   :  { %3297 = vmatprep.subr.bf16.mxu0 %v4064_v16  ;;  %3889 = vset.pattern.permute.xlu1 %v4285_v10 }
 0x249   :  { %3278 = vmatprep.mubr.bf16.mxu1 %v2418_v21  ;;  %v4142_v21 = vld [vmem:[#allocation11 + $0x394] ss:$8 sps:$4 sm:$0xff]   ;;  %3890 = vset.pattern.permute.xlu0 %v4285_v10 }
 0x24a   :  { %3279 = vmatmul.mubr.bf16.vlgmr.msra.gmra.mxu1 %v2417_v30 }
 0x24b   :  { %3298 = vmatpush1.bf16.msra.mxu0 %v4062_v22  ;;  %3333 = vmatpush1.bf16.msra.mxu1 %v4098_v23 }
 0x24c   :  { %3299 = vmatprep.subr.bf16.mxu0 %v4067_v31  ;;  %3334 = vmatprep.subr.bf16.mxu1 %v4103_v32 }
 0x24f   :  { %3300 = vmatpush1.bf16.msra.mxu0 %v4065_v26  ;;  %3335 = vmatpush1.bf16.msra.mxu1 %v4101_v33  ;;  %v4140_v33 = vld [vmem:[#allocation11 + $0x390] ss:$8 sps:$4 sm:$0xff]  }
 0x250   :  { %3301 = vmatprep.subr.bf16.mxu0 %v4070_v34  ;;  %3336 = vmatprep.subr.bf16.mxu1 %v4106_v35  ;;  %v4145_v35 = vld [vmem:[#allocation11 + $0x384] ss:$8 sps:$4 sm:$0xff]  }
 0x253   :  { %3302 = vmatpush1.bf16.msra.mxu0 %v4068_v27  ;;  %3337 = vmatpush1.bf16.msra.mxu1 %v4104_v37 }
 0x254   :  { %3303 = vmatprep.subr.bf16.mxu0 %v4073_v29  ;;  %3338 = vmatprep.subr.bf16.mxu1 %v4109_v38 }
 0x257   :  { %3304 = vmatpush1.bf16.msra.mxu0 %v4071_v39  ;;  %3339 = vmatpush1.bf16.msra.mxu1 %v4107_v40 }
 0x258   :  { %3305 = vmatprep.subr.bf16.mxu0 %v4076_v41  ;;  %3340 = vmatprep.subr.bf16.mxu1 %v4112_v42  ;;  %v4143_v41 = vld [vmem:[#allocation11 + $0x380] ss:$8 sps:$4 sm:$0xff]  }
 0x25b   :  { %3306 = vmatpush2.bf16.msra.mxu0 %v4074_v43  ;;  %3341 = vmatpush1.bf16.msra.mxu1 %v4110_v44 }
 0x25c   :  { %3307 = vmatprep.subr.bf16.mxu0 %v4079_v45  ;;  %3342 = vmatprep.subr.bf16.mxu1 %v4115_v36 }
 0x25f   :  { %3308 = vmatpush2.bf16.msra.mxu0 %v4077_v46  ;;  %3343 = vmatpush1.bf16.msra.mxu1 %v4113_v47  ;;  %v765_v47 = vsub.s32 7, %v4368_v52 }
 0x260   :  { %3309 = vmatprep.subr.bf16.mxu0 %v4082_v48  ;;  %3344 = vmatprep.subr.bf16.mxu1 %v4118_v49  ;;  %v761_v48 = vsub.s32 6, %v4368_v52 }
 0x261   :  { %v766_v49 = vrot.slane %v4409_v19, %v765_v47 }
 0x263   :  { %3310 = vmatpush2.bf16.msra.mxu0 %v4080_v24  ;;  %3345 = vmatpush1.bf16.msra.mxu1 %v4116_v50  ;;  %v762_v24 = vrot.slane %v4409_v19, %v761_v48 }
 0x264   :  { %3311 = vmatprep.subr.bf16.mxu0 %v4085_v28  ;;  %3346 = vmatprep.subr.bf16.mxu1 %v4121_v57 }
 0x267   :  { %3312 = vmatpush2.bf16.msra.mxu0 %v4083_v58  ;;  %3347 = vmatpush1.bf16.msra.mxu1 %v4119_v25 }
 0x268   :  { %3313 = vmatprep.subr.bf16.mxu0 %v4088_v59  ;;  %3348 = vmatprep.subr.bf16.mxu1 %v4124_v60 }
 0x26b   :  { %3314 = vmatpush2.bf16.msra.mxu0 %v4086_v61  ;;  %3349 = vmatpush2.bf16.msra.mxu1 %v4122_v62 }
 0x26c   :  { %3315 = vmatprep.subr.bf16.mxu0 %v4091_v63  ;;  %3350 = vmatprep.subr.bf16.mxu1 %v4127_v0 }
 0x26f   :  { %3316 = vmatpush2.bf16.msra.mxu0 %v4089_v1  ;;  %3351 = vmatpush2.bf16.msra.mxu1 %v4125_v2 }
 0x270   :  { %3317 = vmatprep.subr.bf16.mxu0 %v4094_v3  ;;  %3352 = vmatprep.subr.bf16.mxu1 %v4130_v4 }
 0x273   :  { %3318 = vmatpush2.bf16.msra.mxu0 %v4092_v5  ;;  %3353 = vmatpush2.bf16.msra.mxu1 %v4128_v6 }
 0x274   :  { %3319 = vmatprep.subr.bf16.mxu0 %v4097_v54  ;;  %3354 = vmatprep.subr.bf16.mxu1 %v4133_v7 }
 0x277   :  { %3320 = vmatpush2.bf16.msra.mxu0 %v4095_v8  ;;  %3355 = vmatpush2.bf16.msra.mxu1 %v4131_v56 }
 0x278   :  { %3356 = vmatprep.subr.bf16.mxu1 %v4136_v9  ;;  %v3401_v9 = vld [vmem:[#allocation2] sm:$0x1] }
 0x279   :  { %3404 = vperm.xlu1 %3889, %v3401_v9  }
 0x27a   :  { %v2261_v16 = vpop.f32.mrf.mxu0 }
 0x27b   :  { %v2304_v17 = vpop.f32.mrf.mxu1  ;;  %3357 = vmatpush2.bf16.msra.mxu1 %v4134_v12  ;;  %v2262_v30 = vadd.f32 %v2261_v16, %v754_v15 }
 0x27c   :  { %v2263_v20 = vpop.f32.mrf.mxu0  ;;  %3358 = vmatprep.subr.bf16.mxu1 %v4139_v13 }
 0x27d   :  { %v2264_v22 = vadd.f32 %v2263_v20, %v758_v14  ;;  %v2306_v23 = vpop.f32.mrf.mxu1  ;;  %v2305_v38 = vadd.f32 %v2304_v17, %v2262_v30 }
 0x27e   :  { %v2265_v31 = vpop.f32.mrf.mxu0 }
 0x27f   :  { %v2266_v32 = vadd.f32 %v2265_v31, %v754_v15  ;;  %v2308_v26 = vpop.f32.mrf.mxu1  ;;  %3359 = vmatpush2.bf16.msra.mxu1 %v4137_v18  ;;  %v2307_v27 = vadd.f32 %v2306_v23, %v2264_v22  ;;  %v2403_v45 = vmax.f32 %v2305_v38, 0.0  ;;  %v2551_v15 = vld [vmem:[%s4466_s6] sm:$0x3]  ;;  %s4286_s6 = smov [#allocation12]  }
 0x280   :  { %v2267_v34 = vpop.f32.mrf.mxu0  ;;  %3360 = vmatprep.subr.bf16.mxu1 %v4142_v21  ;;  %v2556_v20 = vrot.slane %v2551_v15, %v4375_v55  ;;  %v2560_v21 = vrot.slane %v2551_v15, %v4371_v53 }
 0x281   :  { %v2309_v37 = vadd.f32 %v2308_v26, %v2266_v32  ;;  %v2268_v29 = vadd.f32 %v2267_v34, %v758_v14  ;;  %v2310_v39 = vpop.f32.mrf.mxu1  ;;  %v2404_v43 = vmax.f32 %v2307_v27, 0.0 }
 0x283   :  { %v2311_v40 = vadd.f32 %v2310_v39, %v2268_v29  ;;  %3361 = vmatpush2.bf16.msra.mxu1 %v4140_v33  ;;  %v2411_v42 = vmax.f32 %v2309_v37, 0.0  ;;  %v3379_v37 = vld [vmem:[%s4467_s7] sm:$0x3]  ;;  %s3437_s7 = sshll.u32 %s4286_s6, 4  ;;  %s3438_s7 = int_to_ptr.vmem [resolvable:$true] %s3437_s7 }
 0x284   :  { %3362 = vmatprep.subr.bf16.mxu1 %v4145_v35  ;;  %v3388_v48 = vrot.slane %v3379_v37, %v4371_v53  ;;  %s4246_s19 = scalar_lea.vmem %s3438_s7, 16  ;;  %s4250_s20 = scalar_lea.vmem %s3438_s7, 32 }
 0x285   :  { %v2412_v44 = vmax.f32 %v2311_v40, 0.0  ;;  %v2419_v46 = vpack.c.bf16 %v2411_v42, %v2403_v45  ;;  %v3384_v45 = vrot.slane %v3379_v37, %v4375_v55  ;;  %p4247_p11 = scmp.ne.s32.totalorder %s3438_s7, %s4246_s19  ;;  %p4251_p12 = scmp.lt.s32.totalorder %s3438_s7, %s3438_s7 }
 0x286   :  { %p4252_p13 = scmp.lt.s32.totalorder %s4250_s20, %s4246_s19 }
 0x287   :  { %v2420_v36 = vpack.c.bf16 %v2412_v44, %v2404_v43  ;;  %3363 = vmatpush2.bf16.msra.mxu1 %v4143_v41 }
 0x288   :  { %p4253_p0 = por %p4252_p13, %p4251_p12 }
 0x289   :  { %3321 = vmatprep.mubr.bf16.mxu0 %v2420_v36 }
 0x28a   :  { %3322 = vmatmul.mubr.bf16.vlgmr.msra.gmra.mxu0 %v2419_v46  ;;  %p4254_p1 = pnand %p4253_p0, %p4247_p11 }
 0x2ba   :  { %v2347_v50 = vpop.f32.mrf.mxu0 }
 0x2bb   :  { %v2390_v28 = vpop.f32.mrf.mxu1  ;;  %v2348_v59 = vadd.f32 %v2347_v50, %v762_v24 }
 0x2bc   :  { %v2349_v57 = vpop.f32.mrf.mxu0 }
 0x2bd   :  { %v2350_v58 = vadd.f32 %v2349_v57, %v766_v49  ;;  %v2392_v25 = vpop.f32.mrf.mxu1  ;;  %v2391_v3 = vadd.f32 %v2390_v28, %v2348_v59 }
 0x2be   :  { %v2351_v60 = vpop.f32.mrf.mxu0 }
 0x2bf   :  { %v2352_v61 = vadd.f32 %v2351_v60, %v762_v24  ;;  %v2394_v62 = vpop.f32.mrf.mxu1  ;;  %v2393_v0 = vadd.f32 %v2392_v25, %v2350_v58  ;;  %v2405_v19 = vmax.f32 %v2391_v3, 0.0  ;;  %v3416_v3 = vand.u32 127, %v146_v51 }
 0x2c0   :  { %v2353_v63 = vpop.f32.mrf.mxu0 }
 0x2c1   :  { %v2395_v1 = vadd.f32 %v2394_v62, %v2352_v61  ;;  %v2354_v2 = vadd.f32 %v2353_v63, %v766_v49  ;;  %v2396_v4 = vpop.f32.mrf.mxu1  ;;  %v2406_v54 = vmax.f32 %v2393_v0, 0.0 }
 0x2c3   :  { %v2397_v5 = vadd.f32 %v2396_v4, %v2354_v2  ;;  %v2413_v6 = vmax.f32 %v2395_v1, 0.0  ;;  %v3421_v4 = vadd.s32 4294967288, %v3416_v3 }
 0x2c5   :  { %v2414_v7 = vmax.f32 %v2397_v5, 0.0  ;;  %v2421_v56 = vpack.c.bf16 %v2413_v6, %v2405_v19  ;;  %v3419_v6 = vsub.s32 %v3416_v3, %v4368_v52 }
 0x2c7   :  { %v2422_v8 = vpack.c.bf16 %v2414_v7, %v2406_v54  ;;  %v3424_v7 = vsub.s32 %v3421_v4, %v4368_v52 }
 0x2c9   :  { %3364 = vmatprep.mubr.bf16.mxu1 %v2422_v8 }
 0x2ca   :  { %3365 = vmatmul.mubr.bf16.vlgmr.msra.gmra.mxu1 %v2421_v56 }
 0x2f4   :  { %v3405_v2 = vpop.permute.xlu1 %3404 }
 0x2f5   :  { %v3410_v53 = vrot.slane %v3405_v2, %v4375_v55 }
 0x2fa   :  { %v3237_v11 = vpop.f32.mrf.mxu0 }
 0x2fb   :  { %v3238_v30 = vadd.f32 %v3237_v11, %v2556_v20 }
 0x2fc   :  { %v3239_v12 = vpop.f32.mrf.mxu0 }
 0x2fd   :  { %v3240_v31 = vadd.f32 %v3239_v12, %v2560_v21 }
 0x2fe   :  { %v3241_v13 = vpop.f32.mrf.mxu0 }
 0x2ff   :  { %v3242_v34 = vadd.f32 %v3241_v13, %v2556_v20 }
 0x300   :  { %v3243_v16 = vpop.f32.mrf.mxu0 }
 0x301   :  { %v3244_v29 = vadd.f32 %v3243_v16, %v2560_v21 }
 0x30a   :  { %v3280_v14 = vpop.f32.mrf.mxu1 }
 0x30b   :  { %v3281_v32 = vadd.f32 %v3280_v14, %v3238_v30 }
 0x30c   :  { %v3282_v17 = vpop.f32.mrf.mxu1 }
 0x30d   :  { %v3283_v35 = vadd.f32 %v3282_v17, %v3240_v31 }
 0x30e   :  { %v3284_v22 = vpop.f32.mrf.mxu1 }
 0x30f   :  { %v3285_v39 = vadd.f32 %v3284_v22, %v3242_v34 }
 0x310   :  { %v3286_v26 = vpop.f32.mrf.mxu1 }
 0x311   :  { %v3287_v42 = vadd.f32 %v3286_v26, %v3244_v29 }
 0x34a   :  { %v3323_v18 = vpop.f32.mrf.mxu0 }
 0x34b   :  { %v3324_v27 = vadd.f32 %v3323_v18, %v3281_v32 }
 0x34c   :  { %v3325_v23 = vpop.f32.mrf.mxu0 }
 0x34d   :  { %v3326_v40 = vadd.f32 %v3325_v23, %v3283_v35 }
 0x34e   :  { %v3327_v33 = vpop.f32.mrf.mxu0 }
 0x34f   :  { %v3328_v36 = vadd.f32 %v3327_v33, %v3285_v39 }
 0x350   :  { %v3329_v43 = vpop.f32.mrf.mxu0 }
 0x351   :  { %v3330_v24 = vadd.f32 %v3329_v43, %v3287_v42 }
 0x38a   :  { %v3366_v38 = vpop.f32.mrf.mxu1 }
 0x38b   :  { %v3367_v41 = vadd.f32 %v3366_v38, %v3324_v27 }
 0x38c   :  { %v3368_v44 = vpop.f32.mrf.mxu1 }
 0x38d   :  { %v3375_v46 = vmax.f32 %v3367_v41, 0.0  ;;  %v3369_v47 = vadd.f32 %v3368_v44, %v3326_v40 }
 0x38e   :  { %v3370_v49 = vpop.f32.mrf.mxu1 }
 0x38f   :  { %v3376_v50 = vmax.f32 %v3369_v47, 0.0  ;;  %v3371_v28 = vadd.f32 %v3370_v49, %v3328_v36  ;;  %v3391_v59 = vmul.f32 %v3384_v45, %v3375_v46 }
 0x390   :  { %v3372_v57 = vpop.f32.mrf.mxu1 }
 0x391   :  { %v3377_v58 = vmax.f32 %v3371_v28, 0.0  ;;  %v3373_v25 = vadd.f32 %v3372_v57, %v3330_v24  ;;  %v3392_v60 = vmul.f32 %v3388_v48, %v3376_v50 }
 0x393   :  { %v3378_v61 = vmax.f32 %v3373_v25, 0.0  ;;  %v3395_v62 = vadd.f32 %v3392_v60, %v3391_v59  ;;  %v3393_v63 = vmul.f32 %v3384_v45, %v3377_v58 }
 0x395   :  { %v3394_v0 = vmul.f32 %v3388_v48, %v3378_v61  ;;  %3396 = vadd.xlane.f32.xlu0 %v3395_v62 }
 0x397   :  { %v3398_v1 = vadd.f32 %v3394_v0, %v3393_v63 }
 0x399   :  { %3399 = vadd.xlane.f32.xlu0 %v3398_v1 }
 0x41e   :  { %v3397_v5 = vpop.xlane.xlu0 %3396 }
 0x41f   :  { %v3411_v54 = vadd.f32 %v3410_v53, %v3397_v5 }
 0x421   :  { %v3420_v56 = vrot.slane %v3411_v54, %v3419_v6 }
 0x422   :  { %v3400_v19 = vpop.xlane.xlu0 %3399 }
 0x423   :  { %v3412_v8 = vadd.f32 %v3410_v53, %v3400_v19 }
 0x425   :  { %v3425_v9 = vrot.slane %v3412_v8, %v3424_v7 }
 0x427   :  { %v3427_v10 = vsel %vm3426_vm1, %v3425_v9, %v3420_v56 }
 0x428   :  { %3430 = vst.msk [vmem:[#allocation12] sm:$0x1] %vm3429_vm2, %v3427_v10 }
 0x429   :  { %4257 = shalt.err (!%p4254_p1)
}
 0x42a   :  { %3440 = dma.vmem_to_hbm [thread:$0]  %s3438_s7, 16, %s4469_s9, [#allocation5]  }
 0x42b   :  { %4272 = dma.done.wait [#allocation5], 16  }
 0x42c   :  { %4273 = vsyncadd [#allocation5], 4294967280 }
 0x42d   :  { %3444 = vsyncpa [#allocation4], 1 }
 0x42e   :  { %3445 = vsyncpa [#allocation7], 1 }
 0x42f   :  { %3446 = vsyncpa [#allocation10], 1 }
 0x430   :  { %3447 = vsyncpa [#allocation5], 1 }

// kernel: tpu_custom_call.1
= control target key start
LH: loop header
LB: loop body
LE: loop exit
PB: predicated region body
PF: predicated region fallthrough
CT: control target
= control target key end

     0   :  { %s4460_s0 = inlined_call_operand.hbm [shape: bf16[16,160], index: 0, kind: input, shape index: {}]   ;;  %s4461_s1 = inlined_call_operand.hbm [shape: bf16[160,512], index: 1, kind: input, shape index: {}]   ;;  %s4462_s2 = inlined_call_operand.hbm [shape: f32[1,512], index: 2, kind: input, shape index: {}]   ;;  %s4463_s3 = inlined_call_operand.hbm [shape: bf16[512,1024], index: 3, kind: input, shape index: {}]   ;;  %s4464_s4 = inlined_call_operand.vmem [shape: f32[1,1024], index: 4, kind: input, shape index: {}]   ;;  %s4465_s5 = inlined_call_operand.hbm [shape: bf16[1024,256], index: 5, kind: input, shape index: {}]   ;;  %s4466_s6 = inlined_call_operand.vmem [shape: f32[1,256], index: 6, kind: input, shape index: {}]   ;;  %s4467_s7 = inlined_call_operand.vmem [shape: f32[1,256], index: 7, kind: input, shape index: {}]   ;;  %s4468_s8 = inlined_call_operand.<no memory space> [shape: f32[1,1], index: 8, kind: input, shape index: {}]   ;;  %s4469_s9 = inlined_call_operand.hbm [shape: f32[1,1,16], index: 9, kind: output, shape index: {}]  }
   0x1   :  { %v14_v0 = vstv %s4468_s8 }
   0x2   :  { %15 = vst [vmem:[#allocation2] sm:$0x1] %v14_v0 }
   0x3   :  { %16 = vsyncpa [#allocation4], 0 }
   0x4   :  { %17 = vsyncpa [#allocation7], 0 }
   0x5   :  { %18 = vsyncpa [#allocation10], 0 }
   0x6   :  { %19 = vsyncpa [#allocation5], 0  ;;  %s4274_s11 = smov [#allocation6]  }
   0x7   :  { %s37_s12 = sshll.u32 %s4274_s11, 4  ;;  %s38_s12 = int_to_ptr.vmem [resolvable:$true] %s37_s12 }
   0x8   :  { %s4154_s13 = scalar_lea.vmem %s38_s12, 5120  ;;  %p4159_p1 = scmp.lt.s32.totalorder %s38_s12, %s38_s12 }
   0x9   :  { %p4155_p0 = scmp.ne.s32.totalorder %s38_s12, %s4154_s13  ;;  %p4160_p2 = scmp.lt.s32.totalorder %s4154_s13, %s4154_s13 }
   0xb   :  { %p4161_p3 = por %p4160_p2, %p4159_p1 }
   0xd   :  { %p4162_p4 = pnand %p4161_p3, %p4155_p0 }
   0xf   :  { %4165 = shalt.err (!%p4162_p4)
}
  0x10   :  { %s4275_s14 = smov 256   ;;  %s4276_s15 = smov 16  }
  0x11   :  { %43 = dma.hbm_to_vmem [thread:$0]  %s4461_s1, 5120, %s38_s12, [#allocation7], %s4275_s14, %s4275_s14, %s4276_s15  }
  0x12   :  { %s4277_s8 = smov [#allocation9]  }
  0x13   :  { %s59_s18 = sshll.u32 %s4277_s8, 4  ;;  %s60_s18 = int_to_ptr.vmem [resolvable:$true] %s59_s18 }
  0x14   :  { %s4174_s19 = scalar_lea.vmem %s60_s18, 32768  ;;  %p4179_p6 = scmp.lt.s32.totalorder %s60_s18, %s60_s18 }
  0x15   :  { %p4175_p5 = scmp.ne.s32.totalorder %s60_s18, %s4174_s19  ;;  %p4180_p7 = scmp.lt.s32.totalorder %s4174_s19, %s4174_s19 }
  0x17   :  { %p4181_p8 = por %p4180_p7, %p4179_p6 }
  0x19   :  { %p4182_p9 = pnand %p4181_p8, %p4175_p5 }
  0x1b   :  { %4185 = shalt.err (!%p4182_p9)
}
  0x1c   :  { %s4278_s20 = smov 512   ;;  %s4279_s21 = smov 32  }
  0x1d   :  { %65 = dma.hbm_to_vmem [thread:$0]  %s4463_s3, 32768, %s60_s18, [#allocation10], %s4278_s20, %s4278_s20, %s4279_s21  }
  0x1e   :  { %s4280_s24 = smov [#allocation3]  }
  0x1f   :  { %s25_s25 = sshll.u32 %s4280_s24, 4  ;;  %s26_s25 = int_to_ptr.vmem [resolvable:$true] %s25_s25 }
  0x20   :  { %s4194_s1 = scalar_lea.vmem %s26_s25, 256  ;;  %p4199_p11 = scmp.lt.s32.totalorder %s26_s25, %s26_s25 }
  0x21   :  { %p4195_p10 = scmp.ne.s32.totalorder %s26_s25, %s4194_s1  ;;  %p4200_p12 = scmp.lt.s32.totalorder %s4194_s1, %s4194_s1 }
  0x23   :  { %p4201_p13 = por %p4200_p12, %p4199_p11 }
  0x25   :  { %p4202_p0 = pnand %p4201_p13, %p4195_p10 }
  0x27   :  { %4205 = shalt.err (!%p4202_p0)
}
  0x28   :  { %s4281_s26 = smov 128   ;;  %s4282_s27 = smov 8  }
  0x29   :  { %31 = dma.hbm_to_vmem [thread:$0]  %s4460_s0, 256, %s26_s25, [#allocation4], %s4281_s26, %s4281_s26, %s4282_s27  }
  0x2a   :  { %s4283_s30 = smov [#allocation8]   ;;  %s4284_s3 = smov [#allocation11]  }
  0x2b   :  { %s50_s10 = sshll.u32 %s4283_s30, 4  ;;  %s73_s11 = sshll.u32 %s4284_s3, 4  ;;  %s51_s10 = int_to_ptr.vmem [resolvable:$true] %s50_s10  ;;  %s74_s11 = int_to_ptr.vmem [resolvable:$true] %s73_s11 }
  0x2c   :  { %s4214_s12 = scalar_lea.vmem %s51_s10, 64  ;;  %p4219_p2 = scmp.lt.s32.totalorder %s51_s10, %s51_s10 }
  0x2d   :  { %p4215_p1 = scmp.ne.s32.totalorder %s51_s10, %s4214_s12  ;;  %p4220_p3 = scmp.lt.s32.totalorder %s4214_s12, %s4214_s12 }
  0x2f   :  { %p4221_p4 = por %p4220_p3, %p4219_p2 }
  0x31   :  { %p4222_p5 = pnand %p4221_p4, %p4215_p1 }
  0x33   :  { %4225 = shalt.err (!%p4222_p5)
}
  0x34   :  { %53 = dma.hbm_to_vmem [thread:$0]  %s4462_s2, 64, %s51_s10, [#allocation7]  }
  0x35   :  { %s4234_s15 = scalar_lea.vmem %s74_s11, 16384  ;;  %p4239_p7 = scmp.lt.s32.totalorder %s74_s11, %s74_s11 }
  0x36   :  { %p4235_p6 = scmp.ne.s32.totalorder %s74_s11, %s4234_s15  ;;  %p4240_p8 = scmp.lt.s32.totalorder %s4234_s15, %s4234_s15 }
  0x38   :  { %p4241_p9 = por %p4240_p8, %p4239_p7 }
  0x3a   :  { %p4242_p10 = pnand %p4241_p9, %p4235_p6 }
  0x3c   :  { %4245 = shalt.err (!%p4242_p10)
}
  0x3d   :  { %79 = dma.hbm_to_vmem [thread:$0]  %s4465_s5, 16384, %s74_s11, [#allocation10], %s4281_s26, %s4281_s26, %s4282_s27  }
  0x3e   :  { %4266 = dma.done.wait [#allocation4], 256  }
  0x3f   :  { %4267 = vsyncadd [#allocation4], 4294967040 }
  0x40   :  { %4268 = dma.done.wait [#allocation7], 5184  }
  0x41   :  { %4269 = vsyncadd [#allocation7], 4294962112 }
  0x42   :  { %4270 = dma.done.wait [#allocation10], 49152  }
  0x43   :  { %4271 = vsyncadd [#allocation10], 4294918144  ;;  %v3891_v1 = vld [vmem:[#allocation6 + $0xe4] ss:$16 sps:$4 sm:$0xff]   ;;  %v3893_v2 = vld [vmem:[#allocation6 + $0xec] ss:$16 sps:$4 sm:$0xff]  }
  0x44   :  { %379 = vmatprep.subr.bf16.mxu0 %v3891_v1  ;;  %v3895_v3 = vld [vmem:[#allocation6 + $0xe0] ss:$16 sps:$4 sm:$0xff]   ;;  %v3896_v4 = vld [vmem:[#allocation6 + $0xe8] ss:$16 sps:$4 sm:$0xff]   ;;  %422 = vmatprep.subr.bf16.mxu1 %v3893_v2  ;;  %v3897_v5 = vld [vmem:[#allocation6 + $0xc4] ss:$16 sps:$4 sm:$0xff]  }
  0x45   :  { %380 = vmatpush1.bf16.msra.mxu0 %v3895_v3  ;;  %423 = vmatpush1.bf16.msra.mxu1 %v3896_v4  ;;  %v3899_v6 = vld [vmem:[#allocation6 + $0xcc] ss:$16 sps:$4 sm:$0xff]   ;;  %v3901_v7 = vld [vmem:[#allocation6 + $0xc0] ss:$16 sps:$4 sm:$0xff]   ;;  %v3902_v8 = vld [vmem:[#allocation6 + $0xc8] ss:$16 sps:$4 sm:$0xff]  }
  0x46   :  { %381 = vmatprep.subr.bf16.mxu0 %v3897_v5  ;;  %424 = vmatprep.subr.bf16.mxu1 %v3899_v6  ;;  %v3903_v9 = vld [vmem:[#allocation6 + $0xa4] ss:$16 sps:$4 sm:$0xff]   ;;  %v3905_v10 = vld [vmem:[#allocation6 + $0xac] ss:$16 sps:$4 sm:$0xff]   ;;  %v3907_v11 = vld [vmem:[#allocation6 + $0xa0] ss:$16 sps:$4 sm:$0xff]  }
  0x47   :  { %v3908_v12 = vld [vmem:[#allocation6 + $0xa8] ss:$16 sps:$4 sm:$0xff]   ;;  %v3909_v13 = vld [vmem:[#allocation6 + $0x84] ss:$16 sps:$4 sm:$0xff]   ;;  %v3911_v14 = vld [vmem:[#allocation6 + $0x8c] ss:$16 sps:$4 sm:$0xff]  }
  0x48   :  { %v3913_v15 = vld [vmem:[#allocation6 + $0x80] ss:$16 sps:$4 sm:$0xff]   ;;  %v3914_v16 = vld [vmem:[#allocation6 + $0x88] ss:$16 sps:$4 sm:$0xff]   ;;  %v3915_v17 = vld [vmem:[#allocation6 + $0x64] ss:$16 sps:$4 sm:$0xff]  }
  0x49   :  { %382 = vmatpush1.bf16.msra.mxu0 %v3901_v7  ;;  %425 = vmatpush1.bf16.msra.mxu1 %v3902_v8  ;;  %v3917_v18 = vld [vmem:[#allocation6 + $0x6c] ss:$16 sps:$4 sm:$0xff]   ;;  %v3919_v19 = vld [vmem:[#allocation6 + $0x60] ss:$16 sps:$4 sm:$0xff]   ;;  %v3920_v20 = vld [vmem:[#allocation6 + $0x68] ss:$16 sps:$4 sm:$0xff]  }
  0x4a   :  { %383 = vmatprep.subr.bf16.mxu0 %v3903_v9  ;;  %426 = vmatprep.subr.bf16.mxu1 %v3905_v10  ;;  %v3921_v21 = vld [vmem:[#allocation6 + $0x44] ss:$16 sps:$4 sm:$0xff]   ;;  %v3923_v22 = vld [vmem:[#allocation6 + $0x4c] ss:$16 sps:$4 sm:$0xff]   ;;  %v3925_v23 = vld [vmem:[#allocation6 + $0x40] ss:$16 sps:$4 sm:$0xff]  }
  0x4b   :  { %v3926_v24 = vld [vmem:[#allocation6 + $0x48] ss:$16 sps:$4 sm:$0xff]   ;;  %v3927_v25 = vld [vmem:[#allocation6 + $0x24] ss:$16 sps:$4 sm:$0xff]   ;;  %v3929_v26 = vld [vmem:[#allocation6 + $0x2c] ss:$16 sps:$4 sm:$0xff]  }
  0x4c   :  { %v3931_v27 = vld [vmem:[#allocation6 + $0x20] ss:$16 sps:$4 sm:$0xff]   ;;  %v3932_v28 = vld [vmem:[#allocation6 + $0x28] ss:$16 sps:$4 sm:$0xff]   ;;  %v3933_v29 = vld [vmem:[#allocation6 + $0x4] ss:$16 sps:$4 sm:$0xff]  }
  0x4d   :  { %384 = vmatpush1.bf16.msra.mxu0 %v3907_v11  ;;  %427 = vmatpush1.bf16.msra.mxu1 %v3908_v12  ;;  %v3935_v30 = vld [vmem:[#allocation6 + $0xc] ss:$16 sps:$4 sm:$0xff]   ;;  %vm375_vm0 = vcmask 261120   ;;  %v3937_v32 = vld [vmem:[#allocation6] ss:$16 sps:$4 sm:$0xff]   ;;  %v533_v40 = vld [vmem:[#allocation9 + $0x1c0] sm:$0xff] }
  0x4e   :  { %385 = vmatprep.subr.bf16.mxu0 %v3909_v13  ;;  %428 = vmatprep.subr.bf16.mxu1 %v3911_v14  ;;  %v3953_v31 = vld [vmem:[#allocation3 + $0x4] ss:$8 sps:$4 sm:$0xff]   ;;  %v3938_v33 = vld [vmem:[#allocation6 + $0x8] ss:$16 sps:$4 sm:$0xff]   ;;  %v3943_v36 = vld [vmem:[#allocation6 + $0x120] ss:$16 sps:$4 sm:$0xff]  }
  0x4f   :  { %v3939_v34 = vld [vmem:[#allocation6 + $0x124] ss:$16 sps:$4 sm:$0xff]   ;;  %v3941_v35 = vld [vmem:[#allocation6 + $0x12c] ss:$16 sps:$4 sm:$0xff]   ;;  %3490 = vmatprep.mubr.msk.bf16.mxu0 %vm375_vm0, %v3953_v31  ;;  %3491 = vmatprep.mubr.msk.bf16.mxu1 %vm375_vm0, %v3953_v31  ;;  %v3944_v37 = vld [vmem:[#allocation6 + $0x128] ss:$16 sps:$4 sm:$0xff]  }
  0x50   :  { %v3945_v38 = vld [vmem:[#allocation6 + $0x104] ss:$16 sps:$4 sm:$0xff]   ;;  %v3947_v39 = vld [vmem:[#allocation6 + $0x10c] ss:$16 sps:$4 sm:$0xff]   ;;  %v3949_v44 = vld [vmem:[#allocation6 + $0x100] ss:$16 sps:$4 sm:$0xff]  }
  0x51   :  { %386 = vmatpush1.bf16.msra.mxu0 %v3913_v15  ;;  %429 = vmatpush1.bf16.msra.mxu1 %v3914_v16  ;;  %v537_v41 = vld [vmem:[#allocation9 + $0x1e0] sm:$0xff]  ;;  %v3951_v52 = vld [vmem:[#allocation3] ss:$8 sps:$4 sm:$0xff]   ;;  %vm3426_vm1 = vcmask 130112   ;;  %vm3429_vm2 = vcmask 122880  }
  0x52   :  { %387 = vmatprep.subr.bf16.mxu0 %v3915_v17  ;;  %430 = vmatprep.subr.bf16.mxu1 %v3917_v18  ;;  %v661_v42 = vld [vmem:[#allocation9 + $0x5c0] sm:$0xff]  ;;  %v3549_v46 = vcombine.high %v533_v40, %v537_v41  ;;  %v3548_v53 = vcombine.low %v533_v40, %v537_v41 }
  0x53   :  { %v665_v43 = vld [vmem:[#allocation9 + $0x5e0] sm:$0xff] }
  0x54   :  { %v3950_v45 = vld [vmem:[#allocation6 + $0x108] ss:$16 sps:$4 sm:$0xff]   ;;  %v3677_v47 = vcombine.high %v661_v42, %v665_v43  ;;  %v3676_v54 = vcombine.low %v661_v42, %v665_v43 }
  0x55   :  { %388 = vmatpush1.bf16.msra.mxu0 %v3919_v19  ;;  %431 = vmatpush1.bf16.msra.mxu1 %v3920_v20  ;;  %v525_v48 = vld [vmem:[#allocation9 + $0x180] sm:$0xff] }
  0x56   :  { %389 = vmatprep.subr.bf16.mxu0 %v3921_v21  ;;  %432 = vmatprep.subr.bf16.mxu1 %v3923_v22  ;;  %v529_v49 = vld [vmem:[#allocation9 + $0x1a0] sm:$0xff] }
  0x57   :  { %v653_v50 = vld [vmem:[#allocation9 + $0x580] sm:$0xff]  ;;  %v3541_v55 = vcombine.high %v525_v48, %v529_v49  ;;  %v3540_v61 = vcombine.low %v525_v48, %v529_v49 }
  0x58   :  { %v657_v51 = vld [vmem:[#allocation9 + $0x5a0] sm:$0xff] }
  0x59   :  { %390 = vmatpush1.bf16.msra.mxu0 %v3925_v23  ;;  %433 = vmatpush1.bf16.msra.mxu1 %v3926_v24  ;;  %v3669_v56 = vcombine.high %v653_v50, %v657_v51  ;;  %v517_v57 = vld [vmem:[#allocation9 + $0x140] sm:$0xff]  ;;  %v3668_v62 = vcombine.low %v653_v50, %v657_v51 }
  0x5a   :  { %391 = vmatprep.subr.bf16.mxu0 %v3927_v25  ;;  %434 = vmatprep.subr.bf16.mxu1 %v3929_v26  ;;  %v521_v58 = vld [vmem:[#allocation9 + $0x160] sm:$0xff] }
  0x5b   :  { %v645_v59 = vld [vmem:[#allocation9 + $0x540] sm:$0xff]  ;;  %v3533_v1 = vcombine.high %v517_v57, %v521_v58  ;;  %v3532_v5 = vcombine.low %v517_v57, %v521_v58 }
  0x5c   :  { %v649_v60 = vld [vmem:[#allocation9 + $0x560] sm:$0xff] }
  0x5d   :  { %392 = vmatpush1.bf16.msra.mxu0 %v3931_v27  ;;  %435 = vmatpush1.bf16.msra.mxu1 %v3932_v28  ;;  %v509_v63 = vld [vmem:[#allocation9 + $0x100] sm:$0xff]  ;;  %v3661_v2 = vcombine.high %v645_v59, %v649_v60  ;;  %v3660_v6 = vcombine.low %v645_v59, %v649_v60 }
  0x5e   :  { %393 = vmatprep.subr.bf16.mxu0 %v3933_v29  ;;  %436 = vmatprep.subr.bf16.mxu1 %v3935_v30  ;;  %v513_v0 = vld [vmem:[#allocation9 + $0x120] sm:$0xff] }
  0x5f   :  { %v637_v3 = vld [vmem:[#allocation9 + $0x500] sm:$0xff]  ;;  %v3525_v11 = vcombine.high %v509_v63, %v513_v0  ;;  %v3524_v13 = vcombine.low %v509_v63, %v513_v0 }
  0x60   :  { %v641_v4 = vld [vmem:[#allocation9 + $0x520] sm:$0xff] }
  0x61   :  { %394 = vmatpush1.bf16.msra.mxu0 %v3937_v32  ;;  %437 = vmatpush1.bf16.msra.mxu1 %v3938_v33  ;;  %v501_v7 = vld [vmem:[#allocation9 + $0xc0] sm:$0xff]  ;;  %v3653_v12 = vcombine.high %v637_v3, %v641_v4  ;;  %v3652_v14 = vcombine.low %v637_v3, %v641_v4 }
  0x62   :  { %407 = vmatprep.subr.bf16.mxu0 %v3939_v34  ;;  %450 = vmatprep.subr.bf16.mxu1 %v3941_v35  ;;  %v505_v8 = vld [vmem:[#allocation9 + $0xe0] sm:$0xff] }
  0x63   :  { %v629_v9 = vld [vmem:[#allocation9 + $0x4c0] sm:$0xff]  ;;  %v3517_v19 = vcombine.high %v501_v7, %v505_v8  ;;  %v3516_v21 = vcombine.low %v501_v7, %v505_v8 }
  0x64   :  { %v633_v10 = vld [vmem:[#allocation9 + $0x4e0] sm:$0xff] }
  0x65   :  { %408 = vmatpush2.bf16.msra.mxu0 %v3943_v36  ;;  %451 = vmatpush2.bf16.msra.mxu1 %v3944_v37  ;;  %v493_v15 = vld [vmem:[#allocation9 + $0x80] sm:$0xff]  ;;  %v3645_v20 = vcombine.high %v629_v9, %v633_v10  ;;  %v3644_v22 = vcombine.low %v629_v9, %v633_v10 }
  0x66   :  { %409 = vmatprep.subr.bf16.mxu0 %v3945_v38  ;;  %452 = vmatprep.subr.bf16.mxu1 %v3947_v39  ;;  %v497_v16 = vld [vmem:[#allocation9 + $0xa0] sm:$0xff] }
  0x67   :  { %v621_v17 = vld [vmem:[#allocation9 + $0x480] sm:$0xff]  ;;  %v3509_v27 = vcombine.high %v493_v15, %v497_v16  ;;  %v3508_v29 = vcombine.low %v493_v15, %v497_v16 }
  0x68   :  { %v625_v18 = vld [vmem:[#allocation9 + $0x4a0] sm:$0xff] }
  0x69   :  { %410 = vmatpush2.bf16.msra.mxu0 %v3949_v44  ;;  %453 = vmatpush2.bf16.msra.mxu1 %v3950_v45  ;;  %v485_v23 = vld [vmem:[#allocation9 + $0x40] sm:$0xff]  ;;  %v3637_v28 = vcombine.high %v621_v17, %v625_v18  ;;  %v3636_v30 = vcombine.low %v621_v17, %v625_v18 }
  0x6a   :  { %2055 = vmatprep.subr.bf16.mxu0 %v3549_v46  ;;  %2098 = vmatprep.subr.bf16.mxu1 %v3677_v47  ;;  %v489_v24 = vld [vmem:[#allocation9 + $0x60] sm:$0xff] }
  0x6b   :  { %v613_v25 = vld [vmem:[#allocation9 + $0x440] sm:$0xff]  ;;  %v3501_v35 = vcombine.high %v485_v23, %v489_v24  ;;  %v3500_v37 = vcombine.low %v485_v23, %v489_v24 }
  0x6c   :  { %412 = vmatmul.mubr.bf16.vlgmr.msra.gmra.mxu0 %v3951_v52  ;;  %455 = vmatmul.mubr.bf16.vlgmr.msra.gmra.mxu1 %v3951_v52  ;;  %v617_v26 = vld [vmem:[#allocation9 + $0x460] sm:$0xff] }
  0x6d   :  { %2056 = vmatpush1.bf16.msra.mxu0 %v3548_v53  ;;  %2099 = vmatpush1.bf16.msra.mxu1 %v3676_v54  ;;  %v477_v31 = vld [vmem:[#allocation9] sm:$0xff]  ;;  %v3629_v36 = vcombine.high %v613_v25, %v617_v26  ;;  %v3628_v38 = vcombine.low %v613_v25, %v617_v26 }
  0x6e   :  { %2057 = vmatprep.subr.bf16.mxu0 %v3541_v55  ;;  %2100 = vmatprep.subr.bf16.mxu1 %v3669_v56  ;;  %v481_v32 = vld [vmem:[#allocation9 + $0x20] sm:$0xff] }
  0x6f   :  { %v605_v33 = vld [vmem:[#allocation9 + $0x400] sm:$0xff]  ;;  %v3493_v43 = vcombine.high %v477_v31, %v481_v32  ;;  %v3492_v45 = vcombine.low %v477_v31, %v481_v32 }
  0x70   :  { %v609_v34 = vld [vmem:[#allocation9 + $0x420] sm:$0xff] }
  0x71   :  { %2058 = vmatpush1.bf16.msra.mxu0 %v3540_v61  ;;  %2101 = vmatpush1.bf16.msra.mxu1 %v3668_v62  ;;  %v597_v39 = vld [vmem:[#allocation9 + $0x3c0] sm:$0xff]  ;;  %v3621_v44 = vcombine.high %v605_v33, %v609_v34  ;;  %v3620_v46 = vcombine.low %v605_v33, %v609_v34 }
  0x72   :  { %2059 = vmatprep.subr.bf16.mxu0 %v3533_v1  ;;  %2102 = vmatprep.subr.bf16.mxu1 %v3661_v2  ;;  %v601_v40 = vld [vmem:[#allocation9 + $0x3e0] sm:$0xff] }
  0x73   :  { %v725_v41 = vld [vmem:[#allocation9 + $0x7c0] sm:$0xff]  ;;  %v3613_v51 = vcombine.high %v597_v39, %v601_v40  ;;  %v3612_v53 = vcombine.low %v597_v39, %v601_v40 }
  0x74   :  { %v729_v42 = vld [vmem:[#allocation9 + $0x7e0] sm:$0xff] }
  0x75   :  { %2060 = vmatpush1.bf16.msra.mxu0 %v3532_v5  ;;  %2103 = vmatpush1.bf16.msra.mxu1 %v3660_v6  ;;  %v589_v47 = vld [vmem:[#allocation9 + $0x380] sm:$0xff]  ;;  %v3741_v52 = vcombine.high %v725_v41, %v729_v42  ;;  %v3740_v54 = vcombine.low %v725_v41, %v729_v42 }
  0x76   :  { %2061 = vmatprep.subr.bf16.mxu0 %v3525_v11  ;;  %2104 = vmatprep.subr.bf16.mxu1 %v3653_v12  ;;  %v593_v48 = vld [vmem:[#allocation9 + $0x3a0] sm:$0xff] }
  0x77   :  { %v717_v49 = vld [vmem:[#allocation9 + $0x780] sm:$0xff]  ;;  %v3605_v59 = vcombine.high %v589_v47, %v593_v48  ;;  %v3604_v61 = vcombine.low %v589_v47, %v593_v48  ;;  %v666_v47 = vld [vmem:[#allocation9 + $0x5e8] sm:$0xff] }
  0x78   :  { %v721_v50 = vld [vmem:[#allocation9 + $0x7a0] sm:$0xff] }
  0x79   :  { %2062 = vmatpush1.bf16.msra.mxu0 %v3524_v13  ;;  %2105 = vmatpush1.bf16.msra.mxu1 %v3652_v14  ;;  %v581_v55 = vld [vmem:[#allocation9 + $0x340] sm:$0xff]  ;;  %v3733_v60 = vcombine.high %v717_v49, %v721_v50  ;;  %v3732_v62 = vcombine.low %v717_v49, %v721_v50 }
  0x7a   :  { %2063 = vmatprep.subr.bf16.mxu0 %v3517_v19  ;;  %2106 = vmatprep.subr.bf16.mxu1 %v3645_v20  ;;  %v585_v56 = vld [vmem:[#allocation9 + $0x360] sm:$0xff] }
  0x7b   :  { %v709_v57 = vld [vmem:[#allocation9 + $0x740] sm:$0xff]  ;;  %v3597_v3 = vcombine.high %v581_v55, %v585_v56  ;;  %v3596_v5 = vcombine.low %v581_v55, %v585_v56 }
  0x7c   :  { %v713_v58 = vld [vmem:[#allocation9 + $0x760] sm:$0xff] }
  0x7d   :  { %2064 = vmatpush1.bf16.msra.mxu0 %v3516_v21  ;;  %2107 = vmatpush1.bf16.msra.mxu1 %v3644_v22  ;;  %v573_v63 = vld [vmem:[#allocation9 + $0x300] sm:$0xff]  ;;  %v3725_v4 = vcombine.high %v709_v57, %v713_v58  ;;  %v3724_v6 = vcombine.low %v709_v57, %v713_v58  ;;  %v144_v57 = vld [vmem:[#allocation8] sm:$0xf] }
  0x7e   :  { %2065 = vmatprep.subr.bf16.mxu0 %v3509_v27  ;;  %2108 = vmatprep.subr.bf16.mxu1 %v3637_v28  ;;  %v577_v0 = vld [vmem:[#allocation9 + $0x320] sm:$0xff] }
  0x7f   :  { %v701_v1 = vld [vmem:[#allocation9 + $0x700] sm:$0xff]  ;;  %v3589_v11 = vcombine.high %v573_v63, %v577_v0  ;;  %v3588_v13 = vcombine.low %v573_v63, %v577_v0 }
  0x80   :  { %v705_v2 = vld [vmem:[#allocation9 + $0x720] sm:$0xff] }
  0x81   :  { %2066 = vmatpush1.bf16.msra.mxu0 %v3508_v29  ;;  %2109 = vmatpush1.bf16.msra.mxu1 %v3636_v30  ;;  %v565_v7 = vld [vmem:[#allocation9 + $0x2c0] sm:$0xff]  ;;  %v3717_v12 = vcombine.high %v701_v1, %v705_v2  ;;  %v3716_v14 = vcombine.low %v701_v1, %v705_v2 }
  0x82   :  { %2067 = vmatprep.subr.bf16.mxu0 %v3501_v35  ;;  %2110 = vmatprep.subr.bf16.mxu1 %v3629_v36  ;;  %v569_v8 = vld [vmem:[#allocation9 + $0x2e0] sm:$0xff] }
  0x83   :  { %v693_v9 = vld [vmem:[#allocation9 + $0x6c0] sm:$0xff]  ;;  %v3581_v15 = vcombine.high %v565_v7, %v569_v8  ;;  %v3580_v17 = vcombine.low %v565_v7, %v569_v8 }
  0x84   :  { %v697_v10 = vld [vmem:[#allocation9 + $0x6e0] sm:$0xff] }
  0x85   :  { %2068 = vmatpush1.bf16.msra.mxu0 %v3500_v37  ;;  %2111 = vmatpush1.bf16.msra.mxu1 %v3628_v38  ;;  %v3709_v16 = vcombine.high %v693_v9, %v697_v10  ;;  %v3708_v18 = vcombine.low %v693_v9, %v697_v10  ;;  %v557_v19 = vld [vmem:[#allocation9 + $0x280] sm:$0xff] }
  0x86   :  { %2069 = vmatprep.subr.bf16.mxu0 %v3493_v43  ;;  %2112 = vmatprep.subr.bf16.mxu1 %v3621_v44  ;;  %v561_v20 = vld [vmem:[#allocation9 + $0x2a0] sm:$0xff]  ;;  %v4355_v43 = vld [vmem:[#allocation9 + $0x1c8] sm:$0xff] }
  0x87   :  { %v685_v21 = vld [vmem:[#allocation9 + $0x680] sm:$0xff]  ;;  %v3573_v22 = vcombine.high %v557_v19, %v561_v20  ;;  %v3572_v24 = vcombine.low %v557_v19, %v561_v20  ;;  %v4357_v44 = vld [vmem:[#allocation9 + $0x1e8] sm:$0xff] }
  0x88   :  { %v689_v23 = vld [vmem:[#allocation9 + $0x6a0] sm:$0xff]  ;;  %v3550_v48 = vcombine.low %v4355_v43, %v4357_v44  ;;  %v526_v20 = vld [vmem:[#allocation9 + $0x188] sm:$0xff] }
  0x89   :  { %2070 = vmatpush1.bf16.msra.mxu0 %v3492_v45  ;;  %2113 = vmatpush1.bf16.msra.mxu1 %v3620_v46  ;;  %v3700_v25 = vcombine.low %v685_v21, %v689_v23  ;;  %v3701_v26 = vcombine.high %v685_v21, %v689_v23  ;;  %v549_v27 = vld [vmem:[#allocation9 + $0x240] sm:$0xff]  ;;  %v4359_v45 = vld [vmem:[#allocation9 + $0x5c8] sm:$0xff]  ;;  %v3551_v46 = vcombine.high %v4355_v43, %v4357_v44 }
  0x8a   :  { %2071 = vmatprep.subr.bf16.mxu0 %v3613_v51  ;;  %2114 = vmatprep.subr.bf16.mxu1 %v3741_v52  ;;  %v553_v28 = vld [vmem:[#allocation9 + $0x260] sm:$0xff]  ;;  %v3678_v49 = vcombine.low %v4359_v45, %v666_v47  ;;  %v3679_v50 = vcombine.high %v4359_v45, %v666_v47  ;;  %v146_v51 = vlaneseq  ;;  %v530_v23 = vld [vmem:[#allocation9 + $0x1a8] sm:$0xff] }
  0x8b   :  { %v677_v29 = vld [vmem:[#allocation9 + $0x640] sm:$0xff]  ;;  %v3565_v30 = vcombine.high %v549_v27, %v553_v28  ;;  %v3564_v32 = vcombine.low %v549_v27, %v553_v28  ;;  %v642_v43 = vld [vmem:[#allocation9 + $0x528] sm:$0xff] }
  0x8c   :  { %v681_v31 = vld [vmem:[#allocation9 + $0x660] sm:$0xff]  ;;  %v4368_v52 = vshrl.u32 %v146_v51, 7 }
  0x8d   :  { %2072 = vmatpush2.bf16.msra.mxu0 %v3612_v53  ;;  %2115 = vmatpush2.bf16.msra.mxu1 %v3740_v54  ;;  %v3692_v33 = vcombine.low %v677_v29, %v681_v31  ;;  %v3693_v34 = vcombine.high %v677_v29, %v681_v31  ;;  %v541_v35 = vld [vmem:[#allocation9 + $0x200] sm:$0xff]  ;;  %v3543_v31 = vcombine.high %v526_v20, %v530_v23 }
  0x8e   :  { %2073 = vmatprep.subr.bf16.mxu0 %v3605_v59  ;;  %2116 = vmatprep.subr.bf16.mxu1 %v3733_v60  ;;  %v545_v36 = vld [vmem:[#allocation9 + $0x220] sm:$0xff]  ;;  %v4371_v53 = vsub.s32 1, %v4368_v52  ;;  %v160_v54 = vsub.s32 3, %v4368_v52  ;;  %v4375_v55 = vsub.s32 0, %v4368_v52  ;;  %v156_v56 = vsub.s32 2, %v4368_v52 }
  0x8f   :  { %v669_v37 = vld [vmem:[#allocation9 + $0x600] sm:$0xff]  ;;  %v3557_v38 = vcombine.high %v541_v35, %v545_v36  ;;  %v3556_v40 = vcombine.low %v541_v35, %v545_v36  ;;  %v650_v35 = vld [vmem:[#allocation9 + $0x568] sm:$0xff]  ;;  %v3542_v36 = vcombine.low %v526_v20, %v530_v23 }
  0x90   :  { %v673_v39 = vld [vmem:[#allocation9 + $0x620] sm:$0xff]  ;;  %v153_v60 = vrot.slane %v144_v57, %v4371_v53  ;;  %v157_v63 = vrot.slane %v144_v57, %v156_v56  ;;  %v602_v23 = vld [vmem:[#allocation9 + $0x3e8] sm:$0xff] }
  0x91   :  { %2074 = vmatpush2.bf16.msra.mxu0 %v3604_v61  ;;  %2117 = vmatpush2.bf16.msra.mxu1 %v3732_v62  ;;  %v3684_v41 = vcombine.low %v669_v37, %v673_v39  ;;  %v3685_v42 = vcombine.high %v669_v37, %v673_v39  ;;  %v161_v61 = vrot.slane %v144_v57, %v160_v54 }
  0x92   :  { %2075 = vmatprep.subr.bf16.mxu0 %v3597_v3  ;;  %2118 = vmatprep.subr.bf16.mxu1 %v3725_v4  ;;  %v149_v62 = vrot.slane %v144_v57, %v4375_v55  ;;  %v634_v57 = vld [vmem:[#allocation9 + $0x4e8] sm:$0xff] }
  0x95   :  { %2076 = vmatpush2.bf16.msra.mxu0 %v3596_v5  ;;  %2119 = vmatpush2.bf16.msra.mxu1 %v3724_v6 }
  0x96   :  { %2077 = vmatprep.subr.bf16.mxu0 %v3589_v11  ;;  %2120 = vmatprep.subr.bf16.mxu1 %v3717_v12 }
  0x99   :  { %2078 = vmatpush2.bf16.msra.mxu0 %v3588_v13  ;;  %2121 = vmatpush2.bf16.msra.mxu1 %v3716_v14 }
  0x9a   :  { %2079 = vmatprep.subr.bf16.mxu0 %v3581_v15  ;;  %2122 = vmatprep.subr.bf16.mxu1 %v3709_v16 }
  0x9d   :  { %2080 = vmatpush2.bf16.msra.mxu0 %v3580_v17  ;;  %2123 = vmatpush2.bf16.msra.mxu1 %v3708_v18 }
  0x9e   :  { %2081 = vmatprep.subr.bf16.mxu0 %v3573_v22  ;;  %2124 = vmatprep.subr.bf16.mxu1 %v3701_v26 }
  0xa1   :  { %2082 = vmatpush2.bf16.msra.mxu0 %v3572_v24  ;;  %2125 = vmatpush2.bf16.msra.mxu1 %v3700_v25  ;;  %v654_v24 = vld [vmem:[#allocation9 + $0x588] sm:$0xff] }
  0xa2   :  { %2083 = vmatprep.subr.bf16.mxu0 %v3565_v30  ;;  %2126 = vmatprep.subr.bf16.mxu1 %v3693_v34  ;;  %v658_v25 = vld [vmem:[#allocation9 + $0x5a8] sm:$0xff] }
  0xa3   :  { %v518_v30 = vld [vmem:[#allocation9 + $0x148] sm:$0xff]  ;;  %v3670_v37 = vcombine.low %v654_v24, %v658_v25 }
  0xa4   :  { %v646_v34 = vld [vmem:[#allocation9 + $0x548] sm:$0xff] }
  0xa5   :  { %2084 = vmatpush2.bf16.msra.mxu0 %v3564_v32  ;;  %2127 = vmatpush2.bf16.msra.mxu1 %v3692_v33  ;;  %v3671_v32 = vcombine.high %v654_v24, %v658_v25  ;;  %v522_v33 = vld [vmem:[#allocation9 + $0x168] sm:$0xff]  ;;  %v3663_v39 = vcombine.high %v646_v34, %v650_v35  ;;  %v3662_v45 = vcombine.low %v646_v34, %v650_v35 }
  0xa6   :  { %2085 = vmatprep.subr.bf16.mxu0 %v3557_v38  ;;  %2128 = vmatprep.subr.bf16.mxu1 %v3685_v42  ;;  %v3535_v38 = vcombine.high %v518_v30, %v522_v33  ;;  %v638_v42 = vld [vmem:[#allocation9 + $0x508] sm:$0xff]  ;;  %v3534_v44 = vcombine.low %v518_v30, %v522_v33 }
  0xa7   :  { %v3655_v47 = vcombine.high %v638_v42, %v642_v43  ;;  %v726_v24 = vld [vmem:[#allocation9 + $0x7c8] sm:$0xff] }
  0xa8   :  { %v730_v25 = vld [vmem:[#allocation9 + $0x7e8] sm:$0xff] }
  0xa9   :  { %2086 = vmatpush2.bf16.msra.mxu0 %v3556_v40  ;;  %2129 = vmatpush2.bf16.msra.mxu1 %v3684_v41  ;;  %v510_v40 = vld [vmem:[#allocation9 + $0x108] sm:$0xff]  ;;  %v3743_v33 = vcombine.high %v726_v24, %v730_v25 }
  0xaa   :  { %2141 = vmatprep.subr.bf16.mxu0 %v3551_v46  ;;  %2184 = vmatprep.subr.bf16.mxu1 %v3679_v50  ;;  %v514_v41 = vld [vmem:[#allocation9 + $0x128] sm:$0xff] }
  0xab   :  { %v3527_v46 = vcombine.high %v510_v40, %v514_v41  ;;  %v630_v50 = vld [vmem:[#allocation9 + $0x4c8] sm:$0xff] }
  0xac   :  { %v590_v34 = vld [vmem:[#allocation9 + $0x388] sm:$0xff] }
  0xad   :  { %v594_v35 = vld [vmem:[#allocation9 + $0x3a8] sm:$0xff] }
 0x12c   :  { %v413_v58 = vpop.f32.mrf.mxu0  ;;  %v456_v59 = vpop.f32.mrf.mxu1 }
 0x12d   :  { %v414_v8 = vadd.f32 %v413_v58, %v149_v62  ;;  %v457_v9 = vadd.f32 %v456_v59, %v157_v63  ;;  %v3526_v58 = vcombine.low %v510_v40, %v514_v41  ;;  %v3654_v59 = vcombine.low %v638_v42, %v642_v43  ;;  %v582_v42 = vld [vmem:[#allocation9 + $0x348] sm:$0xff] }
 0x12e   :  { %v415_v0 = vpop.f32.mrf.mxu0  ;;  %v458_v1 = vpop.f32.mrf.mxu1  ;;  %v3607_v40 = vcombine.high %v590_v34, %v594_v35  ;;  %v586_v43 = vld [vmem:[#allocation9 + $0x368] sm:$0xff] }
 0x12f   :  { %v416_v4 = vadd.f32 %v415_v0, %v153_v60  ;;  %v459_v5 = vadd.f32 %v458_v1, %v161_v61  ;;  %v465_v21 = vmax.f32 %v414_v8, 0.0  ;;  %v467_v22 = vmax.f32 %v457_v9, 0.0  ;;  %v622_v0 = vld [vmem:[#allocation9 + $0x488] sm:$0xff] }
 0x130   :  { %v417_v2 = vpop.f32.mrf.mxu0  ;;  %v460_v3 = vpop.f32.mrf.mxu1  ;;  %v626_v1 = vld [vmem:[#allocation9 + $0x4a8] sm:$0xff] }
 0x131   :  { %v418_v6 = vadd.f32 %v417_v2, %v149_v62  ;;  %v461_v7 = vadd.f32 %v460_v3, %v157_v63  ;;  %v466_v16 = vmax.f32 %v416_v4, 0.0  ;;  %v468_v17 = vmax.f32 %v459_v5, 0.0  ;;  %v494_v62 = vld [vmem:[#allocation9 + $0x88] sm:$0xff] }
 0x132   :  { %v419_v10 = vpop.f32.mrf.mxu0  ;;  %v462_v11 = vpop.f32.mrf.mxu1  ;;  %v498_v63 = vld [vmem:[#allocation9 + $0xa8] sm:$0xff]  ;;  %v3646_v3 = vcombine.low %v630_v50, %v634_v57  ;;  %v3639_v5 = vcombine.high %v622_v0, %v626_v1 }
 0x133   :  { %v420_v12 = vadd.f32 %v419_v10, %v153_v60  ;;  %v463_v13 = vadd.f32 %v462_v11, %v161_v61  ;;  %v469_v14 = vmax.f32 %v418_v6, 0.0  ;;  %v471_v15 = vmax.f32 %v461_v7, 0.0  ;;  %v486_v6 = vld [vmem:[#allocation9 + $0x48] sm:$0xff] }
 0x134   :  { %v3647_v61 = vcombine.high %v630_v50, %v634_v57  ;;  %v3511_v4 = vcombine.high %v494_v62, %v498_v63  ;;  %v490_v7 = vld [vmem:[#allocation9 + $0x68] sm:$0xff]  ;;  %v3510_v10 = vcombine.low %v494_v62, %v498_v63  ;;  %v3638_v11 = vcombine.low %v622_v0, %v626_v1 }
 0x135   :  { %v470_v18 = vmax.f32 %v420_v12, 0.0  ;;  %v472_v19 = vmax.f32 %v463_v13, 0.0  ;;  %v4388_v28 = vpack.c.bf16 %v469_v14, %v465_v21  ;;  %v4390_v29 = vpack.c.bf16 %v471_v15, %v467_v22  ;;  %v614_v8 = vld [vmem:[#allocation9 + $0x448] sm:$0xff] }
 0x136   :  { %v618_v9 = vld [vmem:[#allocation9 + $0x468] sm:$0xff]  ;;  %v3503_v12 = vcombine.high %v486_v6, %v490_v7 }
 0x137   :  { %v4384_v26 = vpack.c.bf16 %v470_v18, %v466_v16  ;;  %v4386_v27 = vpack.c.bf16 %v472_v19, %v468_v17  ;;  %v3631_v13 = vcombine.high %v614_v8, %v618_v9  ;;  %v478_v14 = vld [vmem:[#allocation9 + $0x8] sm:$0xff]  ;;  %v3502_v18 = vcombine.low %v486_v6, %v490_v7 }
 0x138   :  { %v482_v15 = vld [vmem:[#allocation9 + $0x28] sm:$0xff]  ;;  %v3630_v19 = vcombine.low %v614_v8, %v618_v9 }
 0x139   :  { %2087 = vmatprep.mubr.bf16.mxu0 %v4384_v26  ;;  %2130 = vmatprep.mubr.bf16.mxu1 %v4386_v27  ;;  %v606_v16 = vld [vmem:[#allocation9 + $0x408] sm:$0xff]  ;;  %v3495_v20 = vcombine.high %v478_v14, %v482_v15  ;;  %v3494_v30 = vcombine.low %v478_v14, %v482_v15 }
 0x13a   :  { %2088 = vmatmul.mubr.bf16.vlgmr.msra.gmra.mxu0 %v4388_v28  ;;  %2131 = vmatmul.mubr.bf16.vlgmr.msra.gmra.mxu1 %v4390_v29  ;;  %v610_v17 = vld [vmem:[#allocation9 + $0x428] sm:$0xff] }
 0x13b   :  { %2142 = vmatpush1.bf16.msra.mxu0 %v3550_v48  ;;  %2185 = vmatpush1.bf16.msra.mxu1 %v3678_v49  ;;  %v502_v48 = vld [vmem:[#allocation9 + $0xc8] sm:$0xff]  ;;  %v3623_v21 = vcombine.high %v606_v16, %v610_v17 }
 0x13c   :  { %2173 = vmatprep.mubr.bf16.mxu0 %v4384_v26  ;;  %2216 = vmatprep.mubr.bf16.mxu1 %v4386_v27  ;;  %v506_v49 = vld [vmem:[#allocation9 + $0xe8] sm:$0xff] }
 0x13d   :  { %2143 = vmatprep.subr.bf16.mxu0 %v3543_v31  ;;  %2186 = vmatprep.subr.bf16.mxu1 %v3671_v32  ;;  %v3519_v60 = vcombine.high %v502_v48, %v506_v49  ;;  %v3518_v2 = vcombine.low %v502_v48, %v506_v49  ;;  %v598_v22 = vld [vmem:[#allocation9 + $0x3c8] sm:$0xff]  ;;  %v3622_v31 = vcombine.low %v606_v16, %v610_v17 }
 0x13e   :  { %v3615_v32 = vcombine.high %v598_v22, %v602_v23  ;;  %v3599_v48 = vcombine.high %v582_v42, %v586_v43  ;;  %v574_v50 = vld [vmem:[#allocation9 + $0x308] sm:$0xff] }
 0x13f   :  { %2144 = vmatpush1.bf16.msra.mxu0 %v3542_v36  ;;  %2187 = vmatpush1.bf16.msra.mxu1 %v3670_v37  ;;  %v718_v36 = vld [vmem:[#allocation9 + $0x788] sm:$0xff] }
 0x140   :  { %2145 = vmatprep.subr.bf16.mxu0 %v3535_v38  ;;  %2188 = vmatprep.subr.bf16.mxu1 %v3663_v39  ;;  %v722_v37 = vld [vmem:[#allocation9 + $0x7a8] sm:$0xff]  ;;  %v3614_v38 = vcombine.low %v598_v22, %v602_v23  ;;  %v3742_v39 = vcombine.low %v726_v24, %v730_v25 }
 0x141   :  { %v3735_v41 = vcombine.high %v718_v36, %v722_v37  ;;  %v578_v57 = vld [vmem:[#allocation9 + $0x328] sm:$0xff] }
 0x142   :  { %v3591_v62 = vcombine.high %v574_v50, %v578_v57  ;;  %v566_v0 = vld [vmem:[#allocation9 + $0x2c8] sm:$0xff] }
 0x143   :  { %2146 = vmatpush1.bf16.msra.mxu0 %v3534_v44  ;;  %2189 = vmatpush1.bf16.msra.mxu1 %v3662_v45  ;;  %v710_v44 = vld [vmem:[#allocation9 + $0x748] sm:$0xff] }
 0x144   :  { %2147 = vmatprep.subr.bf16.mxu0 %v3527_v46  ;;  %2190 = vmatprep.subr.bf16.mxu1 %v3655_v47  ;;  %v714_v45 = vld [vmem:[#allocation9 + $0x768] sm:$0xff]  ;;  %v3606_v46 = vcombine.low %v590_v34, %v594_v35  ;;  %v3734_v47 = vcombine.low %v718_v36, %v722_v37  ;;  %v535_v36 = vld [vmem:[#allocation9 + $0x1d0] sm:$0xff] }
 0x145   :  { %v3727_v49 = vcombine.high %v710_v44, %v714_v45  ;;  %v570_v1 = vld [vmem:[#allocation9 + $0x2e8] sm:$0xff]  ;;  %v539_v37 = vld [vmem:[#allocation9 + $0x1f0] sm:$0xff] }
 0x146   :  { %v3583_v6 = vcombine.high %v566_v0, %v570_v1  ;;  %v558_v8 = vld [vmem:[#allocation9 + $0x288] sm:$0xff] }
 0x147   :  { %2148 = vmatpush1.bf16.msra.mxu0 %v3526_v58  ;;  %2191 = vmatpush1.bf16.msra.mxu1 %v3654_v59  ;;  %v702_v58 = vld [vmem:[#allocation9 + $0x708] sm:$0xff] }
 0x148   :  { %2149 = vmatprep.subr.bf16.mxu0 %v3519_v60  ;;  %2192 = vmatprep.subr.bf16.mxu1 %v3647_v61  ;;  %v706_v59 = vld [vmem:[#allocation9 + $0x728] sm:$0xff]  ;;  %v3598_v60 = vcombine.low %v582_v42, %v586_v43  ;;  %v3726_v61 = vcombine.low %v710_v44, %v714_v45  ;;  %v3553_v42 = vcombine.high %v535_v36, %v539_v37  ;;  %v527_v44 = vld [vmem:[#allocation9 + $0x190] sm:$0xff] }
 0x149   :  { %v3719_v63 = vcombine.high %v702_v58, %v706_v59  ;;  %v562_v9 = vld [vmem:[#allocation9 + $0x2a8] sm:$0xff]  ;;  %v531_v45 = vld [vmem:[#allocation9 + $0x1b0] sm:$0xff] }
 0x14a   :  { %v3575_v14 = vcombine.high %v558_v8, %v562_v9  ;;  %v550_v16 = vld [vmem:[#allocation9 + $0x248] sm:$0xff] }
 0x14b   :  { %2150 = vmatpush1.bf16.msra.mxu0 %v3518_v2  ;;  %2193 = vmatpush1.bf16.msra.mxu1 %v3646_v3  ;;  %v694_v2 = vld [vmem:[#allocation9 + $0x6c8] sm:$0xff] }
 0x14c   :  { %2151 = vmatprep.subr.bf16.mxu0 %v3511_v4  ;;  %2194 = vmatprep.subr.bf16.mxu1 %v3639_v5  ;;  %v698_v3 = vld [vmem:[#allocation9 + $0x6e8] sm:$0xff]  ;;  %v3590_v4 = vcombine.low %v574_v50, %v578_v57  ;;  %v3718_v5 = vcombine.low %v702_v58, %v706_v59  ;;  %v3545_v50 = vcombine.high %v527_v44, %v531_v45  ;;  %v519_v58 = vld [vmem:[#allocation9 + $0x150] sm:$0xff] }
 0x14d   :  { %v3711_v7 = vcombine.high %v694_v2, %v698_v3  ;;  %v554_v17 = vld [vmem:[#allocation9 + $0x268] sm:$0xff]  ;;  %v523_v59 = vld [vmem:[#allocation9 + $0x170] sm:$0xff] }
 0x14e   :  { %v3567_v22 = vcombine.high %v550_v16, %v554_v17  ;;  %v542_v24 = vld [vmem:[#allocation9 + $0x208] sm:$0xff] }
 0x14f   :  { %2152 = vmatpush1.bf16.msra.mxu0 %v3510_v10  ;;  %2195 = vmatpush1.bf16.msra.mxu1 %v3638_v11  ;;  %v686_v10 = vld [vmem:[#allocation9 + $0x688] sm:$0xff] }
 0x150   :  { %2153 = vmatprep.subr.bf16.mxu0 %v3503_v12  ;;  %2196 = vmatprep.subr.bf16.mxu1 %v3631_v13  ;;  %v690_v11 = vld [vmem:[#allocation9 + $0x6a8] sm:$0xff]  ;;  %v3582_v12 = vcombine.low %v566_v0, %v570_v1  ;;  %v3710_v13 = vcombine.low %v694_v2, %v698_v3  ;;  %v3537_v0 = vcombine.high %v519_v58, %v523_v59  ;;  %v511_v2 = vld [vmem:[#allocation9 + $0x110] sm:$0xff] }
 0x151   :  { %v3703_v15 = vcombine.high %v686_v10, %v690_v11  ;;  %v546_v25 = vld [vmem:[#allocation9 + $0x228] sm:$0xff]  ;;  %v515_v3 = vld [vmem:[#allocation9 + $0x130] sm:$0xff] }
 0x152   :  { %v3559_v34 = vcombine.high %v542_v24, %v546_v25 }
 0x153   :  { %2154 = vmatpush1.bf16.msra.mxu0 %v3502_v18  ;;  %2197 = vmatpush1.bf16.msra.mxu1 %v3630_v19  ;;  %v678_v18 = vld [vmem:[#allocation9 + $0x648] sm:$0xff] }
 0x154   :  { %2155 = vmatprep.subr.bf16.mxu0 %v3495_v20  ;;  %2198 = vmatprep.subr.bf16.mxu1 %v3623_v21  ;;  %v682_v19 = vld [vmem:[#allocation9 + $0x668] sm:$0xff]  ;;  %v3574_v20 = vcombine.low %v558_v8, %v562_v9  ;;  %v3702_v21 = vcombine.low %v686_v10, %v690_v11  ;;  %v3529_v8 = vcombine.high %v511_v2, %v515_v3  ;;  %v503_v10 = vld [vmem:[#allocation9 + $0xd0] sm:$0xff] }
 0x155   :  { %v3695_v23 = vcombine.high %v678_v18, %v682_v19  ;;  %v507_v11 = vld [vmem:[#allocation9 + $0xf0] sm:$0xff] }
 0x157   :  { %2156 = vmatpush1.bf16.msra.mxu0 %v3494_v30  ;;  %2199 = vmatpush1.bf16.msra.mxu1 %v3622_v31  ;;  %v670_v30 = vld [vmem:[#allocation9 + $0x608] sm:$0xff] }
 0x158   :  { %2157 = vmatprep.subr.bf16.mxu0 %v3615_v32  ;;  %2200 = vmatprep.subr.bf16.mxu1 %v3743_v33  ;;  %v674_v31 = vld [vmem:[#allocation9 + $0x628] sm:$0xff]  ;;  %v3566_v32 = vcombine.low %v550_v16, %v554_v17  ;;  %v3694_v33 = vcombine.low %v678_v18, %v682_v19  ;;  %v3521_v16 = vcombine.high %v503_v10, %v507_v11  ;;  %v495_v18 = vld [vmem:[#allocation9 + $0x90] sm:$0xff] }
 0x159   :  { %v3687_v35 = vcombine.high %v670_v30, %v674_v31  ;;  %v499_v19 = vld [vmem:[#allocation9 + $0xb0] sm:$0xff] }
 0x15b   :  { %2158 = vmatpush2.bf16.msra.mxu0 %v3614_v38  ;;  %2201 = vmatpush2.bf16.msra.mxu1 %v3742_v39  ;;  %v663_v38 = vld [vmem:[#allocation9 + $0x5d0] sm:$0xff] }
 0x15c   :  { %2159 = vmatprep.subr.bf16.mxu0 %v3607_v40  ;;  %2202 = vmatprep.subr.bf16.mxu1 %v3735_v41  ;;  %v667_v39 = vld [vmem:[#allocation9 + $0x5f0] sm:$0xff]  ;;  %v3558_v40 = vcombine.low %v542_v24, %v546_v25  ;;  %v3686_v41 = vcombine.low %v670_v30, %v674_v31  ;;  %v3513_v24 = vcombine.high %v495_v18, %v499_v19 }
 0x15d   :  { %v3681_v43 = vcombine.high %v663_v38, %v667_v39  ;;  %v487_v30 = vld [vmem:[#allocation9 + $0x50] sm:$0xff] }
 0x15e   :  { %v491_v31 = vld [vmem:[#allocation9 + $0x70] sm:$0xff] }
 0x15f   :  { %2160 = vmatpush2.bf16.msra.mxu0 %v3606_v46  ;;  %2203 = vmatpush2.bf16.msra.mxu1 %v3734_v47  ;;  %v655_v46 = vld [vmem:[#allocation9 + $0x590] sm:$0xff] }
 0x160   :  { %2161 = vmatprep.subr.bf16.mxu0 %v3599_v48  ;;  %2204 = vmatprep.subr.bf16.mxu1 %v3727_v49  ;;  %v659_v47 = vld [vmem:[#allocation9 + $0x5b0] sm:$0xff]  ;;  %v3552_v48 = vcombine.low %v535_v36, %v539_v37  ;;  %v3680_v49 = vcombine.low %v663_v38, %v667_v39  ;;  %v3505_v36 = vcombine.high %v487_v30, %v491_v31 }
 0x161   :  { %v3673_v57 = vcombine.high %v655_v46, %v659_v47  ;;  %v479_v38 = vld [vmem:[#allocation9 + $0x10] sm:$0xff] }
 0x162   :  { %v483_v39 = vld [vmem:[#allocation9 + $0x30] sm:$0xff] }
 0x163   :  { %2162 = vmatpush2.bf16.msra.mxu0 %v3598_v60  ;;  %2205 = vmatpush2.bf16.msra.mxu1 %v3726_v61  ;;  %v647_v60 = vld [vmem:[#allocation9 + $0x550] sm:$0xff] }
 0x164   :  { %2163 = vmatprep.subr.bf16.mxu0 %v3591_v62  ;;  %2206 = vmatprep.subr.bf16.mxu1 %v3719_v63  ;;  %v651_v61 = vld [vmem:[#allocation9 + $0x570] sm:$0xff]  ;;  %v3544_v62 = vcombine.low %v527_v44, %v531_v45  ;;  %v3672_v63 = vcombine.low %v655_v46, %v659_v47  ;;  %v3497_v44 = vcombine.high %v479_v38, %v483_v39 }
 0x165   :  { %v3665_v1 = vcombine.high %v647_v60, %v651_v61  ;;  %v599_v46 = vld [vmem:[#allocation9 + $0x3d0] sm:$0xff] }
 0x166   :  { %v603_v47 = vld [vmem:[#allocation9 + $0x3f0] sm:$0xff] }
 0x167   :  { %2164 = vmatpush2.bf16.msra.mxu0 %v3590_v4  ;;  %2207 = vmatpush2.bf16.msra.mxu1 %v3718_v5  ;;  %v639_v4 = vld [vmem:[#allocation9 + $0x510] sm:$0xff] }
 0x168   :  { %2165 = vmatprep.subr.bf16.mxu0 %v3583_v6  ;;  %2208 = vmatprep.subr.bf16.mxu1 %v3711_v7  ;;  %v643_v5 = vld [vmem:[#allocation9 + $0x530] sm:$0xff]  ;;  %v3536_v6 = vcombine.low %v519_v58, %v523_v59  ;;  %v3664_v7 = vcombine.low %v647_v60, %v651_v61  ;;  %v3617_v58 = vcombine.high %v599_v46, %v603_v47 }
 0x169   :  { %v3657_v9 = vcombine.high %v639_v4, %v643_v5  ;;  %v591_v60 = vld [vmem:[#allocation9 + $0x390] sm:$0xff] }
 0x16a   :  { %v595_v61 = vld [vmem:[#allocation9 + $0x3b0] sm:$0xff] }
 0x16b   :  { %2166 = vmatpush2.bf16.msra.mxu0 %v3582_v12  ;;  %2209 = vmatpush2.bf16.msra.mxu1 %v3710_v13  ;;  %v631_v12 = vld [vmem:[#allocation9 + $0x4d0] sm:$0xff] }
 0x16c   :  { %2167 = vmatprep.subr.bf16.mxu0 %v3575_v14  ;;  %2210 = vmatprep.subr.bf16.mxu1 %v3703_v15  ;;  %v635_v13 = vld [vmem:[#allocation9 + $0x4f0] sm:$0xff]  ;;  %v3528_v14 = vcombine.low %v511_v2, %v515_v3  ;;  %v3656_v15 = vcombine.low %v639_v4, %v643_v5  ;;  %v3609_v2 = vcombine.high %v591_v60, %v595_v61 }
 0x16d   :  { %v3649_v17 = vcombine.high %v631_v12, %v635_v13  ;;  %v583_v4 = vld [vmem:[#allocation9 + $0x350] sm:$0xff] }
 0x16e   :  { %v587_v5 = vld [vmem:[#allocation9 + $0x370] sm:$0xff] }
 0x16f   :  { %2168 = vmatpush2.bf16.msra.mxu0 %v3574_v20  ;;  %2211 = vmatpush2.bf16.msra.mxu1 %v3702_v21  ;;  %v623_v20 = vld [vmem:[#allocation9 + $0x490] sm:$0xff] }
 0x170   :  { %2169 = vmatprep.subr.bf16.mxu0 %v3567_v22  ;;  %2212 = vmatprep.subr.bf16.mxu1 %v3695_v23  ;;  %v627_v21 = vld [vmem:[#allocation9 + $0x4b0] sm:$0xff]  ;;  %v3520_v22 = vcombine.low %v503_v10, %v507_v11  ;;  %v3648_v23 = vcombine.low %v631_v12, %v635_v13  ;;  %v3601_v10 = vcombine.high %v583_v4, %v587_v5 }
 0x171   :  { %v3641_v25 = vcombine.high %v623_v20, %v627_v21  ;;  %v575_v12 = vld [vmem:[#allocation9 + $0x310] sm:$0xff] }
 0x172   :  { %v579_v13 = vld [vmem:[#allocation9 + $0x330] sm:$0xff] }
 0x173   :  { %2170 = vmatpush2.bf16.msra.mxu0 %v3566_v32  ;;  %2213 = vmatpush2.bf16.msra.mxu1 %v3694_v33  ;;  %v615_v32 = vld [vmem:[#allocation9 + $0x450] sm:$0xff] }
 0x174   :  { %2171 = vmatprep.subr.bf16.mxu0 %v3559_v34  ;;  %2214 = vmatprep.subr.bf16.mxu1 %v3687_v35  ;;  %v619_v33 = vld [vmem:[#allocation9 + $0x470] sm:$0xff]  ;;  %v3512_v34 = vcombine.low %v495_v18, %v499_v19  ;;  %v3640_v35 = vcombine.low %v623_v20, %v627_v21  ;;  %v3593_v18 = vcombine.high %v575_v12, %v579_v13 }
 0x175   :  { %v3633_v37 = vcombine.high %v615_v32, %v619_v33  ;;  %v567_v20 = vld [vmem:[#allocation9 + $0x2d0] sm:$0xff] }
 0x176   :  { %v571_v21 = vld [vmem:[#allocation9 + $0x2f0] sm:$0xff] }
 0x177   :  { %2172 = vmatpush2.bf16.msra.mxu0 %v3558_v40  ;;  %2215 = vmatpush2.bf16.msra.mxu1 %v3686_v41  ;;  %v607_v40 = vld [vmem:[#allocation9 + $0x410] sm:$0xff] }
 0x178   :  { %2227 = vmatprep.subr.bf16.mxu0 %v3553_v42  ;;  %2270 = vmatprep.subr.bf16.mxu1 %v3681_v43  ;;  %v611_v41 = vld [vmem:[#allocation9 + $0x430] sm:$0xff]  ;;  %v3504_v42 = vcombine.low %v487_v30, %v491_v31  ;;  %v3632_v43 = vcombine.low %v615_v32, %v619_v33  ;;  %v3585_v30 = vcombine.high %v567_v20, %v571_v21 }
 0x179   :  { %v3625_v45 = vcombine.high %v607_v40, %v611_v41  ;;  %v559_v32 = vld [vmem:[#allocation9 + $0x290] sm:$0xff] }
 0x17a   :  { %2174 = vmatmul.mubr.bf16.vlgmr.msra.gmra.mxu0 %v4388_v28  ;;  %2217 = vmatmul.mubr.bf16.vlgmr.msra.gmra.mxu1 %v4390_v29  ;;  %v563_v33 = vld [vmem:[#allocation9 + $0x2b0] sm:$0xff] }
 0x17b   :  { %2228 = vmatpush1.bf16.msra.mxu0 %v3552_v48  ;;  %2259 = vmatprep.mubr.bf16.mxu0 %v4384_v26  ;;  %v727_v48 = vld [vmem:[#allocation9 + $0x7d0] sm:$0xff] }
 0x17c   :  { %2271 = vmatpush1.bf16.msra.mxu1 %v3680_v49  ;;  %2302 = vmatprep.mubr.bf16.mxu1 %v4386_v27  ;;  %v731_v49 = vld [vmem:[#allocation9 + $0x7f0] sm:$0xff] }
 0x17d   :  { %2229 = vmatprep.subr.bf16.mxu0 %v3545_v50  ;;  %2272 = vmatprep.subr.bf16.mxu1 %v3673_v57  ;;  %v3496_v50 = vcombine.low %v479_v38, %v483_v39  ;;  %v3624_v57 = vcombine.low %v607_v40, %v611_v41  ;;  %v3745_v59 = vcombine.high %v727_v48, %v731_v49  ;;  %v551_v40 = vld [vmem:[#allocation9 + $0x250] sm:$0xff] }
 0x17e   :  { %v3577_v38 = vcombine.high %v559_v32, %v563_v33  ;;  %v555_v41 = vld [vmem:[#allocation9 + $0x270] sm:$0xff] }
 0x17f   :  { %2230 = vmatpush1.bf16.msra.mxu0 %v3544_v62  ;;  %v719_v62 = vld [vmem:[#allocation9 + $0x790] sm:$0xff] }
 0x180   :  { %2273 = vmatpush1.bf16.msra.mxu1 %v3672_v63  ;;  %2231 = vmatprep.subr.bf16.mxu0 %v3537_v0  ;;  %v723_v63 = vld [vmem:[#allocation9 + $0x7b0] sm:$0xff]  ;;  %v3616_v0 = vcombine.low %v599_v46, %v603_v47  ;;  %v3569_v46 = vcombine.high %v551_v40, %v555_v41 }
 0x181   :  { %2274 = vmatprep.subr.bf16.mxu1 %v3665_v1  ;;  %v3744_v1 = vcombine.low %v727_v48, %v731_v49  ;;  %v3737_v3 = vcombine.high %v719_v62, %v723_v63  ;;  %v543_v48 = vld [vmem:[#allocation9 + $0x210] sm:$0xff] }
 0x182   :  { %v547_v49 = vld [vmem:[#allocation9 + $0x230] sm:$0xff] }
 0x183   :  { %2232 = vmatpush1.bf16.msra.mxu0 %v3536_v6  ;;  %v711_v6 = vld [vmem:[#allocation9 + $0x750] sm:$0xff] }
 0x184   :  { %2275 = vmatpush1.bf16.msra.mxu1 %v3664_v7  ;;  %2233 = vmatprep.subr.bf16.mxu0 %v3529_v8  ;;  %v715_v7 = vld [vmem:[#allocation9 + $0x770] sm:$0xff]  ;;  %v3608_v8 = vcombine.low %v591_v60, %v595_v61  ;;  %v3561_v60 = vcombine.high %v543_v48, %v547_v49 }
 0x185   :  { %2276 = vmatprep.subr.bf16.mxu1 %v3657_v9  ;;  %v3736_v9 = vcombine.low %v719_v62, %v723_v63  ;;  %v3729_v11 = vcombine.high %v711_v6, %v715_v7  ;;  %v536_v62 = vld [vmem:[#allocation9 + $0x1d8] sm:$0xff] }
 0x186   :  { %v540_v63 = vld [vmem:[#allocation9 + $0x1f8] sm:$0xff] }
 0x187   :  { %2234 = vmatpush1.bf16.msra.mxu0 %v3528_v14  ;;  %v703_v14 = vld [vmem:[#allocation9 + $0x710] sm:$0xff] }
 0x188   :  { %2277 = vmatpush1.bf16.msra.mxu1 %v3656_v15  ;;  %2235 = vmatprep.subr.bf16.mxu0 %v3521_v16  ;;  %v707_v15 = vld [vmem:[#allocation9 + $0x730] sm:$0xff]  ;;  %v3600_v16 = vcombine.low %v583_v4, %v587_v5  ;;  %v3555_v4 = vcombine.high %v536_v62, %v540_v63 }
 0x189   :  { %2278 = vmatprep.subr.bf16.mxu1 %v3649_v17  ;;  %v3728_v17 = vcombine.low %v711_v6, %v715_v7  ;;  %v3721_v19 = vcombine.high %v703_v14, %v707_v15  ;;  %v528_v6 = vld [vmem:[#allocation9 + $0x198] sm:$0xff] }
 0x18a   :  { %v532_v7 = vld [vmem:[#allocation9 + $0x1b8] sm:$0xff] }
 0x18b   :  { %2236 = vmatpush1.bf16.msra.mxu0 %v3520_v22  ;;  %v695_v22 = vld [vmem:[#allocation9 + $0x6d0] sm:$0xff] }
 0x18c   :  { %2279 = vmatpush1.bf16.msra.mxu1 %v3648_v23  ;;  %2237 = vmatprep.subr.bf16.mxu0 %v3513_v24  ;;  %v699_v23 = vld [vmem:[#allocation9 + $0x6f0] sm:$0xff]  ;;  %v3592_v24 = vcombine.low %v575_v12, %v579_v13  ;;  %v3547_v12 = vcombine.high %v528_v6, %v532_v7  ;;  %v520_v13 = vld [vmem:[#allocation9 + $0x158] sm:$0xff] }
 0x18d   :  { %2280 = vmatprep.subr.bf16.mxu1 %v3641_v25  ;;  %v3720_v25 = vcombine.low %v703_v14, %v707_v15  ;;  %v3713_v31 = vcombine.high %v695_v22, %v699_v23  ;;  %v524_v14 = vld [vmem:[#allocation9 + $0x178] sm:$0xff] }
 0x18f   :  { %2238 = vmatpush1.bf16.msra.mxu0 %v3512_v34  ;;  %v687_v34 = vld [vmem:[#allocation9 + $0x690] sm:$0xff] }
 0x190   :  { %2281 = vmatpush1.bf16.msra.mxu1 %v3640_v35  ;;  %2239 = vmatprep.subr.bf16.mxu0 %v3505_v36  ;;  %v691_v35 = vld [vmem:[#allocation9 + $0x6b0] sm:$0xff]  ;;  %v3584_v36 = vcombine.low %v567_v20, %v571_v21  ;;  %v3539_v20 = vcombine.high %v520_v13, %v524_v14 }
 0x191   :  { %2282 = vmatprep.subr.bf16.mxu1 %v3633_v37  ;;  %v3712_v37 = vcombine.low %v695_v22, %v699_v23  ;;  %v3705_v39 = vcombine.high %v687_v34, %v691_v35  ;;  %v512_v22 = vld [vmem:[#allocation9 + $0x118] sm:$0xff] }
 0x192   :  { %v516_v23 = vld [vmem:[#allocation9 + $0x138] sm:$0xff] }
 0x193   :  { %2240 = vmatpush1.bf16.msra.mxu0 %v3504_v42  ;;  %v679_v42 = vld [vmem:[#allocation9 + $0x650] sm:$0xff] }
 0x194   :  { %2283 = vmatpush1.bf16.msra.mxu1 %v3632_v43  ;;  %2241 = vmatprep.subr.bf16.mxu0 %v3497_v44  ;;  %v683_v43 = vld [vmem:[#allocation9 + $0x670] sm:$0xff]  ;;  %v3576_v44 = vcombine.low %v559_v32, %v563_v33  ;;  %v3531_v32 = vcombine.high %v512_v22, %v516_v23  ;;  %v504_v33 = vld [vmem:[#allocation9 + $0xd8] sm:$0xff] }
 0x195   :  { %2284 = vmatprep.subr.bf16.mxu1 %v3625_v45  ;;  %v3704_v45 = vcombine.low %v687_v34, %v691_v35  ;;  %v3697_v47 = vcombine.high %v679_v42, %v683_v43  ;;  %v508_v34 = vld [vmem:[#allocation9 + $0xf8] sm:$0xff] }
 0x196   :  { %v632_v35 = vld [vmem:[#allocation9 + $0x4d8] sm:$0xff] }
 0x197   :  { %2242 = vmatpush1.bf16.msra.mxu0 %v3496_v50  ;;  %v671_v50 = vld [vmem:[#allocation9 + $0x610] sm:$0xff] }
 0x198   :  { %2285 = vmatpush1.bf16.msra.mxu1 %v3624_v57  ;;  %2243 = vmatprep.subr.bf16.mxu0 %v3617_v58  ;;  %v675_v57 = vld [vmem:[#allocation9 + $0x630] sm:$0xff]  ;;  %v3568_v58 = vcombine.low %v551_v40, %v555_v41  ;;  %v496_v40 = vld [vmem:[#allocation9 + $0x98] sm:$0xff] }
 0x199   :  { %2286 = vmatprep.subr.bf16.mxu1 %v3745_v59  ;;  %v3696_v59 = vcombine.low %v679_v42, %v683_v43  ;;  %v3689_v61 = vcombine.high %v671_v50, %v675_v57  ;;  %v500_v41 = vld [vmem:[#allocation9 + $0xb8] sm:$0xff] }
 0x19a   :  { %v624_v42 = vld [vmem:[#allocation9 + $0x498] sm:$0xff] }
 0x19b   :  { %2244 = vmatpush2.bf16.msra.mxu0 %v3616_v0  ;;  %v664_v0 = vld [vmem:[#allocation9 + $0x5d8] sm:$0xff] }
 0x19c   :  { %2287 = vmatpush2.bf16.msra.mxu1 %v3744_v1  ;;  %2245 = vmatprep.subr.bf16.mxu0 %v3609_v2  ;;  %v668_v1 = vld [vmem:[#allocation9 + $0x5f8] sm:$0xff]  ;;  %v3560_v2 = vcombine.low %v543_v48, %v547_v49 }
 0x19d   :  { %2288 = vmatprep.subr.bf16.mxu1 %v3737_v3  ;;  %v3688_v3 = vcombine.low %v671_v50, %v675_v57  ;;  %v3683_v5 = vcombine.high %v664_v0, %v668_v1  ;;  %v628_v43 = vld [vmem:[#allocation9 + $0x4b8] sm:$0xff] }
 0x19e   :  { %v488_v48 = vld [vmem:[#allocation9 + $0x58] sm:$0xff] }
 0x19f   :  { %2246 = vmatpush2.bf16.msra.mxu0 %v3608_v8  ;;  %v3554_v8 = vcombine.low %v536_v62, %v540_v63  ;;  %v492_v49 = vld [vmem:[#allocation9 + $0x78] sm:$0xff] }
 0x1a0   :  { %2289 = vmatpush2.bf16.msra.mxu1 %v3736_v9  ;;  %2247 = vmatprep.subr.bf16.mxu0 %v3601_v10  ;;  %v656_v9 = vld [vmem:[#allocation9 + $0x598] sm:$0xff] }
 0x1a1   :  { %2290 = vmatprep.subr.bf16.mxu1 %v3729_v11  ;;  %v660_v10 = vld [vmem:[#allocation9 + $0x5b8] sm:$0xff]  ;;  %v3682_v11 = vcombine.low %v664_v0, %v668_v1 }
 0x1a2   :  { %v3675_v15 = vcombine.high %v656_v9, %v660_v10  ;;  %v616_v50 = vld [vmem:[#allocation9 + $0x458] sm:$0xff] }
 0x1a3   :  { %2248 = vmatpush2.bf16.msra.mxu0 %v3600_v16  ;;  %v648_v16 = vld [vmem:[#allocation9 + $0x558] sm:$0xff] }
 0x1a4   :  { %2291 = vmatpush2.bf16.msra.mxu1 %v3728_v17  ;;  %2249 = vmatprep.subr.bf16.mxu0 %v3593_v18  ;;  %v652_v17 = vld [vmem:[#allocation9 + $0x578] sm:$0xff]  ;;  %v3546_v18 = vcombine.low %v528_v6, %v532_v7 }
 0x1a5   :  { %2292 = vmatprep.subr.bf16.mxu1 %v3721_v19  ;;  %v3674_v19 = vcombine.low %v656_v9, %v660_v10  ;;  %v3667_v21 = vcombine.high %v648_v16, %v652_v17  ;;  %v620_v57 = vld [vmem:[#allocation9 + $0x478] sm:$0xff] }
 0x1a6   :  { %v480_v62 = vld [vmem:[#allocation9 + $0x18] sm:$0xff] }
 0x1a7   :  { %2250 = vmatpush2.bf16.msra.mxu0 %v3592_v24  ;;  %v640_v24 = vld [vmem:[#allocation9 + $0x518] sm:$0xff] }
 0x1a8   :  { %2293 = vmatpush2.bf16.msra.mxu1 %v3720_v25  ;;  %2251 = vmatprep.subr.bf16.mxu0 %v3585_v30  ;;  %v644_v25 = vld [vmem:[#allocation9 + $0x538] sm:$0xff]  ;;  %v3538_v30 = vcombine.low %v520_v13, %v524_v14 }
 0x1a9   :  { %2294 = vmatprep.subr.bf16.mxu1 %v3713_v31  ;;  %v3666_v31 = vcombine.low %v648_v16, %v652_v17  ;;  %v484_v63 = vld [vmem:[#allocation9 + $0x38] sm:$0xff] }
 0x1aa   :  { %v608_v0 = vld [vmem:[#allocation9 + $0x418] sm:$0xff]  ;;  %v3498_v10 = vcombine.low %v480_v62, %v484_v63 }
 0x1ab   :  { %2252 = vmatpush2.bf16.msra.mxu0 %v3584_v36  ;;  %v636_v36 = vld [vmem:[#allocation9 + $0x4f8] sm:$0xff] }
 0x1ac   :  { %2295 = vmatpush2.bf16.msra.mxu1 %v3712_v37  ;;  %2253 = vmatprep.subr.bf16.mxu0 %v3577_v38  ;;  %v3658_v37 = vcombine.low %v640_v24, %v644_v25  ;;  %v3523_v38 = vcombine.high %v504_v33, %v508_v34  ;;  %v612_v1 = vld [vmem:[#allocation9 + $0x438] sm:$0xff] }
 0x1ad   :  { %2296 = vmatprep.subr.bf16.mxu1 %v3705_v39  ;;  %v3651_v39 = vcombine.high %v632_v35, %v636_v36  ;;  %v600_v6 = vld [vmem:[#allocation9 + $0x3d8] sm:$0xff] }
 0x1ae   :  { %v604_v7 = vld [vmem:[#allocation9 + $0x3f8] sm:$0xff] }
 0x1af   :  { %2254 = vmatpush2.bf16.msra.mxu0 %v3576_v44  ;;  %v3522_v44 = vcombine.low %v504_v33, %v508_v34  ;;  %v732_v9 = vld [vmem:[#allocation9 + $0x7f8] sm:$0xff] }
 0x1b0   :  { %2297 = vmatpush2.bf16.msra.mxu1 %v3704_v45  ;;  %2255 = vmatprep.subr.bf16.mxu0 %v3569_v46  ;;  %v3650_v45 = vcombine.low %v632_v35, %v636_v36  ;;  %v3515_v46 = vcombine.high %v496_v40, %v500_v41  ;;  %v592_v14 = vld [vmem:[#allocation9 + $0x398] sm:$0xff] }
 0x1b1   :  { %2298 = vmatprep.subr.bf16.mxu1 %v3697_v47  ;;  %v3643_v47 = vcombine.high %v624_v42, %v628_v43  ;;  %v720_v16 = vld [vmem:[#allocation9 + $0x798] sm:$0xff] }
 0x1b2   :  { %v724_v17 = vld [vmem:[#allocation9 + $0x7b8] sm:$0xff] }
 0x1b3   :  { %2256 = vmatpush2.bf16.msra.mxu0 %v3568_v58  ;;  %v3514_v58 = vcombine.low %v496_v40, %v500_v41  ;;  %v576_v33 = vld [vmem:[#allocation9 + $0x318] sm:$0xff] }
 0x1b4   :  { %2299 = vmatpush2.bf16.msra.mxu1 %v3696_v59  ;;  %2257 = vmatprep.subr.bf16.mxu0 %v3561_v60  ;;  %v3642_v59 = vcombine.low %v624_v42, %v628_v43  ;;  %v3507_v60 = vcombine.high %v488_v48, %v492_v49  ;;  %v580_v34 = vld [vmem:[#allocation9 + $0x338] sm:$0xff] }
 0x1b5   :  { %2300 = vmatprep.subr.bf16.mxu1 %v3689_v61  ;;  %v3635_v61 = vcombine.high %v616_v50, %v620_v57  ;;  %v704_v35 = vld [vmem:[#allocation9 + $0x718] sm:$0xff] }
 0x1b6   :  { %v708_v36 = vld [vmem:[#allocation9 + $0x738] sm:$0xff] }
 0x1b7   :  { %2258 = vmatpush2.bf16.msra.mxu0 %v3560_v2  ;;  %v3506_v2 = vcombine.low %v488_v48, %v492_v49  ;;  %v568_v40 = vld [vmem:[#allocation9 + $0x2d8] sm:$0xff] }
 0x1b8   :  { %2301 = vmatpush2.bf16.msra.mxu1 %v3688_v3  ;;  %2313 = vmatprep.subr.bf16.mxu0 %v3555_v4  ;;  %v3634_v3 = vcombine.low %v616_v50, %v620_v57  ;;  %v3499_v4 = vcombine.high %v480_v62, %v484_v63  ;;  %v572_v41 = vld [vmem:[#allocation9 + $0x2f8] sm:$0xff] }
 0x1b9   :  { %2356 = vmatprep.subr.bf16.mxu1 %v3683_v5  ;;  %v3627_v5 = vcombine.high %v608_v0, %v612_v1  ;;  %v696_v42 = vld [vmem:[#allocation9 + $0x6d8] sm:$0xff] }
 0x1ba   :  { %2260 = vmatmul.mubr.bf16.vlgmr.msra.gmra.mxu0 %v4388_v28  ;;  %v700_v43 = vld [vmem:[#allocation9 + $0x6f8] sm:$0xff] }
 0x1bb   :  { %2303 = vmatmul.mubr.bf16.vlgmr.msra.gmra.mxu1 %v4390_v29  ;;  %2314 = vmatpush1.bf16.msra.mxu0 %v3554_v8  ;;  %v728_v8 = vld [vmem:[#allocation9 + $0x7d8] sm:$0xff] }
 0x1bc   :  { %2345 = vmatprep.mubr.bf16.mxu0 %v4384_v26  ;;  %2357 = vmatpush1.bf16.msra.mxu1 %v3682_v11  ;;  %v3659_v26 = vcombine.high %v640_v24, %v644_v25  ;;  %v3626_v11 = vcombine.low %v608_v0, %v612_v1  ;;  %v3747_v13 = vcombine.high %v728_v8, %v732_v9  ;;  %v712_v24 = vld [vmem:[#allocation9 + $0x758] sm:$0xff] }
 0x1bd   :  { %2388 = vmatprep.mubr.bf16.mxu1 %v4386_v27  ;;  %2315 = vmatprep.subr.bf16.mxu0 %v3547_v12  ;;  %v3530_v27 = vcombine.low %v512_v22, %v516_v23  ;;  %v3619_v12 = vcombine.high %v600_v6, %v604_v7  ;;  %v584_v22 = vld [vmem:[#allocation9 + $0x358] sm:$0xff] }
 0x1be   :  { %2358 = vmatprep.subr.bf16.mxu1 %v3675_v15  ;;  %v596_v15 = vld [vmem:[#allocation9 + $0x3b8] sm:$0xff] }
 0x1bf   :  { %2316 = vmatpush1.bf16.msra.mxu0 %v3546_v18  ;;  %v3618_v18 = vcombine.low %v600_v6, %v604_v7  ;;  %v588_v23 = vld [vmem:[#allocation9 + $0x378] sm:$0xff] }
 0x1c0   :  { %2359 = vmatpush1.bf16.msra.mxu1 %v3674_v19  ;;  %2317 = vmatprep.subr.bf16.mxu0 %v3539_v20  ;;  %v3746_v19 = vcombine.low %v728_v8, %v732_v9  ;;  %v3611_v20 = vcombine.high %v592_v14, %v596_v15  ;;  %v716_v25 = vld [vmem:[#allocation9 + $0x778] sm:$0xff] }
 0x1c1   :  { %2360 = vmatprep.subr.bf16.mxu1 %v3667_v21  ;;  %v3739_v21 = vcombine.high %v720_v16, %v724_v17  ;;  %v560_v48 = vld [vmem:[#allocation9 + $0x298] sm:$0xff] }
 0x1c2   :  { %v564_v49 = vld [vmem:[#allocation9 + $0x2b8] sm:$0xff] }
 0x1c3   :  { %2318 = vmatpush1.bf16.msra.mxu0 %v3538_v30  ;;  %v3610_v30 = vcombine.low %v592_v14, %v596_v15  ;;  %v688_v50 = vld [vmem:[#allocation9 + $0x698] sm:$0xff] }
 0x1c4   :  { %2361 = vmatpush1.bf16.msra.mxu1 %v3666_v31  ;;  %2319 = vmatprep.subr.bf16.mxu0 %v3531_v32  ;;  %v3738_v31 = vcombine.low %v720_v16, %v724_v17  ;;  %v3603_v32 = vcombine.high %v584_v22, %v588_v23  ;;  %v692_v57 = vld [vmem:[#allocation9 + $0x6b8] sm:$0xff] }
 0x1c5   :  { %2362 = vmatprep.subr.bf16.mxu1 %v3659_v26  ;;  %v3731_v26 = vcombine.high %v712_v24, %v716_v25  ;;  %v552_v62 = vld [vmem:[#allocation9 + $0x258] sm:$0xff] }
 0x1c6   :  { %v556_v63 = vld [vmem:[#allocation9 + $0x278] sm:$0xff] }
 0x1c7   :  { %2320 = vmatpush1.bf16.msra.mxu0 %v3530_v27  ;;  %v3602_v27 = vcombine.low %v584_v22, %v588_v23  ;;  %v680_v0 = vld [vmem:[#allocation9 + $0x658] sm:$0xff]  ;;  %v3977_v23 = vld [vmem:[#allocation11 + $0x164] ss:$8 sps:$4 sm:$0xff]  }
 0x1c8   :  { %2363 = vmatpush1.bf16.msra.mxu1 %v3658_v37  ;;  %2321 = vmatprep.subr.bf16.mxu0 %v3523_v38  ;;  %v3730_v37 = vcombine.low %v712_v24, %v716_v25  ;;  %v3595_v38 = vcombine.high %v576_v33, %v580_v34  ;;  %v684_v1 = vld [vmem:[#allocation9 + $0x678] sm:$0xff] }
 0x1c9   :  { %2364 = vmatprep.subr.bf16.mxu1 %v3651_v39  ;;  %v3723_v39 = vcombine.high %v704_v35, %v708_v36  ;;  %v544_v6 = vld [vmem:[#allocation9 + $0x218] sm:$0xff] }
 0x1ca   :  { %v548_v7 = vld [vmem:[#allocation9 + $0x238] sm:$0xff] }
 0x1cb   :  { %2322 = vmatpush1.bf16.msra.mxu0 %v3522_v44  ;;  %v3594_v44 = vcombine.low %v576_v33, %v580_v34  ;;  %v672_v8 = vld [vmem:[#allocation9 + $0x618] sm:$0xff]  ;;  %v3562_v14 = vcombine.low %v544_v6, %v548_v7  ;;  %v3975_v33 = vld [vmem:[#allocation11 + $0x160] ss:$8 sps:$4 sm:$0xff]  }
 0x1cc   :  { %2365 = vmatpush1.bf16.msra.mxu1 %v3650_v45  ;;  %2323 = vmatprep.subr.bf16.mxu0 %v3515_v46  ;;  %v3722_v45 = vcombine.low %v704_v35, %v708_v36  ;;  %v3587_v46 = vcombine.high %v568_v40, %v572_v41  ;;  %v676_v9 = vld [vmem:[#allocation9 + $0x638] sm:$0xff] }
 0x1cd   :  { %2366 = vmatprep.subr.bf16.mxu1 %v3643_v47  ;;  %v3715_v47 = vcombine.high %v696_v42, %v700_v43  ;;  %v3690_v15 = vcombine.low %v672_v8, %v676_v9  ;;  %v3956_v16 = vld [vmem:[#allocation11 + $0x74] ss:$8 sps:$4 sm:$0xff]  }
 0x1ce   :  { %v3971_v17 = vld [vmem:[#allocation11 + $0x174] ss:$8 sps:$4 sm:$0xff]  }
 0x1cf   :  { %2324 = vmatpush1.bf16.msra.mxu0 %v3514_v58  ;;  %v3586_v58 = vcombine.low %v568_v40, %v572_v41  ;;  %v3983_v35 = vld [vmem:[#allocation11 + $0x154] ss:$8 sps:$4 sm:$0xff]   ;;  %v3989_v41 = vld [vmem:[#allocation11 + $0x144] ss:$8 sps:$4 sm:$0xff]  }
 0x1d0   :  { %2367 = vmatpush1.bf16.msra.mxu1 %v3642_v59  ;;  %2325 = vmatprep.subr.bf16.mxu0 %v3507_v60  ;;  %v3714_v59 = vcombine.low %v696_v42, %v700_v43  ;;  %v3579_v60 = vcombine.high %v560_v48, %v564_v49 }
 0x1d1   :  { %2368 = vmatprep.subr.bf16.mxu1 %v3635_v61  ;;  %v3707_v61 = vcombine.high %v688_v50, %v692_v57 }
 0x1d3   :  { %2326 = vmatpush1.bf16.msra.mxu0 %v3506_v2  ;;  %v3578_v2 = vcombine.low %v560_v48, %v564_v49  ;;  %v3995_v49 = vld [vmem:[#allocation11 + $0x134] ss:$8 sps:$4 sm:$0xff]  }
 0x1d4   :  { %2369 = vmatpush1.bf16.msra.mxu1 %v3634_v3  ;;  %2327 = vmatprep.subr.bf16.mxu0 %v3499_v4  ;;  %v3706_v3 = vcombine.low %v688_v50, %v692_v57  ;;  %v3571_v4 = vcombine.high %v552_v62, %v556_v63  ;;  %v3966_v57 = vld [vmem:[#allocation11 + $0x30] ss:$8 sps:$4 sm:$0xff]  }
 0x1d5   :  { %2370 = vmatprep.subr.bf16.mxu1 %v3627_v5  ;;  %v3699_v5 = vcombine.high %v680_v0, %v684_v1 }
 0x1d7   :  { %2328 = vmatpush1.bf16.msra.mxu0 %v3498_v10  ;;  %v3570_v10 = vcombine.low %v552_v62, %v556_v63  ;;  %v3980_v62 = vld [vmem:[#allocation11 + $0x14] ss:$8 sps:$4 sm:$0xff]   ;;  %v3999_v63 = vld [vmem:[#allocation11 + $0x120] ss:$8 sps:$4 sm:$0xff]  }
 0x1d8   :  { %2371 = vmatpush1.bf16.msra.mxu1 %v3626_v11  ;;  %2329 = vmatprep.subr.bf16.mxu0 %v3619_v12  ;;  %v3698_v11 = vcombine.low %v680_v0, %v684_v1  ;;  %v3563_v12 = vcombine.high %v544_v6, %v548_v7  ;;  %v4007_v0 = vld [vmem:[#allocation11 + $0x114] ss:$8 sps:$4 sm:$0xff]   ;;  %v3978_v1 = vld [vmem:[#allocation11 + $0x10] ss:$8 sps:$4 sm:$0xff]   ;;  %v4011_v7 = vld [vmem:[#allocation11 + $0x100] ss:$8 sps:$4 sm:$0xff]  }
 0x1d9   :  { %2372 = vmatprep.subr.bf16.mxu1 %v3747_v13  ;;  %v3691_v13 = vcombine.high %v672_v8, %v676_v9  ;;  %v3992_v6 = vld [vmem:[#allocation11 + $0xf4] ss:$8 sps:$4 sm:$0xff]   ;;  %v3990_v9 = vld [vmem:[#allocation11 + $0xf0] ss:$8 sps:$4 sm:$0xff]  }
 0x1da   :  { %v4019_v8 = vld [vmem:[#allocation11 + $0x1f4] ss:$8 sps:$4 sm:$0xff]  }
 0x1db   :  { %2330 = vmatpush2.bf16.msra.mxu0 %v3618_v18  ;;  %v3954_v18 = vld [vmem:[#allocation11 + $0x70] ss:$8 sps:$4 sm:$0xff]  }
 0x1dc   :  { %2373 = vmatpush2.bf16.msra.mxu1 %v3746_v19  ;;  %2331 = vmatprep.subr.bf16.mxu0 %v3611_v20  ;;  %v4409_v19 = vld [vmem:[%s4464_s4] sm:$0xff] }
 0x1dd   :  { %2374 = vmatprep.subr.bf16.mxu1 %v3739_v21  ;;  %v3959_v20 = vld [vmem:[#allocation11 + $0x64] ss:$8 sps:$4 sm:$0xff]   ;;  %v3969_v21 = vld [vmem:[#allocation11 + $0x170] ss:$8 sps:$4 sm:$0xff]   ;;  %v742_v22 = vrot.slane %v4409_v19, %v4371_v53 }
 0x1df   :  { %2332 = vmatpush2.bf16.msra.mxu0 %v3610_v30  ;;  %v3957_v30 = vld [vmem:[#allocation11 + $0x60] ss:$8 sps:$4 sm:$0xff]  }
 0x1e0   :  { %2375 = vmatpush2.bf16.msra.mxu1 %v3738_v31  ;;  %2333 = vmatprep.subr.bf16.mxu0 %v3603_v32 }
 0x1e1   :  { %2376 = vmatprep.subr.bf16.mxu1 %v3731_v26  ;;  %v3962_v26 = vld [vmem:[#allocation11 + $0x54] ss:$8 sps:$4 sm:$0xff]  }
 0x1e3   :  { %2334 = vmatpush2.bf16.msra.mxu0 %v3602_v27  ;;  %v3960_v27 = vld [vmem:[#allocation11 + $0x50] ss:$8 sps:$4 sm:$0xff]  }
 0x1e4   :  { %2377 = vmatpush2.bf16.msra.mxu1 %v3730_v37  ;;  %2335 = vmatprep.subr.bf16.mxu0 %v3595_v38  ;;  %v3981_v38 = vld [vmem:[#allocation11 + $0x150] ss:$8 sps:$4 sm:$0xff]  }
 0x1e5   :  { %2378 = vmatprep.subr.bf16.mxu1 %v3723_v39 }
 0x1e7   :  { %2336 = vmatpush2.bf16.msra.mxu0 %v3594_v44  ;;  %v3963_v44 = vld [vmem:[#allocation11 + $0x40] ss:$8 sps:$4 sm:$0xff]  }
 0x1e8   :  { %2379 = vmatpush2.bf16.msra.mxu1 %v3722_v45  ;;  %2337 = vmatprep.subr.bf16.mxu0 %v3587_v46  ;;  %v3968_v45 = vld [vmem:[#allocation11 + $0x34] ss:$8 sps:$4 sm:$0xff]   ;;  %v3987_v46 = vld [vmem:[#allocation11 + $0x140] ss:$8 sps:$4 sm:$0xff]  }
 0x1e9   :  { %2380 = vmatprep.subr.bf16.mxu1 %v3715_v47 }
 0x1eb   :  { %2338 = vmatpush2.bf16.msra.mxu0 %v3586_v58  ;;  %v3974_v58 = vld [vmem:[#allocation11 + $0x24] ss:$8 sps:$4 sm:$0xff]  }
 0x1ec   :  { %2381 = vmatpush2.bf16.msra.mxu1 %v3714_v59  ;;  %2339 = vmatprep.subr.bf16.mxu0 %v3579_v60  ;;  %v3993_v59 = vld [vmem:[#allocation11 + $0x130] ss:$8 sps:$4 sm:$0xff]   ;;  %v4001_v60 = vld [vmem:[#allocation11 + $0x124] ss:$8 sps:$4 sm:$0xff]  }
 0x1ed   :  { %2382 = vmatprep.subr.bf16.mxu1 %v3707_v61  ;;  %v3972_v61 = vld [vmem:[#allocation11 + $0x20] ss:$8 sps:$4 sm:$0xff]  }
 0x1ef   :  { %2340 = vmatpush2.bf16.msra.mxu0 %v3578_v2  ;;  %v3986_v2 = vld [vmem:[#allocation11 + $0x4] ss:$8 sps:$4 sm:$0xff]  }
 0x1f0   :  { %2383 = vmatpush2.bf16.msra.mxu1 %v3706_v3  ;;  %2341 = vmatprep.subr.bf16.mxu0 %v3571_v4  ;;  %v4005_v3 = vld [vmem:[#allocation11 + $0x110] ss:$8 sps:$4 sm:$0xff]   ;;  %v4013_v4 = vld [vmem:[#allocation11 + $0x104] ss:$8 sps:$4 sm:$0xff]  }
 0x1f1   :  { %2384 = vmatprep.subr.bf16.mxu1 %v3699_v5  ;;  %v3984_v5 = vld [vmem:[#allocation11] ss:$8 sps:$4 sm:$0xff]  }
 0x1f3   :  { %2342 = vmatpush2.bf16.msra.mxu0 %v3570_v10  ;;  %v3998_v10 = vld [vmem:[#allocation11 + $0xe4] ss:$8 sps:$4 sm:$0xff]  }
 0x1f4   :  { %2385 = vmatpush2.bf16.msra.mxu1 %v3698_v11  ;;  %2343 = vmatprep.subr.bf16.mxu0 %v3563_v12  ;;  %v4017_v11 = vld [vmem:[#allocation11 + $0x1f0] ss:$8 sps:$4 sm:$0xff]   ;;  %v4025_v12 = vld [vmem:[#allocation11 + $0x1e4] ss:$8 sps:$4 sm:$0xff]  }
 0x1f5   :  { %2386 = vmatprep.subr.bf16.mxu1 %v3691_v13  ;;  %v3996_v13 = vld [vmem:[#allocation11 + $0xe0] ss:$8 sps:$4 sm:$0xff]  }
 0x1f7   :  { %2344 = vmatpush2.bf16.msra.mxu0 %v3562_v14  ;;  %v4004_v14 = vld [vmem:[#allocation11 + $0xd4] ss:$8 sps:$4 sm:$0xff]  }
 0x1f8   :  { %2387 = vmatpush2.bf16.msra.mxu1 %v3690_v15  ;;  %3203 = vmatprep.subr.bf16.mxu0 %v3956_v16  ;;  %v4023_v15 = vld [vmem:[#allocation11 + $0x1e0] ss:$8 sps:$4 sm:$0xff]   ;;  %v4031_v16 = vld [vmem:[#allocation11 + $0x1d4] ss:$8 sps:$4 sm:$0xff]  }
 0x1f9   :  { %3246 = vmatprep.subr.bf16.mxu1 %v3971_v17  ;;  %v4002_v17 = vld [vmem:[#allocation11 + $0xd0] ss:$8 sps:$4 sm:$0xff]  }
 0x1fa   :  { %2346 = vmatmul.mubr.bf16.vlgmr.msra.gmra.mxu0 %v4388_v28  ;;  %v4414_v24 = vpop.f32.mrf.mxu0  ;;  %v4416_v25 = vpop.f32.mrf.mxu1 }
 0x1fb   :  { %2389 = vmatmul.mubr.bf16.vlgmr.msra.gmra.mxu1 %v4390_v29  ;;  %3204 = vmatpush1.bf16.msra.mxu0 %v3954_v18  ;;  %v3965_v29 = vld [vmem:[#allocation11 + $0x44] ss:$8 sps:$4 sm:$0xff]  }
 0x1fc   :  { %v2091_v31 = vpop.f32.mrf.mxu0  ;;  %v2134_v32 = vpop.f32.mrf.mxu1  ;;  %3205 = vmatprep.subr.bf16.mxu0 %v3959_v20  ;;  %3247 = vmatpush1.bf16.msra.mxu1 %v3969_v21  ;;  %v4010_v18 = vld [vmem:[#allocation11 + $0xc4] ss:$8 sps:$4 sm:$0xff]   ;;  %v4029_v20 = vld [vmem:[#allocation11 + $0x1d0] ss:$8 sps:$4 sm:$0xff]  }
 0x1fd   :  { %v2092_v34 = vadd.f32 %v2091_v31, %v742_v22  ;;  %3248 = vmatprep.subr.bf16.mxu1 %v3977_v23  ;;  %v4037_v21 = vld [vmem:[#allocation11 + $0x1c4] ss:$8 sps:$4 sm:$0xff]   ;;  %v4016_v23 = vld [vmem:[#allocation11 + $0xb4] ss:$8 sps:$4 sm:$0xff]  }
 0x1fe   :  { %v4419_v36 = vpop.f32.mrf.mxu0  ;;  %v4421_v28 = vpop.f32.mrf.mxu1  ;;  %v4040_v31 = vld [vmem:[#allocation11 + $0x1b4] ss:$8 sps:$4 sm:$0xff]  }
 0x1ff   :  { %3206 = vmatpush1.bf16.msra.mxu0 %v3957_v30  ;;  %v2135_v39 = vadd.f32 %v2134_v32, %v2092_v34  ;;  %v4035_v30 = vld [vmem:[#allocation11 + $0x1c0] ss:$8 sps:$4 sm:$0xff]   ;;  %v4014_v32 = vld [vmem:[#allocation11 + $0xb0] ss:$8 sps:$4 sm:$0xff]   ;;  %v4043_v34 = vld [vmem:[#allocation11 + $0x1a4] ss:$8 sps:$4 sm:$0xff]  }
 0x200   :  { %v2095_v37 = vpop.f32.mrf.mxu0  ;;  %3207 = vmatprep.subr.bf16.mxu0 %v3962_v26  ;;  %3249 = vmatpush1.bf16.msra.mxu1 %v3975_v33  ;;  %v2138_v42 = vpop.f32.mrf.mxu1  ;;  %v4022_v26 = vld [vmem:[#allocation11 + $0xa4] ss:$8 sps:$4 sm:$0xff]   ;;  %v4038_v33 = vld [vmem:[#allocation11 + $0x1b0] ss:$8 sps:$4 sm:$0xff]  }
 0x201   :  { %v2096_v40 = vadd.f32 %v2095_v37, %v742_v22  ;;  %3250 = vmatprep.subr.bf16.mxu1 %v3983_v35  ;;  %v2400_v47 = vmax.f32 %v2135_v39, 0.0  ;;  %v4008_v22 = vld [vmem:[#allocation11 + $0xc0] ss:$8 sps:$4 sm:$0xff]   ;;  %v738_v35 = vrot.slane %v4409_v19, %v4375_v55  ;;  %v4046_v39 = vld [vmem:[#allocation11 + $0x194] ss:$8 sps:$4 sm:$0xff]  }
 0x203   :  { %v2139_v43 = vadd.f32 %v2138_v42, %v2096_v40  ;;  %3208 = vmatpush1.bf16.msra.mxu0 %v3960_v27  ;;  %v4020_v27 = vld [vmem:[#allocation11 + $0xa0] ss:$8 sps:$4 sm:$0xff]   ;;  %v2094_v37 = vadd.f32 %v4419_v36, %v738_v35  ;;  %v2090_v40 = vadd.f32 %v4414_v24, %v738_v35  ;;  %v4100_v24 = vld [vmem:[#allocation11 + $0x374] ss:$8 sps:$4 sm:$0xff]  }
 0x204   :  { %3209 = vmatprep.subr.bf16.mxu0 %v3965_v29  ;;  %3251 = vmatpush1.bf16.msra.mxu1 %v3981_v38  ;;  %v4028_v29 = vld [vmem:[#allocation11 + $0x94] ss:$8 sps:$4 sm:$0xff]   ;;  %v4041_v38 = vld [vmem:[#allocation11 + $0x1a0] ss:$8 sps:$4 sm:$0xff]  }
 0x205   :  { %v2408_v48 = vmax.f32 %v2139_v43, 0.0  ;;  %3252 = vmatprep.subr.bf16.mxu1 %v3989_v41  ;;  %v4026_v41 = vld [vmem:[#allocation11 + $0x90] ss:$8 sps:$4 sm:$0xff]   ;;  %v2137_v42 = vadd.f32 %v4421_v28, %v2094_v37  ;;  %v4034_v43 = vld [vmem:[#allocation11 + $0x84] ss:$8 sps:$4 sm:$0xff]   ;;  %v2133_v36 = vadd.f32 %v4416_v25, %v2090_v40  ;;  %v750_v25 = vrot.slane %v4409_v19, %v160_v54 }
 0x206   :  { %v4050_v28 = vld [vmem:[#allocation11 + $0x270] ss:$8 sps:$4 sm:$0xff]   ;;  %v4106_v35 = vld [vmem:[#allocation11 + $0x354] ss:$8 sps:$4 sm:$0xff]   ;;  %v4107_v40 = vld [vmem:[#allocation11 + $0x340] ss:$8 sps:$4 sm:$0xff]  }
 0x207   :  { %v2416_v50 = vpack.c.bf16 %v2408_v48, %v2400_v47  ;;  %3210 = vmatpush1.bf16.msra.mxu0 %v3963_v44  ;;  %v4044_v44 = vld [vmem:[#allocation11 + $0x190] ss:$8 sps:$4 sm:$0xff]   ;;  %v2407_v47 = vmax.f32 %v2137_v42, 0.0  ;;  %v4047_v48 = vld [vmem:[#allocation11 + $0x180] ss:$8 sps:$4 sm:$0xff]  }
 0x208   :  { %3211 = vmatprep.subr.bf16.mxu0 %v3968_v45  ;;  %3253 = vmatpush1.bf16.msra.mxu1 %v3987_v46  ;;  %v4049_v45 = vld [vmem:[#allocation11 + $0x184] ss:$8 sps:$4 sm:$0xff]   ;;  %v4032_v46 = vld [vmem:[#allocation11 + $0x80] ss:$8 sps:$4 sm:$0xff]   ;;  %v4056_v54 = vld [vmem:[#allocation11 + $0x250] ss:$8 sps:$4 sm:$0xff]  }
 0x209   :  { %3235 = vmatprep.mubr.bf16.mxu0 %v2416_v50  ;;  %3254 = vmatprep.subr.bf16.mxu1 %v3995_v49  ;;  %v4052_v49 = vld [vmem:[#allocation11 + $0x274] ss:$8 sps:$4 sm:$0xff]   ;;  %v2399_v50 = vmax.f32 %v2133_v36, 0.0  ;;  %v4104_v37 = vld [vmem:[#allocation11 + $0x350] ss:$8 sps:$4 sm:$0xff]  }
 0x20a   :  { %v4112_v42 = vld [vmem:[#allocation11 + $0x334] ss:$8 sps:$4 sm:$0xff]   ;;  %v4115_v36 = vld [vmem:[#allocation11 + $0x324] ss:$8 sps:$4 sm:$0xff]  }
 0x20b   :  { %3212 = vmatpush1.bf16.msra.mxu0 %v3966_v57  ;;  %v2415_v57 = vpack.c.bf16 %v2407_v47, %v2399_v50  ;;  %v4113_v47 = vld [vmem:[#allocation11 + $0x320] ss:$8 sps:$4 sm:$0xff]   ;;  %v4116_v50 = vld [vmem:[#allocation11 + $0x310] ss:$8 sps:$4 sm:$0xff]  }
 0x20c   :  { %3213 = vmatprep.subr.bf16.mxu0 %v3974_v58  ;;  %3255 = vmatpush1.bf16.msra.mxu1 %v3993_v59  ;;  %v4055_v58 = vld [vmem:[#allocation11 + $0x264] ss:$8 sps:$4 sm:$0xff]   ;;  %v746_v59 = vrot.slane %v4409_v19, %v156_v56 }
 0x20d   :  { %3256 = vmatprep.subr.bf16.mxu1 %v4001_v60 }
 0x20f   :  { %3214 = vmatpush1.bf16.msra.mxu0 %v3972_v61 }
 0x210   :  { %3215 = vmatprep.subr.bf16.mxu0 %v3980_v62  ;;  %3257 = vmatpush1.bf16.msra.mxu1 %v3999_v63  ;;  %v4053_v62 = vld [vmem:[#allocation11 + $0x260] ss:$8 sps:$4 sm:$0xff]  }
 0x211   :  { %3258 = vmatprep.subr.bf16.mxu1 %v4007_v0 }
 0x213   :  { %3216 = vmatpush1.bf16.msra.mxu0 %v3978_v1  ;;  %v4058_v1 = vld [vmem:[#allocation11 + $0x254] ss:$8 sps:$4 sm:$0xff]  }
 0x214   :  { %3217 = vmatprep.subr.bf16.mxu0 %v3986_v2  ;;  %3259 = vmatpush1.bf16.msra.mxu1 %v4005_v3 }
 0x215   :  { %3260 = vmatprep.subr.bf16.mxu1 %v4013_v4 }
 0x217   :  { %3218 = vmatpush1.bf16.msra.mxu0 %v3984_v5 }
 0x218   :  { %3219 = vmatprep.subr.bf16.mxu0 %v3992_v6  ;;  %3261 = vmatpush1.bf16.msra.mxu1 %v4011_v7 }
 0x219   :  { %3262 = vmatprep.subr.bf16.mxu1 %v4019_v8  ;;  %v4061_v8 = vld [vmem:[#allocation11 + $0x244] ss:$8 sps:$4 sm:$0xff]  }
 0x21b   :  { %3220 = vmatpush2.bf16.msra.mxu0 %v3990_v9 }
 0x21c   :  { %3221 = vmatprep.subr.bf16.mxu0 %v3998_v10  ;;  %3263 = vmatpush2.bf16.msra.mxu1 %v4017_v11 }
 0x21d   :  { %3264 = vmatprep.subr.bf16.mxu1 %v4025_v12 }
 0x21f   :  { %3222 = vmatpush2.bf16.msra.mxu0 %v3996_v13 }
 0x220   :  { %3223 = vmatprep.subr.bf16.mxu0 %v4004_v14  ;;  %3265 = vmatpush2.bf16.msra.mxu1 %v4023_v15  ;;  %v4059_v14 = vld [vmem:[#allocation11 + $0x240] ss:$8 sps:$4 sm:$0xff]  }
 0x221   :  { %3266 = vmatprep.subr.bf16.mxu1 %v4031_v16  ;;  %v4064_v16 = vld [vmem:[#allocation11 + $0x234] ss:$8 sps:$4 sm:$0xff]  }
 0x223   :  { %3224 = vmatpush2.bf16.msra.mxu0 %v4002_v17 }
 0x224   :  { %3225 = vmatprep.subr.bf16.mxu0 %v4010_v18  ;;  %3267 = vmatpush2.bf16.msra.mxu1 %v4029_v20 }
 0x225   :  { %3268 = vmatprep.subr.bf16.mxu1 %v4037_v21 }
 0x227   :  { %3226 = vmatpush2.bf16.msra.mxu0 %v4008_v22  ;;  %v4062_v22 = vld [vmem:[#allocation11 + $0x230] ss:$8 sps:$4 sm:$0xff]  }
 0x228   :  { %3227 = vmatprep.subr.bf16.mxu0 %v4016_v23  ;;  %3269 = vmatpush2.bf16.msra.mxu1 %v4035_v30  ;;  %v4098_v23 = vld [vmem:[#allocation11 + $0x370] ss:$8 sps:$4 sm:$0xff]  }
 0x229   :  { %3270 = vmatprep.subr.bf16.mxu1 %v4040_v31  ;;  %v4067_v31 = vld [vmem:[#allocation11 + $0x224] ss:$8 sps:$4 sm:$0xff]  }
 0x22b   :  { %3228 = vmatpush2.bf16.msra.mxu0 %v4014_v32  ;;  %v4103_v32 = vld [vmem:[#allocation11 + $0x364] ss:$8 sps:$4 sm:$0xff]  }
 0x22c   :  { %3229 = vmatprep.subr.bf16.mxu0 %v4022_v26  ;;  %3271 = vmatpush2.bf16.msra.mxu1 %v4038_v33  ;;  %v4065_v26 = vld [vmem:[#allocation11 + $0x220] ss:$8 sps:$4 sm:$0xff]  }
 0x22d   :  { %3272 = vmatprep.subr.bf16.mxu1 %v4043_v34  ;;  %v4101_v33 = vld [vmem:[#allocation11 + $0x360] ss:$8 sps:$4 sm:$0xff]   ;;  %v4070_v34 = vld [vmem:[#allocation11 + $0x214] ss:$8 sps:$4 sm:$0xff]  }
 0x22f   :  { %3230 = vmatpush2.bf16.msra.mxu0 %v4020_v27  ;;  %v4068_v27 = vld [vmem:[#allocation11 + $0x210] ss:$8 sps:$4 sm:$0xff]  }
 0x230   :  { %3231 = vmatprep.subr.bf16.mxu0 %v4028_v29  ;;  %3273 = vmatpush2.bf16.msra.mxu1 %v4041_v38  ;;  %v4073_v29 = vld [vmem:[#allocation11 + $0x204] ss:$8 sps:$4 sm:$0xff]  }
 0x231   :  { %3274 = vmatprep.subr.bf16.mxu1 %v4046_v39  ;;  %v4109_v38 = vld [vmem:[#allocation11 + $0x344] ss:$8 sps:$4 sm:$0xff]   ;;  %v4071_v39 = vld [vmem:[#allocation11 + $0x200] ss:$8 sps:$4 sm:$0xff]  }
 0x233   :  { %3232 = vmatpush2.bf16.msra.mxu0 %v4026_v41  ;;  %v4076_v41 = vld [vmem:[#allocation11 + $0x2f4] ss:$8 sps:$4 sm:$0xff]  }
 0x234   :  { %3233 = vmatprep.subr.bf16.mxu0 %v4034_v43  ;;  %3275 = vmatpush2.bf16.msra.mxu1 %v4044_v44  ;;  %v4074_v43 = vld [vmem:[#allocation11 + $0x2f0] ss:$8 sps:$4 sm:$0xff]  }
 0x235   :  { %3276 = vmatprep.subr.bf16.mxu1 %v4049_v45  ;;  %v4110_v44 = vld [vmem:[#allocation11 + $0x330] ss:$8 sps:$4 sm:$0xff]   ;;  %v4079_v45 = vld [vmem:[#allocation11 + $0x2e4] ss:$8 sps:$4 sm:$0xff]  }
 0x237   :  { %3234 = vmatpush2.bf16.msra.mxu0 %v4032_v46  ;;  %v4077_v46 = vld [vmem:[#allocation11 + $0x2e0] ss:$8 sps:$4 sm:$0xff]  }
 0x238   :  { %3277 = vmatpush2.bf16.msra.mxu1 %v4047_v48  ;;  %3289 = vmatprep.subr.bf16.mxu0 %v4052_v49  ;;  %v4082_v48 = vld [vmem:[#allocation11 + $0x2d4] ss:$8 sps:$4 sm:$0xff]  }
 0x239   :  { %3332 = vmatprep.subr.bf16.mxu1 %v4100_v24  ;;  %v4118_v49 = vld [vmem:[#allocation11 + $0x314] ss:$8 sps:$4 sm:$0xff]   ;;  %v4080_v24 = vld [vmem:[#allocation11 + $0x2d0] ss:$8 sps:$4 sm:$0xff]  }
 0x23a   :  { %v2175_v60 = vpop.f32.mrf.mxu0  ;;  %v2218_v61 = vpop.f32.mrf.mxu1  ;;  %3236 = vmatmul.mubr.bf16.vlgmr.msra.gmra.mxu0 %v2415_v57  ;;  %v4121_v57 = vld [vmem:[#allocation11 + $0x304] ss:$8 sps:$4 sm:$0xff]  }
 0x23b   :  { %3290 = vmatpush1.bf16.msra.mxu0 %v4050_v28  ;;  %v2176_v3 = vadd.f32 %v2175_v60, %v746_v59  ;;  %v4085_v28 = vld [vmem:[#allocation11 + $0x2c4] ss:$8 sps:$4 sm:$0xff]   ;;  %v4124_v60 = vld [vmem:[#allocation11 + $0x3f4] ss:$8 sps:$4 sm:$0xff]  }
 0x23c   :  { %v2177_v63 = vpop.f32.mrf.mxu0  ;;  %v2220_v0 = vpop.f32.mrf.mxu1  ;;  %3291 = vmatprep.subr.bf16.mxu0 %v4055_v58  ;;  %v4083_v58 = vld [vmem:[#allocation11 + $0x2c0] ss:$8 sps:$4 sm:$0xff]  }
 0x23d   :  { %v2178_v2 = vadd.f32 %v2177_v63, %v750_v25  ;;  %v2219_v11 = vadd.f32 %v2218_v61, %v2176_v3  ;;  %v4086_v61 = vld [vmem:[#allocation11 + $0x2b0] ss:$8 sps:$4 sm:$0xff]   ;;  %v4091_v63 = vld [vmem:[#allocation11 + $0x2a4] ss:$8 sps:$4 sm:$0xff]   ;;  %v4094_v3 = vld [vmem:[#allocation11 + $0x294] ss:$8 sps:$4 sm:$0xff]  }
 0x23e   :  { %v2179_v4 = vpop.f32.mrf.mxu0  ;;  %v2222_v5 = vpop.f32.mrf.mxu1 }
 0x23f   :  { %v2180_v6 = vadd.f32 %v2179_v4, %v746_v59  ;;  %3292 = vmatpush1.bf16.msra.mxu0 %v4053_v62  ;;  %v2221_v56 = vadd.f32 %v2220_v0, %v2178_v2  ;;  %v2401_v20 = vmax.f32 %v2219_v11, 0.0  ;;  %v4088_v59 = vld [vmem:[#allocation11 + $0x2b4] ss:$8 sps:$4 sm:$0xff]   ;;  %v4122_v62 = vld [vmem:[#allocation11 + $0x3f0] ss:$8 sps:$4 sm:$0xff]   ;;  %v753_v11 = vsub.s32 4, %v4368_v52 }
 0x240   :  { %v2181_v7 = vpop.f32.mrf.mxu0  ;;  %3293 = vmatprep.subr.bf16.mxu0 %v4058_v1  ;;  %v2224_v12 = vpop.f32.mrf.mxu1  ;;  %v4127_v0 = vld [vmem:[#allocation11 + $0x3e4] ss:$8 sps:$4 sm:$0xff]   ;;  %v4089_v1 = vld [vmem:[#allocation11 + $0x2a0] ss:$8 sps:$4 sm:$0xff]   ;;  %v4130_v4 = vld [vmem:[#allocation11 + $0x3d4] ss:$8 sps:$4 sm:$0xff]  }
 0x241   :  { %v2223_v9 = vadd.f32 %v2222_v5, %v2180_v6  ;;  %v2182_v10 = vadd.f32 %v2181_v7, %v750_v25  ;;  %v2402_v17 = vmax.f32 %v2221_v56, 0.0  ;;  %v4119_v25 = vld [vmem:[#allocation11 + $0x300] ss:$8 sps:$4 sm:$0xff]   ;;  %v4092_v5 = vld [vmem:[#allocation11 + $0x290] ss:$8 sps:$4 sm:$0xff]  }
 0x242   :  { %v4125_v2 = vld [vmem:[#allocation11 + $0x3e0] ss:$8 sps:$4 sm:$0xff]   ;;  %v4128_v6 = vld [vmem:[#allocation11 + $0x3d0] ss:$8 sps:$4 sm:$0xff]   ;;  %v4133_v7 = vld [vmem:[#allocation11 + $0x3c4] ss:$8 sps:$4 sm:$0xff]  }
 0x243   :  { %v2225_v13 = vadd.f32 %v2224_v12, %v2182_v10  ;;  %3294 = vmatpush1.bf16.msra.mxu0 %v4056_v54  ;;  %v2409_v15 = vmax.f32 %v2223_v9, 0.0  ;;  %v4097_v54 = vld [vmem:[#allocation11 + $0x284] ss:$8 sps:$4 sm:$0xff]   ;;  %v4131_v56 = vld [vmem:[#allocation11 + $0x3c0] ss:$8 sps:$4 sm:$0xff]   ;;  %v757_v10 = vsub.s32 5, %v4368_v52 }
 0x244   :  { %3295 = vmatprep.subr.bf16.mxu0 %v4061_v8  ;;  %v4095_v8 = vld [vmem:[#allocation11 + $0x280] ss:$8 sps:$4 sm:$0xff]   ;;  %v4136_v9 = vld [vmem:[#allocation11 + $0x3b4] ss:$8 sps:$4 sm:$0xff]   ;;  %v4134_v12 = vld [vmem:[#allocation11 + $0x3b0] ss:$8 sps:$4 sm:$0xff]  }
 0x245   :  { %v2410_v18 = vmax.f32 %v2225_v13, 0.0  ;;  %v2417_v30 = vpack.c.bf16 %v2409_v15, %v2401_v20  ;;  %v4139_v13 = vld [vmem:[#allocation11 + $0x3a4] ss:$8 sps:$4 sm:$0xff]   ;;  %v754_v15 = vrot.slane %v4409_v19, %v753_v11 }
 0x247   :  { %v2418_v21 = vpack.c.bf16 %v2410_v18, %v2402_v17  ;;  %3296 = vmatpush1.bf16.msra.mxu0 %v4059_v14  ;;  %v758_v14 = vrot.slane %v4409_v19, %v757_v10  ;;  %v4137_v18 = vld [vmem:[#allocation11 + $0x3a0] ss:$8 sps:$4 sm:$0xff]   ;;  %v4285_v10 = vmov 0  }
 0x248   :  { %3297 = vmatprep.subr.bf16.mxu0 %v4064_v16  ;;  %3889 = vset.pattern.permute.xlu1 %v4285_v10 }
 0x249   :  { %3278 = vmatprep.mubr.bf16.mxu1 %v2418_v21  ;;  %v4142_v21 = vld [vmem:[#allocation11 + $0x394] ss:$8 sps:$4 sm:$0xff]   ;;  %3890 = vset.pattern.permute.xlu0 %v4285_v10 }
 0x24a   :  { %3279 = vmatmul.mubr.bf16.vlgmr.msra.gmra.mxu1 %v2417_v30 }
 0x24b   :  { %3298 = vmatpush1.bf16.msra.mxu0 %v4062_v22  ;;  %3333 = vmatpush1.bf16.msra.mxu1 %v4098_v23 }
 0x24c   :  { %3299 = vmatprep.subr.bf16.mxu0 %v4067_v31  ;;  %3334 = vmatprep.subr.bf16.mxu1 %v4103_v32 }
 0x24f   :  { %3300 = vmatpush1.bf16.msra.mxu0 %v4065_v26  ;;  %3335 = vmatpush1.bf16.msra.mxu1 %v4101_v33  ;;  %v4140_v33 = vld [vmem:[#allocation11 + $0x390] ss:$8 sps:$4 sm:$0xff]  }
 0x250   :  { %3301 = vmatprep.subr.bf16.mxu0 %v4070_v34  ;;  %3336 = vmatprep.subr.bf16.mxu1 %v4106_v35  ;;  %v4145_v35 = vld [vmem:[#allocation11 + $0x384] ss:$8 sps:$4 sm:$0xff]  }
 0x253   :  { %3302 = vmatpush1.bf16.msra.mxu0 %v4068_v27  ;;  %3337 = vmatpush1.bf16.msra.mxu1 %v4104_v37 }
 0x254   :  { %3303 = vmatprep.subr.bf16.mxu0 %v4073_v29  ;;  %3338 = vmatprep.subr.bf16.mxu1 %v4109_v38 }
 0x257   :  { %3304 = vmatpush1.bf16.msra.mxu0 %v4071_v39  ;;  %3339 = vmatpush1.bf16.msra.mxu1 %v4107_v40 }
 0x258   :  { %3305 = vmatprep.subr.bf16.mxu0 %v4076_v41  ;;  %3340 = vmatprep.subr.bf16.mxu1 %v4112_v42  ;;  %v4143_v41 = vld [vmem:[#allocation11 + $0x380] ss:$8 sps:$4 sm:$0xff]  }
 0x25b   :  { %3306 = vmatpush2.bf16.msra.mxu0 %v4074_v43  ;;  %3341 = vmatpush1.bf16.msra.mxu1 %v4110_v44 }
 0x25c   :  { %3307 = vmatprep.subr.bf16.mxu0 %v4079_v45  ;;  %3342 = vmatprep.subr.bf16.mxu1 %v4115_v36 }
 0x25f   :  { %3308 = vmatpush2.bf16.msra.mxu0 %v4077_v46  ;;  %3343 = vmatpush1.bf16.msra.mxu1 %v4113_v47  ;;  %v765_v47 = vsub.s32 7, %v4368_v52 }
 0x260   :  { %3309 = vmatprep.subr.bf16.mxu0 %v4082_v48  ;;  %3344 = vmatprep.subr.bf16.mxu1 %v4118_v49  ;;  %v761_v48 = vsub.s32 6, %v4368_v52 }
 0x261   :  { %v766_v49 = vrot.slane %v4409_v19, %v765_v47 }
 0x263   :  { %3310 = vmatpush2.bf16.msra.mxu0 %v4080_v24  ;;  %3345 = vmatpush1.bf16.msra.mxu1 %v4116_v50  ;;  %v762_v24 = vrot.slane %v4409_v19, %v761_v48 }
 0x264   :  { %3311 = vmatprep.subr.bf16.mxu0 %v4085_v28  ;;  %3346 = vmatprep.subr.bf16.mxu1 %v4121_v57 }
 0x267   :  { %3312 = vmatpush2.bf16.msra.mxu0 %v4083_v58  ;;  %3347 = vmatpush1.bf16.msra.mxu1 %v4119_v25 }
 0x268   :  { %3313 = vmatprep.subr.bf16.mxu0 %v4088_v59  ;;  %3348 = vmatprep.subr.bf16.mxu1 %v4124_v60 }
 0x26b   :  { %3314 = vmatpush2.bf16.msra.mxu0 %v4086_v61  ;;  %3349 = vmatpush2.bf16.msra.mxu1 %v4122_v62 }
 0x26c   :  { %3315 = vmatprep.subr.bf16.mxu0 %v4091_v63  ;;  %3350 = vmatprep.subr.bf16.mxu1 %v4127_v0 }
 0x26f   :  { %3316 = vmatpush2.bf16.msra.mxu0 %v4089_v1  ;;  %3351 = vmatpush2.bf16.msra.mxu1 %v4125_v2 }
 0x270   :  { %3317 = vmatprep.subr.bf16.mxu0 %v4094_v3  ;;  %3352 = vmatprep.subr.bf16.mxu1 %v4130_v4 }
 0x273   :  { %3318 = vmatpush2.bf16.msra.mxu0 %v4092_v5  ;;  %3353 = vmatpush2.bf16.msra.mxu1 %v4128_v6 }
 0x274   :  { %3319 = vmatprep.subr.bf16.mxu0 %v4097_v54  ;;  %3354 = vmatprep.subr.bf16.mxu1 %v4133_v7 }
 0x277   :  { %3320 = vmatpush2.bf16.msra.mxu0 %v4095_v8  ;;  %3355 = vmatpush2.bf16.msra.mxu1 %v4131_v56 }
 0x278   :  { %3356 = vmatprep.subr.bf16.mxu1 %v4136_v9  ;;  %v3401_v9 = vld [vmem:[#allocation2] sm:$0x1] }
 0x279   :  { %3404 = vperm.xlu1 %3889, %v3401_v9  }
 0x27a   :  { %v2261_v16 = vpop.f32.mrf.mxu0 }
 0x27b   :  { %v2304_v17 = vpop.f32.mrf.mxu1  ;;  %3357 = vmatpush2.bf16.msra.mxu1 %v4134_v12  ;;  %v2262_v30 = vadd.f32 %v2261_v16, %v754_v15 }
 0x27c   :  { %v2263_v20 = vpop.f32.mrf.mxu0  ;;  %3358 = vmatprep.subr.bf16.mxu1 %v4139_v13 }
 0x27d   :  { %v2264_v22 = vadd.f32 %v2263_v20, %v758_v14  ;;  %v2306_v23 = vpop.f32.mrf.mxu1  ;;  %v2305_v38 = vadd.f32 %v2304_v17, %v2262_v30 }
 0x27e   :  { %v2265_v31 = vpop.f32.mrf.mxu0 }
 0x27f   :  { %v2266_v32 = vadd.f32 %v2265_v31, %v754_v15  ;;  %v2308_v26 = vpop.f32.mrf.mxu1  ;;  %3359 = vmatpush2.bf16.msra.mxu1 %v4137_v18  ;;  %v2307_v27 = vadd.f32 %v2306_v23, %v2264_v22  ;;  %v2403_v45 = vmax.f32 %v2305_v38, 0.0  ;;  %v2551_v15 = vld [vmem:[%s4466_s6] sm:$0x3]  ;;  %s4286_s6 = smov [#allocation12]  }
 0x280   :  { %v2267_v34 = vpop.f32.mrf.mxu0  ;;  %3360 = vmatprep.subr.bf16.mxu1 %v4142_v21  ;;  %v2556_v20 = vrot.slane %v2551_v15, %v4375_v55  ;;  %v2560_v21 = vrot.slane %v2551_v15, %v4371_v53 }
 0x281   :  { %v2309_v37 = vadd.f32 %v2308_v26, %v2266_v32  ;;  %v2268_v29 = vadd.f32 %v2267_v34, %v758_v14  ;;  %v2310_v39 = vpop.f32.mrf.mxu1  ;;  %v2404_v43 = vmax.f32 %v2307_v27, 0.0 }
 0x283   :  { %v2311_v40 = vadd.f32 %v2310_v39, %v2268_v29  ;;  %3361 = vmatpush2.bf16.msra.mxu1 %v4140_v33  ;;  %v2411_v42 = vmax.f32 %v2309_v37, 0.0  ;;  %v3379_v37 = vld [vmem:[%s4467_s7] sm:$0x3]  ;;  %s3437_s7 = sshll.u32 %s4286_s6, 4  ;;  %s3438_s7 = int_to_ptr.vmem [resolvable:$true] %s3437_s7 }
 0x284   :  { %3362 = vmatprep.subr.bf16.mxu1 %v4145_v35  ;;  %v3388_v48 = vrot.slane %v3379_v37, %v4371_v53  ;;  %s4246_s19 = scalar_lea.vmem %s3438_s7, 16  ;;  %s4250_s20 = scalar_lea.vmem %s3438_s7, 32 }
 0x285   :  { %v2412_v44 = vmax.f32 %v2311_v40, 0.0  ;;  %v2419_v46 = vpack.c.bf16 %v2411_v42, %v2403_v45  ;;  %v3384_v45 = vrot.slane %v3379_v37, %v4375_v55  ;;  %p4247_p11 = scmp.ne.s32.totalorder %s3438_s7, %s4246_s19  ;;  %p4251_p12 = scmp.lt.s32.totalorder %s3438_s7, %s3438_s7 }
 0x286   :  { %p4252_p13 = scmp.lt.s32.totalorder %s4250_s20, %s4246_s19 }
 0x287   :  { %v2420_v36 = vpack.c.bf16 %v2412_v44, %v2404_v43  ;;  %3363 = vmatpush2.bf16.msra.mxu1 %v4143_v41 }
 0x288   :  { %p4253_p0 = por %p4252_p13, %p4251_p12 }
 0x289   :  { %3321 = vmatprep.mubr.bf16.mxu0 %v2420_v36 }
 0x28a   :  { %3322 = vmatmul.mubr.bf16.vlgmr.msra.gmra.mxu0 %v2419_v46  ;;  %p4254_p1 = pnand %p4253_p0, %p4247_p11 }
 0x2ba   :  { %v2347_v50 = vpop.f32.mrf.mxu0 }
 0x2bb   :  { %v2390_v28 = vpop.f32.mrf.mxu1  ;;  %v2348_v59 = vadd.f32 %v2347_v50, %v762_v24 }
 0x2bc   :  { %v2349_v57 = vpop.f32.mrf.mxu0 }
 0x2bd   :  { %v2350_v58 = vadd.f32 %v2349_v57, %v766_v49  ;;  %v2392_v25 = vpop.f32.mrf.mxu1  ;;  %v2391_v3 = vadd.f32 %v2390_v28, %v2348_v59 }
 0x2be   :  { %v2351_v60 = vpop.f32.mrf.mxu0 }
 0x2bf   :  { %v2352_v61 = vadd.f32 %v2351_v60, %v762_v24  ;;  %v2394_v62 = vpop.f32.mrf.mxu1  ;;  %v2393_v0 = vadd.f32 %v2392_v25, %v2350_v58  ;;  %v2405_v19 = vmax.f32 %v2391_v3, 0.0  ;;  %v3416_v3 = vand.u32 127, %v146_v51 }
 0x2c0   :  { %v2353_v63 = vpop.f32.mrf.mxu0 }
 0x2c1   :  { %v2395_v1 = vadd.f32 %v2394_v62, %v2352_v61  ;;  %v2354_v2 = vadd.f32 %v2353_v63, %v766_v49  ;;  %v2396_v4 = vpop.f32.mrf.mxu1  ;;  %v2406_v54 = vmax.f32 %v2393_v0, 0.0 }
 0x2c3   :  { %v2397_v5 = vadd.f32 %v2396_v4, %v2354_v2  ;;  %v2413_v6 = vmax.f32 %v2395_v1, 0.0  ;;  %v3421_v4 = vadd.s32 4294967288, %v3416_v3 }
 0x2c5   :  { %v2414_v7 = vmax.f32 %v2397_v5, 0.0  ;;  %v2421_v56 = vpack.c.bf16 %v2413_v6, %v2405_v19  ;;  %v3419_v6 = vsub.s32 %v3416_v3, %v4368_v52 }
 0x2c7   :  { %v2422_v8 = vpack.c.bf16 %v2414_v7, %v2406_v54  ;;  %v3424_v7 = vsub.s32 %v3421_v4, %v4368_v52 }
 0x2c9   :  { %3364 = vmatprep.mubr.bf16.mxu1 %v2422_v8 }
 0x2ca   :  { %3365 = vmatmul.mubr.bf16.vlgmr.msra.gmra.mxu1 %v2421_v56 }
 0x2f4   :  { %v3405_v2 = vpop.permute.xlu1 %3404 }
 0x2f5   :  { %v3410_v53 = vrot.slane %v3405_v2, %v4375_v55 }
 0x2fa   :  { %v3237_v11 = vpop.f32.mrf.mxu0 }
 0x2fb   :  { %v3238_v30 = vadd.f32 %v3237_v11, %v2556_v20 }
 0x2fc   :  { %v3239_v12 = vpop.f32.mrf.mxu0 }
 0x2fd   :  { %v3240_v31 = vadd.f32 %v3239_v12, %v2560_v21 }
 0x2fe   :  { %v3241_v13 = vpop.f32.mrf.mxu0 }
 0x2ff   :  { %v3242_v34 = vadd.f32 %v3241_v13, %v2556_v20 }
 0x300   :  { %v3243_v16 = vpop.f32.mrf.mxu0 }
 0x301   :  { %v3244_v29 = vadd.f32 %v3243_v16, %v2560_v21 }
 0x30a   :  { %v3280_v14 = vpop.f32.mrf.mxu1 }
 0x30b   :  { %v3281_v32 = vadd.f32 %v3280_v14, %v3238_v30 }
 0x30c   :  { %v3282_v17 = vpop.f32.mrf.mxu1 }
 0x30d   :  { %v3283_v35 = vadd.f32 %v3282_v17, %v3240_v31 }
 0x30e   :  { %v3284_v22 = vpop.f32.mrf.mxu1 }
 0x30f   :  { %v3285_v39 = vadd.f32 %v3284_v22, %v3242_v34 }
 0x310   :  { %v3286_v26 = vpop.f32.mrf.mxu1 }
 0x311   :  { %v3287_v42 = vadd.f32 %v3286_v26, %v3244_v29 }
 0x34a   :  { %v3323_v18 = vpop.f32.mrf.mxu0 }
 0x34b   :  { %v3324_v27 = vadd.f32 %v3323_v18, %v3281_v32 }
 0x34c   :  { %v3325_v23 = vpop.f32.mrf.mxu0 }
 0x34d   :  { %v3326_v40 = vadd.f32 %v3325_v23, %v3283_v35 }
 0x34e   :  { %v3327_v33 = vpop.f32.mrf.mxu0 }
 0x34f   :  { %v3328_v36 = vadd.f32 %v3327_v33, %v3285_v39 }
 0x350   :  { %v3329_v43 = vpop.f32.mrf.mxu0 }
 0x351   :  { %v3330_v24 = vadd.f32 %v3329_v43, %v3287_v42 }
 0x38a   :  { %v3366_v38 = vpop.f32.mrf.mxu1 }
 0x38b   :  { %v3367_v41 = vadd.f32 %v3366_v38, %v3324_v27 }
 0x38c   :  { %v3368_v44 = vpop.f32.mrf.mxu1 }
 0x38d   :  { %v3375_v46 = vmax.f32 %v3367_v41, 0.0  ;;  %v3369_v47 = vadd.f32 %v3368_v44, %v3326_v40 }
 0x38e   :  { %v3370_v49 = vpop.f32.mrf.mxu1 }
 0x38f   :  { %v3376_v50 = vmax.f32 %v3369_v47, 0.0  ;;  %v3371_v28 = vadd.f32 %v3370_v49, %v3328_v36  ;;  %v3391_v59 = vmul.f32 %v3384_v45, %v3375_v46 }
 0x390   :  { %v3372_v57 = vpop.f32.mrf.mxu1 }
 0x391   :  { %v3377_v58 = vmax.f32 %v3371_v28, 0.0  ;;  %v3373_v25 = vadd.f32 %v3372_v57, %v3330_v24  ;;  %v3392_v60 = vmul.f32 %v3388_v48, %v3376_v50 }
 0x393   :  { %v3378_v61 = vmax.f32 %v3373_v25, 0.0  ;;  %v3395_v62 = vadd.f32 %v3392_v60, %v3391_v59  ;;  %v3393_v63 = vmul.f32 %v3384_v45, %v3377_v58 }
 0x395   :  { %v3394_v0 = vmul.f32 %v3388_v48, %v3378_v61  ;;  %3396 = vadd.xlane.f32.xlu0 %v3395_v62 }
 0x397   :  { %v3398_v1 = vadd.f32 %v3394_v0, %v3393_v63 }
 0x399   :  { %3399 = vadd.xlane.f32.xlu0 %v3398_v1 }
 0x41e   :  { %v3397_v5 = vpop.xlane.xlu0 %3396 }
 0x41f   :  { %v3411_v54 = vadd.f32 %v3410_v53, %v3397_v5 }
 0x421   :  { %v3420_v56 = vrot.slane %v3411_v54, %v3419_v6 }
 0x422   :  { %v3400_v19 = vpop.xlane.xlu0 %3399 }
 0x423   :  { %v3412_v8 = vadd.f32 %v3410_v53, %v3400_v19 }
 0x425   :  { %v3425_v9 = vrot.slane %v3412_v8, %v3424_v7 }
 0x427   :  { %v3427_v10 = vsel %vm3426_vm1, %v3425_v9, %v3420_v56 }
 0x428   :  { %3430 = vst.msk [vmem:[#allocation12] sm:$0x1] %vm3429_vm2, %v3427_v10 }
 0x429   :  { %4257 = shalt.err (!%p4254_p1)
}
 0x42a   :  { %3440 = dma.vmem_to_hbm [thread:$0]  %s3438_s7, 16, %s4469_s9, [#allocation5]  }
 0x42b   :  { %4272 = dma.done.wait [#allocation5], 16  }
 0x42c   :  { %4273 = vsyncadd [#allocation5], 4294967280 }
 0x42d   :  { %3444 = vsyncpa [#allocation4], 1 }
 0x42e   :  { %3445 = vsyncpa [#allocation7], 1 }
 0x42f   :  { %3446 = vsyncpa [#allocation10], 1 }
 0x430   :  { %3447 = vsyncpa [#allocation5], 1 }

</bundles_post_ra>
